<compile_context>
chip_gen: v7x
topology: tpu7x:2x2x1
jax: 0.10.0
libtpu: 0.0.40
codegen_flags: <defaults>
</compile_context>

<pallas_src>
import jax
import jax.numpy as jnp
from jax import lax
from jax.experimental import pallas as pl
from jax.experimental.pallas import tpu as pltpu


# ----------------------------------------------------------------------------
# Fused Pallas kernel: 2 bidirectional LSTM layers + FC head
# ----------------------------------------------------------------------------
def _brnn_kernel(x_ref,
                 w0f_ih_ref, w0f_hh_ref, b0f_ref,
                 w0b_ih_ref, w0b_hh_ref, b0b_ref,
                 w1f_ih_ref, w1f_hh_ref, b1f_ref,
                 w1b_ih_ref, w1b_hh_ref, b1b_ref,
                 fcw_ref, fcb_ref,
                 out_ref,
                 p_scr, l1_scr, l2_scr):
    """Everything VMEM-resident; time-major rows (row index = t*B + b).

    x_ref    : (T*B, Din)  bf16
    w*_ih    : (Din_l, 4H) bf16 (transposed input->hidden weights)
    w*_hh    : (H, 4H)     bf16 (transposed hidden->hidden weights)
    b*       : (1, 4H)     f32  (b_ih + b_hh)
    fcw_ref  : (T, 2H, C)  bf16 (fc weight, time-major view)
    fcb_ref  : (1, C)      f32
    out_ref  : (B, C)      f32
    p_scr    : (T*B, 4H)   f32  gate pre-activations (reused per direction)
    l1_scr   : (T*B, 2H)   f32  layer-1 output, [fwd | bwd] along lanes
    l2_scr   : (T*B, 2H)   f32  layer-2 output, [fwd | bwd] along lanes
    """
    B, C = out_ref.shape
    H = w0f_hh_ref.shape[0]
    T = x_ref.shape[0] // B

    def run_direction(whh_ref, out_scr, lane_off, reverse):
        """One direction of one layer; gate pre-activations come from p_scr."""
        whh = whh_ref[...]                               # hoisted (H, 4H) bf16
        h = jnp.zeros((B, H), jnp.float32)
        c = jnp.zeros((B, H), jnp.float32)
        steps = range(T - 1, -1, -1) if reverse else range(T)
        for t in steps:                  # static unroll: T is small & fixed
            row = t * B                  # compile-time constant offset
            gates = p_scr[pl.ds(row, B), :] + jnp.dot(
                h.astype(jnp.bfloat16), whh,
                preferred_element_type=jnp.float32)      # (B, 4H) f32
            # PyTorch gate order i, f, g, o: sigmoid everywhere except the
            # g block (lanes [2H:3H]) which gets tanh -- one EUP pass each
            # plus a lane-iota select, then slice the activated row.
            sig = jax.nn.sigmoid(gates)
            tnh = jnp.tanh(gates)
            lane = lax.broadcasted_iota(jnp.int32, gates.shape, 1)
            act = jnp.where((lane >= 2 * H) & (lane < 3 * H), tnh, sig)
            i_g = act[:, 0 * H:1 * H]
            f_g = act[:, 1 * H:2 * H]
            g_g = act[:, 2 * H:3 * H]
            o_g = act[:, 3 * H:4 * H]
            c = f_g * c + i_g * g_g
            h = o_g * jnp.tanh(c)
            out_scr[pl.ds(row, B), pl.ds(lane_off, H)] = h

    # ---- layer 0 -----------------------------------------------------------
    x = x_ref[...]                                       # (T*B, Din) bf16
    p_scr[...] = jnp.dot(x, w0f_ih_ref[...],
                         preferred_element_type=jnp.float32) + b0f_ref[...]
    run_direction(w0f_hh_ref, l1_scr, 0, reverse=False)
    p_scr[...] = jnp.dot(x, w0b_ih_ref[...],
                         preferred_element_type=jnp.float32) + b0b_ref[...]
    run_direction(w0b_hh_ref, l1_scr, H, reverse=True)

    # ---- layer 1 (input = [fwd | bwd] of layer 0) ---------------------------
    l1 = l1_scr[...].astype(jnp.bfloat16)                # (T*B, 2H)
    p_scr[...] = jnp.dot(l1, w1f_ih_ref[...],
                         preferred_element_type=jnp.float32) + b1f_ref[...]
    run_direction(w1f_hh_ref, l2_scr, 0, reverse=False)
    p_scr[...] = jnp.dot(l1, w1b_ih_ref[...],
                         preferred_element_type=jnp.float32) + b1b_ref[...]
    run_direction(w1b_hh_ref, l2_scr, H, reverse=True)

    # ---- FC head:  flat(B, T*2H) @ W  ==  sum_t out[:, t, :] @ W3[t] --------
    acc = jnp.zeros((B, C), jnp.float32)
    for t in range(T):
        h_t = l2_scr[pl.ds(t * B, B), :].astype(jnp.bfloat16)   # (B, 2H)
        acc = acc + jnp.dot(h_t, fcw_ref[t],
                            preferred_element_type=jnp.float32)
    out_ref[...] = (acc + fcb_ref[...]).astype(out_ref.dtype)


# ----------------------------------------------------------------------------
# Wrapper
# ----------------------------------------------------------------------------
@jax.jit
def brnn_forward(x, params):
    """x: (B, T, D_in) batch-first, like the PyTorch module."""
    B, T, Din = x.shape
    lyr0, lyr1 = params["lstm"]
    H = lyr0["whh_T_f"].shape[0]
    C = params["fc_b"].shape[-1]

    # time-major, flattened so row index = t*B + b; bf16 MXU operand.
    x2d = jnp.transpose(x, (1, 0, 2)).reshape(T * B, Din).astype(jnp.bfloat16)
    # fc weight viewed time-major so the (T*B, 2H) buffer is contracted
    # without a transpose:  flat[b] @ W  ==  sum_t out[b, t, :] @ W3[t]
    fcw3 = params["fc_w_T"].reshape(T, 2 * H, C)

    return pl.pallas_call(
        _brnn_kernel,
        out_shape=jax.ShapeDtypeStruct((B, C), jnp.float32),
        scratch_shapes=[
            pltpu.VMEM((T * B, 4 * H), jnp.float32),   # gate pre-activations
            pltpu.VMEM((T * B, 2 * H), jnp.float32),   # layer-1 out [fwd|bwd]
            pltpu.VMEM((T * B, 2 * H), jnp.float32),   # layer-2 out [fwd|bwd]
        ],
    )(x2d,
      lyr0["wih_T_f"], lyr0["whh_T_f"], lyr0["b_f"],
      lyr0["wih_T_b"], lyr0["whh_T_b"], lyr0["b_b"],
      lyr1["wih_T_f"], lyr1["whh_T_f"], lyr1["b_f"],
      lyr1["wih_T_b"], lyr1["whh_T_b"], lyr1["b_b"],
      fcw3, params["fc_b"])


# ----------------------------------------------------------------------------
# Deterministic parameter init (PyTorch-style uniform(-1/sqrt(H), 1/sqrt(H)))
# Weights stored in bf16 (MXU operands), biases / state in f32.
# ----------------------------------------------------------------------------
def init_params(key, input_size, hidden_size, num_layers, num_classes, seq_len):
    H = hidden_size
    bound = 1.0 / jnp.sqrt(jnp.float32(H))
    layers = []
    for layer in range(num_layers):
        d_in = input_size if layer == 0 else 2 * H
        ps = {}
        for tag in ("f", "b"):
            key, k1, k2, k3, k4 = jax.random.split(key, 5)
            wih = jax.random.uniform(k1, (4 * H, d_in), jnp.float32, -bound, bound)
            whh = jax.random.uniform(k2, (4 * H, H), jnp.float32, -bound, bound)
            bih = jax.random.uniform(k3, (4 * H,), jnp.float32, -bound, bound)
            bhh = jax.random.uniform(k4, (4 * H,), jnp.float32, -bound, bound)
            ps[f"wih_T_{tag}"] = wih.T.astype(jnp.bfloat16)      # (d_in, 4H)
            ps[f"whh_T_{tag}"] = whh.T.astype(jnp.bfloat16)      # (H, 4H)
            ps[f"b_{tag}"] = (bih + bhh).reshape(1, 4 * H)       # f32
        layers.append(ps)

    fc_in = hidden_size * seq_len * 2
    fc_bound = 1.0 / jnp.sqrt(jnp.float32(fc_in))
    key, k1, k2 = jax.random.split(key, 3)
    fc_w = jax.random.uniform(k1, (num_classes, fc_in), jnp.float32,
                              -fc_bound, fc_bound)
    fc_b = jax.random.uniform(k2, (num_classes,), jnp.float32,
                              -fc_bound, fc_bound)
    return {
        "lstm": layers,
        "fc_w_T": fc_w.T.astype(jnp.bfloat16),   # (fc_in, num_classes)
        "fc_b": fc_b.reshape(1, num_classes),    # f32
    }


# ----------------------------------------------------------------------------
# Pure-JAX reference (same math: bf16 MXU operands, f32 accumulation/state).
# ----------------------------------------------------------------------------
def _ref_lstm_dir(x_tm, wih_T, whh_T, bias, reverse):
    T, B, _ = x_tm.shape
    H = whh_T.shape[0]
    xs = x_tm[::-1] if reverse else x_tm

    def step(carry, x_t):
        h, c = carry
        g = (jnp.dot(x_t.astype(jnp.bfloat16), wih_T,
                     preferred_element_type=jnp.float32)
             + jnp.dot(h.astype(jnp.bfloat16), whh_T,
                       preferred_element_type=jnp.float32)
             + bias)
        i = jax.nn.sigmoid(g[:, 0 * H:1 * H])
        f = jax.nn.sigmoid(g[:, 1 * H:2 * H])
        gg = jnp.tanh(g[:, 2 * H:3 * H])
        o = jax.nn.sigmoid(g[:, 3 * H:4 * H])
        c = f * c + i * gg
        h = o * jnp.tanh(c)
        return (h, c), h

    init = (jnp.zeros((B, H), jnp.float32), jnp.zeros((B, H), jnp.float32))
    _, hs = jax.lax.scan(step, init, xs)
    return hs[::-1] if reverse else hs


def brnn_reference(x, params):
    x_tm = jnp.transpose(x, (1, 0, 2)).astype(jnp.float32)
    layer_in = x_tm
    for layer in params["lstm"]:
        hf = _ref_lstm_dir(layer_in, layer["wih_T_f"], layer["whh_T_f"],
                           layer["b_f"], False)
        hb = _ref_lstm_dir(layer_in, layer["wih_T_b"], layer["whh_T_b"],
                           layer["b_b"], True)
        layer_in = jnp.concatenate([hf, hb], axis=-1)
    out_bf = jnp.transpose(layer_in, (1, 0, 2))
    flat = out_bf.reshape(out_bf.shape[0], -1)
    return (jnp.dot(flat.astype(jnp.bfloat16), params["fc_w_T"],
                    preferred_element_type=jnp.float32)
            + params["fc_b"])


# ----------------------------------------------------------------------------
if __name__ == "__main__":
    # Small, module-consistent shapes.
    batch = 2
    seq_len = 8
    input_size = 16
    hidden_size = 32
    num_layers = 2
    num_classes = 10

    key = jax.random.PRNGKey(0)
    key, kx, kp = jax.random.split(key, 3)
    x = jax.random.normal(kx, (batch, seq_len, input_size), jnp.float32)
    params = init_params(kp, input_size, hidden_size, num_layers,
                         num_classes, seq_len)

    out = jax.block_until_ready(brnn_forward(x, params))
    ref = jax.block_until_ready(brnn_reference(x, params))

    assert out.shape == (batch, num_classes), out.shape
    assert jnp.allclose(out, ref, atol=2e-3, rtol=2e-3), (
        "mismatch vs. pure-JAX reference; max abs diff = "
        f"{float(jnp.max(jnp.abs(out - ref)))}")

    print("KERNEL_OK")
</pallas_src>

<mosaic_0001>
module attributes {stable_mosaic.version = 11 : i64} {
  func.func @_brnn_kernel(%arg0: memref<16x16xbf16, #tpu.memory_space<vmem>>, %arg1: memref<16x128xbf16, #tpu.memory_space<vmem>>, %arg2: memref<32x128xbf16, #tpu.memory_space<vmem>>, %arg3: memref<1x128xf32, #tpu.memory_space<vmem>>, %arg4: memref<16x128xbf16, #tpu.memory_space<vmem>>, %arg5: memref<32x128xbf16, #tpu.memory_space<vmem>>, %arg6: memref<1x128xf32, #tpu.memory_space<vmem>>, %arg7: memref<64x128xbf16, #tpu.memory_space<vmem>>, %arg8: memref<32x128xbf16, #tpu.memory_space<vmem>>, %arg9: memref<1x128xf32, #tpu.memory_space<vmem>>, %arg10: memref<64x128xbf16, #tpu.memory_space<vmem>>, %arg11: memref<32x128xbf16, #tpu.memory_space<vmem>>, %arg12: memref<1x128xf32, #tpu.memory_space<vmem>>, %arg13: memref<8x64x10xbf16, #tpu.memory_space<vmem>>, %arg14: memref<1x10xf32, #tpu.memory_space<vmem>>, %arg15: memref<2x10xf32, #tpu.memory_space<vmem>>, %arg16: memref<16x128xf32, #tpu.memory_space<vmem>>, %arg17: memref<16x64xf32, #tpu.memory_space<vmem>>, %arg18: memref<16x64xf32, #tpu.memory_space<vmem>>) attributes {dimension_semantics = [], scalar_prefetch = 0 : i64, scratch_operands = 3 : i64, tpu.core_type = #tpu.core_type<tc>} {
    %c0 = arith.constant 0 : index
    %c0_0 = arith.constant 0 : index
    %0 = vector.load %arg0[%c0, %c0_0] : memref<16x16xbf16, #tpu.memory_space<vmem>>, vector<16x16xbf16>
    %c0_1 = arith.constant 0 : index
    %c0_2 = arith.constant 0 : index
    %1 = vector.load %arg1[%c0_1, %c0_2] : memref<16x128xbf16, #tpu.memory_space<vmem>>, vector<16x128xbf16>
    %cst = arith.constant dense<0.000000e+00> : vector<16x128xf32>
    %2 = tpu.matmul %0, %1, %cst {dimension_numbers = #tpu.dot_dimension_numbers<[1], [0], [0], [1], [0, 0, 1, 1], [], []>} : vector<16x16xbf16>, vector<16x128xbf16>, vector<16x128xf32> -> vector<16x128xf32>
    %c0_3 = arith.constant 0 : index
    %c0_4 = arith.constant 0 : index
    %3 = vector.load %arg3[%c0_3, %c0_4] : memref<1x128xf32, #tpu.memory_space<vmem>>, vector<1x128xf32>
    %4 = vector.broadcast %3 : vector<1x128xf32> to vector<16x128xf32>
    %5 = arith.addf %2, %4 : vector<16x128xf32>
    %c0_5 = arith.constant 0 : index
    %c0_6 = arith.constant 0 : index
    %6 = vector.load %arg16[%c0_5, %c0_6] : memref<16x128xf32, #tpu.memory_space<vmem>>, vector<16x128xf32>
    tpu.vector_store %arg16[%c0_5, %c0_6], %5 {strides = array<i32>} : memref<16x128xf32, #tpu.memory_space<vmem>>, vector<16x128xf32>,
    %c0_7 = arith.constant 0 : index
    %c0_8 = arith.constant 0 : index
    %7 = vector.load %arg2[%c0_7, %c0_8] : memref<32x128xbf16, #tpu.memory_space<vmem>>, vector<32x128xbf16>
    %cst_9 = arith.constant 0.000000e+00 : f32
    %8 = vector.broadcast %cst_9 : f32 to vector<2x32xf32>
    %cst_10 = arith.constant 0.000000e+00 : f32
    %9 = vector.broadcast %cst_10 : f32 to vector<2x32xf32>
    %c0_11 = arith.constant 0 : index
    %c0_12 = arith.constant 0 : index
    %10 = vector.load %arg16[%c0_11, %c0_12] : memref<16x128xf32, #tpu.memory_space<vmem>>, vector<2x128xf32>
    %11 = arith.truncf %8 : vector<2x32xf32> to vector<2x32xbf16>
    %cst_13 = arith.constant dense<0.000000e+00> : vector<2x128xf32>
    %12 = tpu.matmul %11, %7, %cst_13 {dimension_numbers = #tpu.dot_dimension_numbers<[1], [0], [0], [1], [0, 0, 1, 1], [], []>} : vector<2x32xbf16>, vector<32x128xbf16>, vector<2x128xf32> -> vector<2x128xf32>
    %13 = arith.addf %10, %12 : vector<2x128xf32>
    %14 = arith.negf %13 : vector<2x128xf32>
    %15 = math.exp %14 : vector<2x128xf32>
    %cst_14 = arith.constant 1.000000e+00 : f32
    %16 = vector.broadcast %cst_14 : f32 to vector<2x128xf32>
    %17 = arith.addf %16, %15 : vector<2x128xf32>
    %18 = arith.divf %16, %17 : vector<2x128xf32>
    %19 = math.tanh %13 : vector<2x128xf32>
    %20 = tpu.iota {dimensions = array<i32: 1>} : vector<2x128xi32>
    %c64_i32 = arith.constant 64 : i32
    %21 = vector.broadcast %c64_i32 : i32 to vector<2x128xi32>
    %22 = arith.cmpi sge, %20, %21 : vector<2x128xi32>
    %c96_i32 = arith.constant 96 : i32
    %23 = vector.broadcast %c96_i32 : i32 to vector<2x128xi32>
    %24 = arith.cmpi slt, %20, %23 : vector<2x128xi32>
    %25 = arith.andi %22, %24 : vector<2x128xi1>
    %26 = arith.select %25, %19, %18 : vector<2x128xi1>, vector<2x128xf32>
    %27 = vector.extract_strided_slice %26 {offsets = [0, 0], sizes = [2, 32], strides = [1, 1]} : vector<2x128xf32> to vector<2x32xf32>
    %28 = vector.extract_strided_slice %26 {offsets = [0, 32], sizes = [2, 32], strides = [1, 1]} : vector<2x128xf32> to vector<2x32xf32>
    %29 = vector.extract_strided_slice %26 {offsets = [0, 64], sizes = [2, 32], strides = [1, 1]} : vector<2x128xf32> to vector<2x32xf32>
    %30 = vector.extract_strided_slice %26 {offsets = [0, 96], sizes = [2, 32], strides = [1, 1]} : vector<2x128xf32> to vector<2x32xf32>
    %31 = arith.mulf %28, %9 : vector<2x32xf32>
    %32 = arith.mulf %27, %29 : vector<2x32xf32>
    %33 = arith.addf %31, %32 : vector<2x32xf32>
    %34 = math.tanh %33 : vector<2x32xf32>
    %35 = arith.mulf %30, %34 : vector<2x32xf32>
    %c0_15 = arith.constant 0 : index
    %c0_16 = arith.constant 0 : index
    %36 = vector.load %arg17[%c0_15, %c0_16] : memref<16x64xf32, #tpu.memory_space<vmem>>, vector<2x32xf32>
    tpu.vector_store %arg17[%c0_15, %c0_16], %35 {strides = array<i32>} : memref<16x64xf32, #tpu.memory_space<vmem>>, vector<2x32xf32>,
    %c2 = arith.constant 2 : index
    %c0_17 = arith.constant 0 : index
    %37 = vector.load %arg16[%c2, %c0_17] : memref<16x128xf32, #tpu.memory_space<vmem>>, vector<2x128xf32>
    %38 = arith.truncf %35 : vector<2x32xf32> to vector<2x32xbf16>
    %cst_18 = arith.constant dense<0.000000e+00> : vector<2x128xf32>
    %39 = tpu.matmul %38, %7, %cst_18 {dimension_numbers = #tpu.dot_dimension_numbers<[1], [0], [0], [1], [0, 0, 1, 1], [], []>} : vector<2x32xbf16>, vector<32x128xbf16>, vector<2x128xf32> -> vector<2x128xf32>
    %40 = arith.addf %37, %39 : vector<2x128xf32>
    %41 = arith.negf %40 : vector<2x128xf32>
    %42 = math.exp %41 : vector<2x128xf32>
    %cst_19 = arith.constant 1.000000e+00 : f32
    %43 = vector.broadcast %cst_19 : f32 to vector<2x128xf32>
    %44 = arith.addf %43, %42 : vector<2x128xf32>
    %45 = arith.divf %43, %44 : vector<2x128xf32>
    %46 = math.tanh %40 : vector<2x128xf32>
    %47 = tpu.iota {dimensions = array<i32: 1>} : vector<2x128xi32>
    %c64_i32_20 = arith.constant 64 : i32
    %48 = vector.broadcast %c64_i32_20 : i32 to vector<2x128xi32>
    %49 = arith.cmpi sge, %47, %48 : vector<2x128xi32>
    %c96_i32_21 = arith.constant 96 : i32
    %50 = vector.broadcast %c96_i32_21 : i32 to vector<2x128xi32>
    %51 = arith.cmpi slt, %47, %50 : vector<2x128xi32>
    %52 = arith.andi %49, %51 : vector<2x128xi1>
    %53 = arith.select %52, %46, %45 : vector<2x128xi1>, vector<2x128xf32>
    %54 = vector.extract_strided_slice %53 {offsets = [0, 0], sizes = [2, 32], strides = [1, 1]} : vector<2x128xf32> to vector<2x32xf32>
    %55 = vector.extract_strided_slice %53 {offsets = [0, 32], sizes = [2, 32], strides = [1, 1]} : vector<2x128xf32> to vector<2x32xf32>
    %56 = vector.extract_strided_slice %53 {offsets = [0, 64], sizes = [2, 32], strides = [1, 1]} : vector<2x128xf32> to vector<2x32xf32>
    %57 = vector.extract_strided_slice %53 {offsets = [0, 96], sizes = [2, 32], strides = [1, 1]} : vector<2x128xf32> to vector<2x32xf32>
    %58 = arith.mulf %55, %33 : vector<2x32xf32>
    %59 = arith.mulf %54, %56 : vector<2x32xf32>
    %60 = arith.addf %58, %59 : vector<2x32xf32>
    %61 = math.tanh %60 : vector<2x32xf32>
    %62 = arith.mulf %57, %61 : vector<2x32xf32>
    %c2_22 = arith.constant 2 : index
    %c0_23 = arith.constant 0 : index
    %63 = vector.load %arg17[%c2_22, %c0_23] : memref<16x64xf32, #tpu.memory_space<vmem>>, vector<2x32xf32>
    tpu.vector_store %arg17[%c2_22, %c0_23], %62 {strides = array<i32>} : memref<16x64xf32, #tpu.memory_space<vmem>>, vector<2x32xf32>,
    %c4 = arith.constant 4 : index
    %c0_24 = arith.constant 0 : index
    %64 = vector.load %arg16[%c4, %c0_24] : memref<16x128xf32, #tpu.memory_space<vmem>>, vector<2x128xf32>
    %65 = arith.truncf %62 : vector<2x32xf32> to vector<2x32xbf16>
    %cst_25 = arith.constant dense<0.000000e+00> : vector<2x128xf32>
    %66 = tpu.matmul %65, %7, %cst_25 {dimension_numbers = #tpu.dot_dimension_numbers<[1], [0], [0], [1], [0, 0, 1, 1], [], []>} : vector<2x32xbf16>, vector<32x128xbf16>, vector<2x128xf32> -> vector<2x128xf32>
    %67 = arith.addf %64, %66 : vector<2x128xf32>
    %68 = arith.negf %67 : vector<2x128xf32>
    %69 = math.exp %68 : vector<2x128xf32>
    %cst_26 = arith.constant 1.000000e+00 : f32
    %70 = vector.broadcast %cst_26 : f32 to vector<2x128xf32>
    %71 = arith.addf %70, %69 : vector<2x128xf32>
    %72 = arith.divf %70, %71 : vector<2x128xf32>
    %73 = math.tanh %67 : vector<2x128xf32>
    %74 = tpu.iota {dimensions = array<i32: 1>} : vector<2x128xi32>
    %c64_i32_27 = arith.constant 64 : i32
    %75 = vector.broadcast %c64_i32_27 : i32 to vector<2x128xi32>
    %76 = arith.cmpi sge, %74, %75 : vector<2x128xi32>
    %c96_i32_28 = arith.constant 96 : i32
    %77 = vector.broadcast %c96_i32_28 : i32 to vector<2x128xi32>
    %78 = arith.cmpi slt, %74, %77 : vector<2x128xi32>
    %79 = arith.andi %76, %78 : vector<2x128xi1>
    %80 = arith.select %79, %73, %72 : vector<2x128xi1>, vector<2x128xf32>
    %81 = vector.extract_strided_slice %80 {offsets = [0, 0], sizes = [2, 32], strides = [1, 1]} : vector<2x128xf32> to vector<2x32xf32>
    %82 = vector.extract_strided_slice %80 {offsets = [0, 32], sizes = [2, 32], strides = [1, 1]} : vector<2x128xf32> to vector<2x32xf32>
    %83 = vector.extract_strided_slice %80 {offsets = [0, 64], sizes = [2, 32], strides = [1, 1]} : vector<2x128xf32> to vector<2x32xf32>
    %84 = vector.extract_strided_slice %80 {offsets = [0, 96], sizes = [2, 32], strides = [1, 1]} : vector<2x128xf32> to vector<2x32xf32>
    %85 = arith.mulf %82, %60 : vector<2x32xf32>
    %86 = arith.mulf %81, %83 : vector<2x32xf32>
    %87 = arith.addf %85, %86 : vector<2x32xf32>
    %88 = math.tanh %87 : vector<2x32xf32>
    %89 = arith.mulf %84, %88 : vector<2x32xf32>
    %c4_29 = arith.constant 4 : index
    %c0_30 = arith.constant 0 : index
    %90 = vector.load %arg17[%c4_29, %c0_30] : memref<16x64xf32, #tpu.memory_space<vmem>>, vector<2x32xf32>
    tpu.vector_store %arg17[%c4_29, %c0_30], %89 {strides = array<i32>} : memref<16x64xf32, #tpu.memory_space<vmem>>, vector<2x32xf32>,
    %c6 = arith.constant 6 : index
    %c0_31 = arith.constant 0 : index
    %91 = vector.load %arg16[%c6, %c0_31] : memref<16x128xf32, #tpu.memory_space<vmem>>, vector<2x128xf32>
    %92 = arith.truncf %89 : vector<2x32xf32> to vector<2x32xbf16>
    %cst_32 = arith.constant dense<0.000000e+00> : vector<2x128xf32>
    %93 = tpu.matmul %92, %7, %cst_32 {dimension_numbers = #tpu.dot_dimension_numbers<[1], [0], [0], [1], [0, 0, 1, 1], [], []>} : vector<2x32xbf16>, vector<32x128xbf16>, vector<2x128xf32> -> vector<2x128xf32>
    %94 = arith.addf %91, %93 : vector<2x128xf32>
    %95 = arith.negf %94 : vector<2x128xf32>
    %96 = math.exp %95 : vector<2x128xf32>
    %cst_33 = arith.constant 1.000000e+00 : f32
    %97 = vector.broadcast %cst_33 : f32 to vector<2x128xf32>
    %98 = arith.addf %97, %96 : vector<2x128xf32>
    %99 = arith.divf %97, %98 : vector<2x128xf32>
    %100 = math.tanh %94 : vector<2x128xf32>
    %101 = tpu.iota {dimensions = array<i32: 1>} : vector<2x128xi32>
    %c64_i32_34 = arith.constant 64 : i32
    %102 = vector.broadcast %c64_i32_34 : i32 to vector<2x128xi32>
    %103 = arith.cmpi sge, %101, %102 : vector<2x128xi32>
    %c96_i32_35 = arith.constant 96 : i32
    %104 = vector.broadcast %c96_i32_35 : i32 to vector<2x128xi32>
    %105 = arith.cmpi slt, %101, %104 : vector<2x128xi32>
    %106 = arith.andi %103, %105 : vector<2x128xi1>
    %107 = arith.select %106, %100, %99 : vector<2x128xi1>, vector<2x128xf32>
    %108 = vector.extract_strided_slice %107 {offsets = [0, 0], sizes = [2, 32], strides = [1, 1]} : vector<2x128xf32> to vector<2x32xf32>
    %109 = vector.extract_strided_slice %107 {offsets = [0, 32], sizes = [2, 32], strides = [1, 1]} : vector<2x128xf32> to vector<2x32xf32>
    %110 = vector.extract_strided_slice %107 {offsets = [0, 64], sizes = [2, 32], strides = [1, 1]} : vector<2x128xf32> to vector<2x32xf32>
    %111 = vector.extract_strided_slice %107 {offsets = [0, 96], sizes = [2, 32], strides = [1, 1]} : vector<2x128xf32> to vector<2x32xf32>
    %112 = arith.mulf %109, %87 : vector<2x32xf32>
    %113 = arith.mulf %108, %110 : vector<2x32xf32>
    %114 = arith.addf %112, %113 : vector<2x32xf32>
    %115 = math.tanh %114 : vector<2x32xf32>
    %116 = arith.mulf %111, %115 : vector<2x32xf32>
    %c6_36 = arith.constant 6 : index
    %c0_37 = arith.constant 0 : index
    %117 = vector.load %arg17[%c6_36, %c0_37] : memref<16x64xf32, #tpu.memory_space<vmem>>, vector<2x32xf32>
    tpu.vector_store %arg17[%c6_36, %c0_37], %116 {strides = array<i32>} : memref<16x64xf32, #tpu.memory_space<vmem>>, vector<2x32xf32>,
    %c8 = arith.constant 8 : index
    %c0_38 = arith.constant 0 : index
    %118 = vector.load %arg16[%c8, %c0_38] : memref<16x128xf32, #tpu.memory_space<vmem>>, vector<2x128xf32>
    %119 = arith.truncf %116 : vector<2x32xf32> to vector<2x32xbf16>
    %cst_39 = arith.constant dense<0.000000e+00> : vector<2x128xf32>
    %120 = tpu.matmul %119, %7, %cst_39 {dimension_numbers = #tpu.dot_dimension_numbers<[1], [0], [0], [1], [0, 0, 1, 1], [], []>} : vector<2x32xbf16>, vector<32x128xbf16>, vector<2x128xf32> -> vector<2x128xf32>
    %121 = arith.addf %118, %120 : vector<2x128xf32>
    %122 = arith.negf %121 : vector<2x128xf32>
    %123 = math.exp %122 : vector<2x128xf32>
    %cst_40 = arith.constant 1.000000e+00 : f32
    %124 = vector.broadcast %cst_40 : f32 to vector<2x128xf32>
    %125 = arith.addf %124, %123 : vector<2x128xf32>
    %126 = arith.divf %124, %125 : vector<2x128xf32>
    %127 = math.tanh %121 : vector<2x128xf32>
    %128 = tpu.iota {dimensions = array<i32: 1>} : vector<2x128xi32>
    %c64_i32_41 = arith.constant 64 : i32
    %129 = vector.broadcast %c64_i32_41 : i32 to vector<2x128xi32>
    %130 = arith.cmpi sge, %128, %129 : vector<2x128xi32>
    %c96_i32_42 = arith.constant 96 : i32
    %131 = vector.broadcast %c96_i32_42 : i32 to vector<2x128xi32>
    %132 = arith.cmpi slt, %128, %131 : vector<2x128xi32>
    %133 = arith.andi %130, %132 : vector<2x128xi1>
    %134 = arith.select %133, %127, %126 : vector<2x128xi1>, vector<2x128xf32>
    %135 = vector.extract_strided_slice %134 {offsets = [0, 0], sizes = [2, 32], strides = [1, 1]} : vector<2x128xf32> to vector<2x32xf32>
    %136 = vector.extract_strided_slice %134 {offsets = [0, 32], sizes = [2, 32], strides = [1, 1]} : vector<2x128xf32> to vector<2x32xf32>
    %137 = vector.extract_strided_slice %134 {offsets = [0, 64], sizes = [2, 32], strides = [1, 1]} : vector<2x128xf32> to vector<2x32xf32>
    %138 = vector.extract_strided_slice %134 {offsets = [0, 96], sizes = [2, 32], strides = [1, 1]} : vector<2x128xf32> to vector<2x32xf32>
    %139 = arith.mulf %136, %114 : vector<2x32xf32>
    %140 = arith.mulf %135, %137 : vector<2x32xf32>
    %141 = arith.addf %139, %140 : vector<2x32xf32>
    %142 = math.tanh %141 : vector<2x32xf32>
    %143 = arith.mulf %138, %142 : vector<2x32xf32>
    %c8_43 = arith.constant 8 : index
    %c0_44 = arith.constant 0 : index
    %144 = vector.load %arg17[%c8_43, %c0_44] : memref<16x64xf32, #tpu.memory_space<vmem>>, vector<2x32xf32>
    tpu.vector_store %arg17[%c8_43, %c0_44], %143 {strides = array<i32>} : memref<16x64xf32, #tpu.memory_space<vmem>>, vector<2x32xf32>,
    %c10 = arith.constant 10 : index
    %c0_45 = arith.constant 0 : index
    %145 = vector.load %arg16[%c10, %c0_45] : memref<16x128xf32, #tpu.memory_space<vmem>>, vector<2x128xf32>
    %146 = arith.truncf %143 : vector<2x32xf32> to vector<2x32xbf16>
    %cst_46 = arith.constant dense<0.000000e+00> : vector<2x128xf32>
    %147 = tpu.matmul %146, %7, %cst_46 {dimension_numbers = #tpu.dot_dimension_numbers<[1], [0], [0], [1], [0, 0, 1, 1], [], []>} : vector<2x32xbf16>, vector<32x128xbf16>, vector<2x128xf32> -> vector<2x128xf32>
    %148 = arith.addf %145, %147 : vector<2x128xf32>
    %149 = arith.negf %148 : vector<2x128xf32>
    %150 = math.exp %149 : vector<2x128xf32>
    %cst_47 = arith.constant 1.000000e+00 : f32
    %151 = vector.broadcast %cst_47 : f32 to vector<2x128xf32>
    %152 = arith.addf %151, %150 : vector<2x128xf32>
    %153 = arith.divf %151, %152 : vector<2x128xf32>
    %154 = math.tanh %148 : vector<2x128xf32>
    %155 = tpu.iota {dimensions = array<i32: 1>} : vector<2x128xi32>
    %c64_i32_48 = arith.constant 64 : i32
    %156 = vector.broadcast %c64_i32_48 : i32 to vector<2x128xi32>
    %157 = arith.cmpi sge, %155, %156 : vector<2x128xi32>
    %c96_i32_49 = arith.constant 96 : i32
    %158 = vector.broadcast %c96_i32_49 : i32 to vector<2x128xi32>
    %159 = arith.cmpi slt, %155, %158 : vector<2x128xi32>
    %160 = arith.andi %157, %159 : vector<2x128xi1>
    %161 = arith.select %160, %154, %153 : vector<2x128xi1>, vector<2x128xf32>
    %162 = vector.extract_strided_slice %161 {offsets = [0, 0], sizes = [2, 32], strides = [1, 1]} : vector<2x128xf32> to vector<2x32xf32>
    %163 = vector.extract_strided_slice %161 {offsets = [0, 32], sizes = [2, 32], strides = [1, 1]} : vector<2x128xf32> to vector<2x32xf32>
    %164 = vector.extract_strided_slice %161 {offsets = [0, 64], sizes = [2, 32], strides = [1, 1]} : vector<2x128xf32> to vector<2x32xf32>
    %165 = vector.extract_strided_slice %161 {offsets = [0, 96], sizes = [2, 32], strides = [1, 1]} : vector<2x128xf32> to vector<2x32xf32>
    %166 = arith.mulf %163, %141 : vector<2x32xf32>
    %167 = arith.mulf %162, %164 : vector<2x32xf32>
    %168 = arith.addf %166, %167 : vector<2x32xf32>
    %169 = math.tanh %168 : vector<2x32xf32>
    %170 = arith.mulf %165, %169 : vector<2x32xf32>
    %c10_50 = arith.constant 10 : index
    %c0_51 = arith.constant 0 : index
    %171 = vector.load %arg17[%c10_50, %c0_51] : memref<16x64xf32, #tpu.memory_space<vmem>>, vector<2x32xf32>
    tpu.vector_store %arg17[%c10_50, %c0_51], %170 {strides = array<i32>} : memref<16x64xf32, #tpu.memory_space<vmem>>, vector<2x32xf32>,
    %c12 = arith.constant 12 : index
    %c0_52 = arith.constant 0 : index
    %172 = vector.load %arg16[%c12, %c0_52] : memref<16x128xf32, #tpu.memory_space<vmem>>, vector<2x128xf32>
    %173 = arith.truncf %170 : vector<2x32xf32> to vector<2x32xbf16>
    %cst_53 = arith.constant dense<0.000000e+00> : vector<2x128xf32>
    %174 = tpu.matmul %173, %7, %cst_53 {dimension_numbers = #tpu.dot_dimension_numbers<[1], [0], [0], [1], [0, 0, 1, 1], [], []>} : vector<2x32xbf16>, vector<32x128xbf16>, vector<2x128xf32> -> vector<2x128xf32>
    %175 = arith.addf %172, %174 : vector<2x128xf32>
    %176 = arith.negf %175 : vector<2x128xf32>
    %177 = math.exp %176 : vector<2x128xf32>
    %cst_54 = arith.constant 1.000000e+00 : f32
    %178 = vector.broadcast %cst_54 : f32 to vector<2x128xf32>
    %179 = arith.addf %178, %177 : vector<2x128xf32>
    %180 = arith.divf %178, %179 : vector<2x128xf32>
    %181 = math.tanh %175 : vector<2x128xf32>
    %182 = tpu.iota {dimensions = array<i32: 1>} : vector<2x128xi32>
    %c64_i32_55 = arith.constant 64 : i32
    %183 = vector.broadcast %c64_i32_55 : i32 to vector<2x128xi32>
    %184 = arith.cmpi sge, %182, %183 : vector<2x128xi32>
    %c96_i32_56 = arith.constant 96 : i32
    %185 = vector.broadcast %c96_i32_56 : i32 to vector<2x128xi32>
    %186 = arith.cmpi slt, %182, %185 : vector<2x128xi32>
    %187 = arith.andi %184, %186 : vector<2x128xi1>
    %188 = arith.select %187, %181, %180 : vector<2x128xi1>, vector<2x128xf32>
    %189 = vector.extract_strided_slice %188 {offsets = [0, 0], sizes = [2, 32], strides = [1, 1]} : vector<2x128xf32> to vector<2x32xf32>
    %190 = vector.extract_strided_slice %188 {offsets = [0, 32], sizes = [2, 32], strides = [1, 1]} : vector<2x128xf32> to vector<2x32xf32>
    %191 = vector.extract_strided_slice %188 {offsets = [0, 64], sizes = [2, 32], strides = [1, 1]} : vector<2x128xf32> to vector<2x32xf32>
    %192 = vector.extract_strided_slice %188 {offsets = [0, 96], sizes = [2, 32], strides = [1, 1]} : vector<2x128xf32> to vector<2x32xf32>
    %193 = arith.mulf %190, %168 : vector<2x32xf32>
    %194 = arith.mulf %189, %191 : vector<2x32xf32>
    %195 = arith.addf %193, %194 : vector<2x32xf32>
    %196 = math.tanh %195 : vector<2x32xf32>
    %197 = arith.mulf %192, %196 : vector<2x32xf32>
    %c12_57 = arith.constant 12 : index
    %c0_58 = arith.constant 0 : index
    %198 = vector.load %arg17[%c12_57, %c0_58] : memref<16x64xf32, #tpu.memory_space<vmem>>, vector<2x32xf32>
    tpu.vector_store %arg17[%c12_57, %c0_58], %197 {strides = array<i32>} : memref<16x64xf32, #tpu.memory_space<vmem>>, vector<2x32xf32>,
    %c14 = arith.constant 14 : index
    %c0_59 = arith.constant 0 : index
    %199 = vector.load %arg16[%c14, %c0_59] : memref<16x128xf32, #tpu.memory_space<vmem>>, vector<2x128xf32>
    %200 = arith.truncf %197 : vector<2x32xf32> to vector<2x32xbf16>
    %cst_60 = arith.constant dense<0.000000e+00> : vector<2x128xf32>
    %201 = tpu.matmul %200, %7, %cst_60 {dimension_numbers = #tpu.dot_dimension_numbers<[1], [0], [0], [1], [0, 0, 1, 1], [], []>} : vector<2x32xbf16>, vector<32x128xbf16>, vector<2x128xf32> -> vector<2x128xf32>
    %202 = arith.addf %199, %201 : vector<2x128xf32>
    %203 = arith.negf %202 : vector<2x128xf32>
    %204 = math.exp %203 : vector<2x128xf32>
    %cst_61 = arith.constant 1.000000e+00 : f32
    %205 = vector.broadcast %cst_61 : f32 to vector<2x128xf32>
    %206 = arith.addf %205, %204 : vector<2x128xf32>
    %207 = arith.divf %205, %206 : vector<2x128xf32>
    %208 = math.tanh %202 : vector<2x128xf32>
    %209 = tpu.iota {dimensions = array<i32: 1>} : vector<2x128xi32>
    %c64_i32_62 = arith.constant 64 : i32
    %210 = vector.broadcast %c64_i32_62 : i32 to vector<2x128xi32>
    %211 = arith.cmpi sge, %209, %210 : vector<2x128xi32>
    %c96_i32_63 = arith.constant 96 : i32
    %212 = vector.broadcast %c96_i32_63 : i32 to vector<2x128xi32>
    %213 = arith.cmpi slt, %209, %212 : vector<2x128xi32>
    %214 = arith.andi %211, %213 : vector<2x128xi1>
    %215 = arith.select %214, %208, %207 : vector<2x128xi1>, vector<2x128xf32>
    %216 = vector.extract_strided_slice %215 {offsets = [0, 0], sizes = [2, 32], strides = [1, 1]} : vector<2x128xf32> to vector<2x32xf32>
    %217 = vector.extract_strided_slice %215 {offsets = [0, 32], sizes = [2, 32], strides = [1, 1]} : vector<2x128xf32> to vector<2x32xf32>
    %218 = vector.extract_strided_slice %215 {offsets = [0, 64], sizes = [2, 32], strides = [1, 1]} : vector<2x128xf32> to vector<2x32xf32>
    %219 = vector.extract_strided_slice %215 {offsets = [0, 96], sizes = [2, 32], strides = [1, 1]} : vector<2x128xf32> to vector<2x32xf32>
    %220 = arith.mulf %217, %195 : vector<2x32xf32>
    %221 = arith.mulf %216, %218 : vector<2x32xf32>
    %222 = arith.addf %220, %221 : vector<2x32xf32>
    %223 = math.tanh %222 : vector<2x32xf32>
    %224 = arith.mulf %219, %223 : vector<2x32xf32>
    %c14_64 = arith.constant 14 : index
    %c0_65 = arith.constant 0 : index
    %225 = vector.load %arg17[%c14_64, %c0_65] : memref<16x64xf32, #tpu.memory_space<vmem>>, vector<2x32xf32>
    tpu.vector_store %arg17[%c14_64, %c0_65], %224 {strides = array<i32>} : memref<16x64xf32, #tpu.memory_space<vmem>>, vector<2x32xf32>,
    %c0_66 = arith.constant 0 : index
    %c0_67 = arith.constant 0 : index
    %226 = vector.load %arg4[%c0_66, %c0_67] : memref<16x128xbf16, #tpu.memory_space<vmem>>, vector<16x128xbf16>
    %cst_68 = arith.constant dense<0.000000e+00> : vector<16x128xf32>
    %227 = tpu.matmul %0, %226, %cst_68 {dimension_numbers = #tpu.dot_dimension_numbers<[1], [0], [0], [1], [0, 0, 1, 1], [], []>} : vector<16x16xbf16>, vector<16x128xbf16>, vector<16x128xf32> -> vector<16x128xf32>
    %c0_69 = arith.constant 0 : index
    %c0_70 = arith.constant 0 : index
    %228 = vector.load %arg6[%c0_69, %c0_70] : memref<1x128xf32, #tpu.memory_space<vmem>>, vector<1x128xf32>
    %229 = vector.broadcast %228 : vector<1x128xf32> to vector<16x128xf32>
    %230 = arith.addf %227, %229 : vector<16x128xf32>
    %c0_71 = arith.constant 0 : index
    %c0_72 = arith.constant 0 : index
    %231 = vector.load %arg16[%c0_71, %c0_72] : memref<16x128xf32, #tpu.memory_space<vmem>>, vector<16x128xf32>
    tpu.vector_store %arg16[%c0_71, %c0_72], %230 {strides = array<i32>} : memref<16x128xf32, #tpu.memory_space<vmem>>, vector<16x128xf32>,
    %c0_73 = arith.constant 0 : index
    %c0_74 = arith.constant 0 : index
    %232 = vector.load %arg5[%c0_73, %c0_74] : memref<32x128xbf16, #tpu.memory_space<vmem>>, vector<32x128xbf16>
    %cst_75 = arith.constant 0.000000e+00 : f32
    %233 = vector.broadcast %cst_75 : f32 to vector<2x32xf32>
    %cst_76 = arith.constant 0.000000e+00 : f32
    %234 = vector.broadcast %cst_76 : f32 to vector<2x32xf32>
    %c14_77 = arith.constant 14 : index
    %c0_78 = arith.constant 0 : index
    %235 = vector.load %arg16[%c14_77, %c0_78] : memref<16x128xf32, #tpu.memory_space<vmem>>, vector<2x128xf32>
    %236 = arith.truncf %233 : vector<2x32xf32> to vector<2x32xbf16>
    %cst_79 = arith.constant dense<0.000000e+00> : vector<2x128xf32>
    %237 = tpu.matmul %236, %232, %cst_79 {dimension_numbers = #tpu.dot_dimension_numbers<[1], [0], [0], [1], [0, 0, 1, 1], [], []>} : vector<2x32xbf16>, vector<32x128xbf16>, vector<2x128xf32> -> vector<2x128xf32>
    %238 = arith.addf %235, %237 : vector<2x128xf32>
    %239 = arith.negf %238 : vector<2x128xf32>
    %240 = math.exp %239 : vector<2x128xf32>
    %cst_80 = arith.constant 1.000000e+00 : f32
    %241 = vector.broadcast %cst_80 : f32 to vector<2x128xf32>
    %242 = arith.addf %241, %240 : vector<2x128xf32>
    %243 = arith.divf %241, %242 : vector<2x128xf32>
    %244 = math.tanh %238 : vector<2x128xf32>
    %245 = tpu.iota {dimensions = array<i32: 1>} : vector<2x128xi32>
    %c64_i32_81 = arith.constant 64 : i32
    %246 = vector.broadcast %c64_i32_81 : i32 to vector<2x128xi32>
    %247 = arith.cmpi sge, %245, %246 : vector<2x128xi32>
    %c96_i32_82 = arith.constant 96 : i32
    %248 = vector.broadcast %c96_i32_82 : i32 to vector<2x128xi32>
    %249 = arith.cmpi slt, %245, %248 : vector<2x128xi32>
    %250 = arith.andi %247, %249 : vector<2x128xi1>
    %251 = arith.select %250, %244, %243 : vector<2x128xi1>, vector<2x128xf32>
    %252 = vector.extract_strided_slice %251 {offsets = [0, 0], sizes = [2, 32], strides = [1, 1]} : vector<2x128xf32> to vector<2x32xf32>
    %253 = vector.extract_strided_slice %251 {offsets = [0, 32], sizes = [2, 32], strides = [1, 1]} : vector<2x128xf32> to vector<2x32xf32>
    %254 = vector.extract_strided_slice %251 {offsets = [0, 64], sizes = [2, 32], strides = [1, 1]} : vector<2x128xf32> to vector<2x32xf32>
    %255 = vector.extract_strided_slice %251 {offsets = [0, 96], sizes = [2, 32], strides = [1, 1]} : vector<2x128xf32> to vector<2x32xf32>
    %256 = arith.mulf %253, %234 : vector<2x32xf32>
    %257 = arith.mulf %252, %254 : vector<2x32xf32>
    %258 = arith.addf %256, %257 : vector<2x32xf32>
    %259 = math.tanh %258 : vector<2x32xf32>
    %260 = arith.mulf %255, %259 : vector<2x32xf32>
    %c14_83 = arith.constant 14 : index
    %c32 = arith.constant 32 : index
    %261 = vector.load %arg17[%c14_83, %c32] : memref<16x64xf32, #tpu.memory_space<vmem>>, vector<2x32xf32>
    tpu.vector_store %arg17[%c14_83, %c32], %260 {strides = array<i32>} : memref<16x64xf32, #tpu.memory_space<vmem>>, vector<2x32xf32>,
    %c12_84 = arith.constant 12 : index
    %c0_85 = arith.constant 0 : index
    %262 = vector.load %arg16[%c12_84, %c0_85] : memref<16x128xf32, #tpu.memory_space<vmem>>, vector<2x128xf32>
    %263 = arith.truncf %260 : vector<2x32xf32> to vector<2x32xbf16>
    %cst_86 = arith.constant dense<0.000000e+00> : vector<2x128xf32>
    %264 = tpu.matmul %263, %232, %cst_86 {dimension_numbers = #tpu.dot_dimension_numbers<[1], [0], [0], [1], [0, 0, 1, 1], [], []>} : vector<2x32xbf16>, vector<32x128xbf16>, vector<2x128xf32> -> vector<2x128xf32>
    %265 = arith.addf %262, %264 : vector<2x128xf32>
    %266 = arith.negf %265 : vector<2x128xf32>
    %267 = math.exp %266 : vector<2x128xf32>
    %cst_87 = arith.constant 1.000000e+00 : f32
    %268 = vector.broadcast %cst_87 : f32 to vector<2x128xf32>
    %269 = arith.addf %268, %267 : vector<2x128xf32>
    %270 = arith.divf %268, %269 : vector<2x128xf32>
    %271 = math.tanh %265 : vector<2x128xf32>
    %272 = tpu.iota {dimensions = array<i32: 1>} : vector<2x128xi32>
    %c64_i32_88 = arith.constant 64 : i32
    %273 = vector.broadcast %c64_i32_88 : i32 to vector<2x128xi32>
    %274 = arith.cmpi sge, %272, %273 : vector<2x128xi32>
    %c96_i32_89 = arith.constant 96 : i32
    %275 = vector.broadcast %c96_i32_89 : i32 to vector<2x128xi32>
    %276 = arith.cmpi slt, %272, %275 : vector<2x128xi32>
    %277 = arith.andi %274, %276 : vector<2x128xi1>
    %278 = arith.select %277, %271, %270 : vector<2x128xi1>, vector<2x128xf32>
    %279 = vector.extract_strided_slice %278 {offsets = [0, 0], sizes = [2, 32], strides = [1, 1]} : vector<2x128xf32> to vector<2x32xf32>
    %280 = vector.extract_strided_slice %278 {offsets = [0, 32], sizes = [2, 32], strides = [1, 1]} : vector<2x128xf32> to vector<2x32xf32>
    %281 = vector.extract_strided_slice %278 {offsets = [0, 64], sizes = [2, 32], strides = [1, 1]} : vector<2x128xf32> to vector<2x32xf32>
    %282 = vector.extract_strided_slice %278 {offsets = [0, 96], sizes = [2, 32], strides = [1, 1]} : vector<2x128xf32> to vector<2x32xf32>
    %283 = arith.mulf %280, %258 : vector<2x32xf32>
    %284 = arith.mulf %279, %281 : vector<2x32xf32>
    %285 = arith.addf %283, %284 : vector<2x32xf32>
    %286 = math.tanh %285 : vector<2x32xf32>
    %287 = arith.mulf %282, %286 : vector<2x32xf32>
    %c12_90 = arith.constant 12 : index
    %c32_91 = arith.constant 32 : index
    %288 = vector.load %arg17[%c12_90, %c32_91] : memref<16x64xf32, #tpu.memory_space<vmem>>, vector<2x32xf32>
    tpu.vector_store %arg17[%c12_90, %c32_91], %287 {strides = array<i32>} : memref<16x64xf32, #tpu.memory_space<vmem>>, vector<2x32xf32>,
    %c10_92 = arith.constant 10 : index
    %c0_93 = arith.constant 0 : index
    %289 = vector.load %arg16[%c10_92, %c0_93] : memref<16x128xf32, #tpu.memory_space<vmem>>, vector<2x128xf32>
    %290 = arith.truncf %287 : vector<2x32xf32> to vector<2x32xbf16>
    %cst_94 = arith.constant dense<0.000000e+00> : vector<2x128xf32>
    %291 = tpu.matmul %290, %232, %cst_94 {dimension_numbers = #tpu.dot_dimension_numbers<[1], [0], [0], [1], [0, 0, 1, 1], [], []>} : vector<2x32xbf16>, vector<32x128xbf16>, vector<2x128xf32> -> vector<2x128xf32>
    %292 = arith.addf %289, %291 : vector<2x128xf32>
    %293 = arith.negf %292 : vector<2x128xf32>
    %294 = math.exp %293 : vector<2x128xf32>
    %cst_95 = arith.constant 1.000000e+00 : f32
    %295 = vector.broadcast %cst_95 : f32 to vector<2x128xf32>
    %296 = arith.addf %295, %294 : vector<2x128xf32>
    %297 = arith.divf %295, %296 : vector<2x128xf32>
    %298 = math.tanh %292 : vector<2x128xf32>
    %299 = tpu.iota {dimensions = array<i32: 1>} : vector<2x128xi32>
    %c64_i32_96 = arith.constant 64 : i32
    %300 = vector.broadcast %c64_i32_96 : i32 to vector<2x128xi32>
    %301 = arith.cmpi sge, %299, %300 : vector<2x128xi32>
    %c96_i32_97 = arith.constant 96 : i32
    %302 = vector.broadcast %c96_i32_97 : i32 to vector<2x128xi32>
    %303 = arith.cmpi slt, %299, %302 : vector<2x128xi32>
    %304 = arith.andi %301, %303 : vector<2x128xi1>
    %305 = arith.select %304, %298, %297 : vector<2x128xi1>, vector<2x128xf32>
    %306 = vector.extract_strided_slice %305 {offsets = [0, 0], sizes = [2, 32], strides = [1, 1]} : vector<2x128xf32> to vector<2x32xf32>
    %307 = vector.extract_strided_slice %305 {offsets = [0, 32], sizes = [2, 32], strides = [1, 1]} : vector<2x128xf32> to vector<2x32xf32>
    %308 = vector.extract_strided_slice %305 {offsets = [0, 64], sizes = [2, 32], strides = [1, 1]} : vector<2x128xf32> to vector<2x32xf32>
    %309 = vector.extract_strided_slice %305 {offsets = [0, 96], sizes = [2, 32], strides = [1, 1]} : vector<2x128xf32> to vector<2x32xf32>
    %310 = arith.mulf %307, %285 : vector<2x32xf32>
    %311 = arith.mulf %306, %308 : vector<2x32xf32>
    %312 = arith.addf %310, %311 : vector<2x32xf32>
    %313 = math.tanh %312 : vector<2x32xf32>
    %314 = arith.mulf %309, %313 : vector<2x32xf32>
    %c10_98 = arith.constant 10 : index
    %c32_99 = arith.constant 32 : index
    %315 = vector.load %arg17[%c10_98, %c32_99] : memref<16x64xf32, #tpu.memory_space<vmem>>, vector<2x32xf32>
    tpu.vector_store %arg17[%c10_98, %c32_99], %314 {strides = array<i32>} : memref<16x64xf32, #tpu.memory_space<vmem>>, vector<2x32xf32>,
    %c8_100 = arith.constant 8 : index
    %c0_101 = arith.constant 0 : index
    %316 = vector.load %arg16[%c8_100, %c0_101] : memref<16x128xf32, #tpu.memory_space<vmem>>, vector<2x128xf32>
    %317 = arith.truncf %314 : vector<2x32xf32> to vector<2x32xbf16>
    %cst_102 = arith.constant dense<0.000000e+00> : vector<2x128xf32>
    %318 = tpu.matmul %317, %232, %cst_102 {dimension_numbers = #tpu.dot_dimension_numbers<[1], [0], [0], [1], [0, 0, 1, 1], [], []>} : vector<2x32xbf16>, vector<32x128xbf16>, vector<2x128xf32> -> vector<2x128xf32>
    %319 = arith.addf %316, %318 : vector<2x128xf32>
    %320 = arith.negf %319 : vector<2x128xf32>
    %321 = math.exp %320 : vector<2x128xf32>
    %cst_103 = arith.constant 1.000000e+00 : f32
    %322 = vector.broadcast %cst_103 : f32 to vector<2x128xf32>
    %323 = arith.addf %322, %321 : vector<2x128xf32>
    %324 = arith.divf %322, %323 : vector<2x128xf32>
    %325 = math.tanh %319 : vector<2x128xf32>
    %326 = tpu.iota {dimensions = array<i32: 1>} : vector<2x128xi32>
    %c64_i32_104 = arith.constant 64 : i32
    %327 = vector.broadcast %c64_i32_104 : i32 to vector<2x128xi32>
    %328 = arith.cmpi sge, %326, %327 : vector<2x128xi32>
    %c96_i32_105 = arith.constant 96 : i32
    %329 = vector.broadcast %c96_i32_105 : i32 to vector<2x128xi32>
    %330 = arith.cmpi slt, %326, %329 : vector<2x128xi32>
    %331 = arith.andi %328, %330 : vector<2x128xi1>
    %332 = arith.select %331, %325, %324 : vector<2x128xi1>, vector<2x128xf32>
    %333 = vector.extract_strided_slice %332 {offsets = [0, 0], sizes = [2, 32], strides = [1, 1]} : vector<2x128xf32> to vector<2x32xf32>
    %334 = vector.extract_strided_slice %332 {offsets = [0, 32], sizes = [2, 32], strides = [1, 1]} : vector<2x128xf32> to vector<2x32xf32>
    %335 = vector.extract_strided_slice %332 {offsets = [0, 64], sizes = [2, 32], strides = [1, 1]} : vector<2x128xf32> to vector<2x32xf32>
    %336 = vector.extract_strided_slice %332 {offsets = [0, 96], sizes = [2, 32], strides = [1, 1]} : vector<2x128xf32> to vector<2x32xf32>
    %337 = arith.mulf %334, %312 : vector<2x32xf32>
    %338 = arith.mulf %333, %335 : vector<2x32xf32>
    %339 = arith.addf %337, %338 : vector<2x32xf32>
    %340 = math.tanh %339 : vector<2x32xf32>
    %341 = arith.mulf %336, %340 : vector<2x32xf32>
    %c8_106 = arith.constant 8 : index
    %c32_107 = arith.constant 32 : index
    %342 = vector.load %arg17[%c8_106, %c32_107] : memref<16x64xf32, #tpu.memory_space<vmem>>, vector<2x32xf32>
    tpu.vector_store %arg17[%c8_106, %c32_107], %341 {strides = array<i32>} : memref<16x64xf32, #tpu.memory_space<vmem>>, vector<2x32xf32>,
    %c6_108 = arith.constant 6 : index
    %c0_109 = arith.constant 0 : index
    %343 = vector.load %arg16[%c6_108, %c0_109] : memref<16x128xf32, #tpu.memory_space<vmem>>, vector<2x128xf32>
    %344 = arith.truncf %341 : vector<2x32xf32> to vector<2x32xbf16>
    %cst_110 = arith.constant dense<0.000000e+00> : vector<2x128xf32>
    %345 = tpu.matmul %344, %232, %cst_110 {dimension_numbers = #tpu.dot_dimension_numbers<[1], [0], [0], [1], [0, 0, 1, 1], [], []>} : vector<2x32xbf16>, vector<32x128xbf16>, vector<2x128xf32> -> vector<2x128xf32>
    %346 = arith.addf %343, %345 : vector<2x128xf32>
    %347 = arith.negf %346 : vector<2x128xf32>
    %348 = math.exp %347 : vector<2x128xf32>
    %cst_111 = arith.constant 1.000000e+00 : f32
    %349 = vector.broadcast %cst_111 : f32 to vector<2x128xf32>
    %350 = arith.addf %349, %348 : vector<2x128xf32>
    %351 = arith.divf %349, %350 : vector<2x128xf32>
    %352 = math.tanh %346 : vector<2x128xf32>
    %353 = tpu.iota {dimensions = array<i32: 1>} : vector<2x128xi32>
    %c64_i32_112 = arith.constant 64 : i32
    %354 = vector.broadcast %c64_i32_112 : i32 to vector<2x128xi32>
    %355 = arith.cmpi sge, %353, %354 : vector<2x128xi32>
    %c96_i32_113 = arith.constant 96 : i32
    %356 = vector.broadcast %c96_i32_113 : i32 to vector<2x128xi32>
    %357 = arith.cmpi slt, %353, %356 : vector<2x128xi32>
    %358 = arith.andi %355, %357 : vector<2x128xi1>
    %359 = arith.select %358, %352, %351 : vector<2x128xi1>, vector<2x128xf32>
    %360 = vector.extract_strided_slice %359 {offsets = [0, 0], sizes = [2, 32], strides = [1, 1]} : vector<2x128xf32> to vector<2x32xf32>
    %361 = vector.extract_strided_slice %359 {offsets = [0, 32], sizes = [2, 32], strides = [1, 1]} : vector<2x128xf32> to vector<2x32xf32>
    %362 = vector.extract_strided_slice %359 {offsets = [0, 64], sizes = [2, 32], strides = [1, 1]} : vector<2x128xf32> to vector<2x32xf32>
    %363 = vector.extract_strided_slice %359 {offsets = [0, 96], sizes = [2, 32], strides = [1, 1]} : vector<2x128xf32> to vector<2x32xf32>
    %364 = arith.mulf %361, %339 : vector<2x32xf32>
    %365 = arith.mulf %360, %362 : vector<2x32xf32>
    %366 = arith.addf %364, %365 : vector<2x32xf32>
    %367 = math.tanh %366 : vector<2x32xf32>
    %368 = arith.mulf %363, %367 : vector<2x32xf32>
    %c6_114 = arith.constant 6 : index
    %c32_115 = arith.constant 32 : index
    %369 = vector.load %arg17[%c6_114, %c32_115] : memref<16x64xf32, #tpu.memory_space<vmem>>, vector<2x32xf32>
    tpu.vector_store %arg17[%c6_114, %c32_115], %368 {strides = array<i32>} : memref<16x64xf32, #tpu.memory_space<vmem>>, vector<2x32xf32>,
    %c4_116 = arith.constant 4 : index
    %c0_117 = arith.constant 0 : index
    %370 = vector.load %arg16[%c4_116, %c0_117] : memref<16x128xf32, #tpu.memory_space<vmem>>, vector<2x128xf32>
    %371 = arith.truncf %368 : vector<2x32xf32> to vector<2x32xbf16>
    %cst_118 = arith.constant dense<0.000000e+00> : vector<2x128xf32>
    %372 = tpu.matmul %371, %232, %cst_118 {dimension_numbers = #tpu.dot_dimension_numbers<[1], [0], [0], [1], [0, 0, 1, 1], [], []>} : vector<2x32xbf16>, vector<32x128xbf16>, vector<2x128xf32> -> vector<2x128xf32>
    %373 = arith.addf %370, %372 : vector<2x128xf32>
    %374 = arith.negf %373 : vector<2x128xf32>
    %375 = math.exp %374 : vector<2x128xf32>
    %cst_119 = arith.constant 1.000000e+00 : f32
    %376 = vector.broadcast %cst_119 : f32 to vector<2x128xf32>
    %377 = arith.addf %376, %375 : vector<2x128xf32>
    %378 = arith.divf %376, %377 : vector<2x128xf32>
    %379 = math.tanh %373 : vector<2x128xf32>
    %380 = tpu.iota {dimensions = array<i32: 1>} : vector<2x128xi32>
    %c64_i32_120 = arith.constant 64 : i32
    %381 = vector.broadcast %c64_i32_120 : i32 to vector<2x128xi32>
    %382 = arith.cmpi sge, %380, %381 : vector<2x128xi32>
    %c96_i32_121 = arith.constant 96 : i32
    %383 = vector.broadcast %c96_i32_121 : i32 to vector<2x128xi32>
    %384 = arith.cmpi slt, %380, %383 : vector<2x128xi32>
    %385 = arith.andi %382, %384 : vector<2x128xi1>
    %386 = arith.select %385, %379, %378 : vector<2x128xi1>, vector<2x128xf32>
    %387 = vector.extract_strided_slice %386 {offsets = [0, 0], sizes = [2, 32], strides = [1, 1]} : vector<2x128xf32> to vector<2x32xf32>
    %388 = vector.extract_strided_slice %386 {offsets = [0, 32], sizes = [2, 32], strides = [1, 1]} : vector<2x128xf32> to vector<2x32xf32>
    %389 = vector.extract_strided_slice %386 {offsets = [0, 64], sizes = [2, 32], strides = [1, 1]} : vector<2x128xf32> to vector<2x32xf32>
    %390 = vector.extract_strided_slice %386 {offsets = [0, 96], sizes = [2, 32], strides = [1, 1]} : vector<2x128xf32> to vector<2x32xf32>
    %391 = arith.mulf %388, %366 : vector<2x32xf32>
    %392 = arith.mulf %387, %389 : vector<2x32xf32>
    %393 = arith.addf %391, %392 : vector<2x32xf32>
    %394 = math.tanh %393 : vector<2x32xf32>
    %395 = arith.mulf %390, %394 : vector<2x32xf32>
    %c4_122 = arith.constant 4 : index
    %c32_123 = arith.constant 32 : index
    %396 = vector.load %arg17[%c4_122, %c32_123] : memref<16x64xf32, #tpu.memory_space<vmem>>, vector<2x32xf32>
    tpu.vector_store %arg17[%c4_122, %c32_123], %395 {strides = array<i32>} : memref<16x64xf32, #tpu.memory_space<vmem>>, vector<2x32xf32>,
    %c2_124 = arith.constant 2 : index
    %c0_125 = arith.constant 0 : index
    %397 = vector.load %arg16[%c2_124, %c0_125] : memref<16x128xf32, #tpu.memory_space<vmem>>, vector<2x128xf32>
    %398 = arith.truncf %395 : vector<2x32xf32> to vector<2x32xbf16>
    %cst_126 = arith.constant dense<0.000000e+00> : vector<2x128xf32>
    %399 = tpu.matmul %398, %232, %cst_126 {dimension_numbers = #tpu.dot_dimension_numbers<[1], [0], [0], [1], [0, 0, 1, 1], [], []>} : vector<2x32xbf16>, vector<32x128xbf16>, vector<2x128xf32> -> vector<2x128xf32>
    %400 = arith.addf %397, %399 : vector<2x128xf32>
    %401 = arith.negf %400 : vector<2x128xf32>
    %402 = math.exp %401 : vector<2x128xf32>
    %cst_127 = arith.constant 1.000000e+00 : f32
    %403 = vector.broadcast %cst_127 : f32 to vector<2x128xf32>
    %404 = arith.addf %403, %402 : vector<2x128xf32>
    %405 = arith.divf %403, %404 : vector<2x128xf32>
    %406 = math.tanh %400 : vector<2x128xf32>
    %407 = tpu.iota {dimensions = array<i32: 1>} : vector<2x128xi32>
    %c64_i32_128 = arith.constant 64 : i32
    %408 = vector.broadcast %c64_i32_128 : i32 to vector<2x128xi32>
    %409 = arith.cmpi sge, %407, %408 : vector<2x128xi32>
    %c96_i32_129 = arith.constant 96 : i32
    %410 = vector.broadcast %c96_i32_129 : i32 to vector<2x128xi32>
    %411 = arith.cmpi slt, %407, %410 : vector<2x128xi32>
    %412 = arith.andi %409, %411 : vector<2x128xi1>
    %413 = arith.select %412, %406, %405 : vector<2x128xi1>, vector<2x128xf32>
    %414 = vector.extract_strided_slice %413 {offsets = [0, 0], sizes = [2, 32], strides = [1, 1]} : vector<2x128xf32> to vector<2x32xf32>
    %415 = vector.extract_strided_slice %413 {offsets = [0, 32], sizes = [2, 32], strides = [1, 1]} : vector<2x128xf32> to vector<2x32xf32>
    %416 = vector.extract_strided_slice %413 {offsets = [0, 64], sizes = [2, 32], strides = [1, 1]} : vector<2x128xf32> to vector<2x32xf32>
    %417 = vector.extract_strided_slice %413 {offsets = [0, 96], sizes = [2, 32], strides = [1, 1]} : vector<2x128xf32> to vector<2x32xf32>
    %418 = arith.mulf %415, %393 : vector<2x32xf32>
    %419 = arith.mulf %414, %416 : vector<2x32xf32>
    %420 = arith.addf %418, %419 : vector<2x32xf32>
    %421 = math.tanh %420 : vector<2x32xf32>
    %422 = arith.mulf %417, %421 : vector<2x32xf32>
    %c2_130 = arith.constant 2 : index
    %c32_131 = arith.constant 32 : index
    %423 = vector.load %arg17[%c2_130, %c32_131] : memref<16x64xf32, #tpu.memory_space<vmem>>, vector<2x32xf32>
    tpu.vector_store %arg17[%c2_130, %c32_131], %422 {strides = array<i32>} : memref<16x64xf32, #tpu.memory_space<vmem>>, vector<2x32xf32>,
    %c0_132 = arith.constant 0 : index
    %c0_133 = arith.constant 0 : index
    %424 = vector.load %arg16[%c0_132, %c0_133] : memref<16x128xf32, #tpu.memory_space<vmem>>, vector<2x128xf32>
    %425 = arith.truncf %422 : vector<2x32xf32> to vector<2x32xbf16>
    %cst_134 = arith.constant dense<0.000000e+00> : vector<2x128xf32>
    %426 = tpu.matmul %425, %232, %cst_134 {dimension_numbers = #tpu.dot_dimension_numbers<[1], [0], [0], [1], [0, 0, 1, 1], [], []>} : vector<2x32xbf16>, vector<32x128xbf16>, vector<2x128xf32> -> vector<2x128xf32>
    %427 = arith.addf %424, %426 : vector<2x128xf32>
    %428 = arith.negf %427 : vector<2x128xf32>
    %429 = math.exp %428 : vector<2x128xf32>
    %cst_135 = arith.constant 1.000000e+00 : f32
    %430 = vector.broadcast %cst_135 : f32 to vector<2x128xf32>
    %431 = arith.addf %430, %429 : vector<2x128xf32>
    %432 = arith.divf %430, %431 : vector<2x128xf32>
    %433 = math.tanh %427 : vector<2x128xf32>
    %434 = tpu.iota {dimensions = array<i32: 1>} : vector<2x128xi32>
    %c64_i32_136 = arith.constant 64 : i32
    %435 = vector.broadcast %c64_i32_136 : i32 to vector<2x128xi32>
    %436 = arith.cmpi sge, %434, %435 : vector<2x128xi32>
    %c96_i32_137 = arith.constant 96 : i32
    %437 = vector.broadcast %c96_i32_137 : i32 to vector<2x128xi32>
    %438 = arith.cmpi slt, %434, %437 : vector<2x128xi32>
    %439 = arith.andi %436, %438 : vector<2x128xi1>
    %440 = arith.select %439, %433, %432 : vector<2x128xi1>, vector<2x128xf32>
    %441 = vector.extract_strided_slice %440 {offsets = [0, 0], sizes = [2, 32], strides = [1, 1]} : vector<2x128xf32> to vector<2x32xf32>
    %442 = vector.extract_strided_slice %440 {offsets = [0, 32], sizes = [2, 32], strides = [1, 1]} : vector<2x128xf32> to vector<2x32xf32>
    %443 = vector.extract_strided_slice %440 {offsets = [0, 64], sizes = [2, 32], strides = [1, 1]} : vector<2x128xf32> to vector<2x32xf32>
    %444 = vector.extract_strided_slice %440 {offsets = [0, 96], sizes = [2, 32], strides = [1, 1]} : vector<2x128xf32> to vector<2x32xf32>
    %445 = arith.mulf %442, %420 : vector<2x32xf32>
    %446 = arith.mulf %441, %443 : vector<2x32xf32>
    %447 = arith.addf %445, %446 : vector<2x32xf32>
    %448 = math.tanh %447 : vector<2x32xf32>
    %449 = arith.mulf %444, %448 : vector<2x32xf32>
    %c0_138 = arith.constant 0 : index
    %c32_139 = arith.constant 32 : index
    %450 = vector.load %arg17[%c0_138, %c32_139] : memref<16x64xf32, #tpu.memory_space<vmem>>, vector<2x32xf32>
    tpu.vector_store %arg17[%c0_138, %c32_139], %449 {strides = array<i32>} : memref<16x64xf32, #tpu.memory_space<vmem>>, vector<2x32xf32>,
    %c0_140 = arith.constant 0 : index
    %c0_141 = arith.constant 0 : index
    %451 = vector.load %arg17[%c0_140, %c0_141] : memref<16x64xf32, #tpu.memory_space<vmem>>, vector<16x64xf32>
    %452 = arith.truncf %451 : vector<16x64xf32> to vector<16x64xbf16>
    %c0_142 = arith.constant 0 : index
    %c0_143 = arith.constant 0 : index
    %453 = vector.load %arg7[%c0_142, %c0_143] : memref<64x128xbf16, #tpu.memory_space<vmem>>, vector<64x128xbf16>
    %cst_144 = arith.constant dense<0.000000e+00> : vector<16x128xf32>
    %454 = tpu.matmul %452, %453, %cst_144 {dimension_numbers = #tpu.dot_dimension_numbers<[1], [0], [0], [1], [0, 0, 1, 1], [], []>} : vector<16x64xbf16>, vector<64x128xbf16>, vector<16x128xf32> -> vector<16x128xf32>
    %c0_145 = arith.constant 0 : index
    %c0_146 = arith.constant 0 : index
    %455 = vector.load %arg9[%c0_145, %c0_146] : memref<1x128xf32, #tpu.memory_space<vmem>>, vector<1x128xf32>
    %456 = vector.broadcast %455 : vector<1x128xf32> to vector<16x128xf32>
    %457 = arith.addf %454, %456 : vector<16x128xf32>
    %c0_147 = arith.constant 0 : index
    %c0_148 = arith.constant 0 : index
    %458 = vector.load %arg16[%c0_147, %c0_148] : memref<16x128xf32, #tpu.memory_space<vmem>>, vector<16x128xf32>
    tpu.vector_store %arg16[%c0_147, %c0_148], %457 {strides = array<i32>} : memref<16x128xf32, #tpu.memory_space<vmem>>, vector<16x128xf32>,
    %c0_149 = arith.constant 0 : index
    %c0_150 = arith.constant 0 : index
    %459 = vector.load %arg8[%c0_149, %c0_150] : memref<32x128xbf16, #tpu.memory_space<vmem>>, vector<32x128xbf16>
    %cst_151 = arith.constant 0.000000e+00 : f32
    %460 = vector.broadcast %cst_151 : f32 to vector<2x32xf32>
    %cst_152 = arith.constant 0.000000e+00 : f32
    %461 = vector.broadcast %cst_152 : f32 to vector<2x32xf32>
    %c0_153 = arith.constant 0 : index
    %c0_154 = arith.constant 0 : index
    %462 = vector.load %arg16[%c0_153, %c0_154] : memref<16x128xf32, #tpu.memory_space<vmem>>, vector<2x128xf32>
    %463 = arith.truncf %460 : vector<2x32xf32> to vector<2x32xbf16>
    %cst_155 = arith.constant dense<0.000000e+00> : vector<2x128xf32>
    %464 = tpu.matmul %463, %459, %cst_155 {dimension_numbers = #tpu.dot_dimension_numbers<[1], [0], [0], [1], [0, 0, 1, 1], [], []>} : vector<2x32xbf16>, vector<32x128xbf16>, vector<2x128xf32> -> vector<2x128xf32>
    %465 = arith.addf %462, %464 : vector<2x128xf32>
    %466 = arith.negf %465 : vector<2x128xf32>
    %467 = math.exp %466 : vector<2x128xf32>
    %cst_156 = arith.constant 1.000000e+00 : f32
    %468 = vector.broadcast %cst_156 : f32 to vector<2x128xf32>
    %469 = arith.addf %468, %467 : vector<2x128xf32>
    %470 = arith.divf %468, %469 : vector<2x128xf32>
    %471 = math.tanh %465 : vector<2x128xf32>
    %472 = tpu.iota {dimensions = array<i32: 1>} : vector<2x128xi32>
    %c64_i32_157 = arith.constant 64 : i32
    %473 = vector.broadcast %c64_i32_157 : i32 to vector<2x128xi32>
    %474 = arith.cmpi sge, %472, %473 : vector<2x128xi32>
    %c96_i32_158 = arith.constant 96 : i32
    %475 = vector.broadcast %c96_i32_158 : i32 to vector<2x128xi32>
    %476 = arith.cmpi slt, %472, %475 : vector<2x128xi32>
    %477 = arith.andi %474, %476 : vector<2x128xi1>
    %478 = arith.select %477, %471, %470 : vector<2x128xi1>, vector<2x128xf32>
    %479 = vector.extract_strided_slice %478 {offsets = [0, 0], sizes = [2, 32], strides = [1, 1]} : vector<2x128xf32> to vector<2x32xf32>
    %480 = vector.extract_strided_slice %478 {offsets = [0, 32], sizes = [2, 32], strides = [1, 1]} : vector<2x128xf32> to vector<2x32xf32>
    %481 = vector.extract_strided_slice %478 {offsets = [0, 64], sizes = [2, 32], strides = [1, 1]} : vector<2x128xf32> to vector<2x32xf32>
    %482 = vector.extract_strided_slice %478 {offsets = [0, 96], sizes = [2, 32], strides = [1, 1]} : vector<2x128xf32> to vector<2x32xf32>
    %483 = arith.mulf %480, %461 : vector<2x32xf32>
    %484 = arith.mulf %479, %481 : vector<2x32xf32>
    %485 = arith.addf %483, %484 : vector<2x32xf32>
    %486 = math.tanh %485 : vector<2x32xf32>
    %487 = arith.mulf %482, %486 : vector<2x32xf32>
    %c0_159 = arith.constant 0 : index
    %c0_160 = arith.constant 0 : index
    %488 = vector.load %arg18[%c0_159, %c0_160] : memref<16x64xf32, #tpu.memory_space<vmem>>, vector<2x32xf32>
    tpu.vector_store %arg18[%c0_159, %c0_160], %487 {strides = array<i32>} : memref<16x64xf32, #tpu.memory_space<vmem>>, vector<2x32xf32>,
    %c2_161 = arith.constant 2 : index
    %c0_162 = arith.constant 0 : index
    %489 = vector.load %arg16[%c2_161, %c0_162] : memref<16x128xf32, #tpu.memory_space<vmem>>, vector<2x128xf32>
    %490 = arith.truncf %487 : vector<2x32xf32> to vector<2x32xbf16>
    %cst_163 = arith.constant dense<0.000000e+00> : vector<2x128xf32>
    %491 = tpu.matmul %490, %459, %cst_163 {dimension_numbers = #tpu.dot_dimension_numbers<[1], [0], [0], [1], [0, 0, 1, 1], [], []>} : vector<2x32xbf16>, vector<32x128xbf16>, vector<2x128xf32> -> vector<2x128xf32>
    %492 = arith.addf %489, %491 : vector<2x128xf32>
    %493 = arith.negf %492 : vector<2x128xf32>
    %494 = math.exp %493 : vector<2x128xf32>
    %cst_164 = arith.constant 1.000000e+00 : f32
    %495 = vector.broadcast %cst_164 : f32 to vector<2x128xf32>
    %496 = arith.addf %495, %494 : vector<2x128xf32>
    %497 = arith.divf %495, %496 : vector<2x128xf32>
    %498 = math.tanh %492 : vector<2x128xf32>
    %499 = tpu.iota {dimensions = array<i32: 1>} : vector<2x128xi32>
    %c64_i32_165 = arith.constant 64 : i32
    %500 = vector.broadcast %c64_i32_165 : i32 to vector<2x128xi32>
    %501 = arith.cmpi sge, %499, %500 : vector<2x128xi32>
    %c96_i32_166 = arith.constant 96 : i32
    %502 = vector.broadcast %c96_i32_166 : i32 to vector<2x128xi32>
    %503 = arith.cmpi slt, %499, %502 : vector<2x128xi32>
    %504 = arith.andi %501, %503 : vector<2x128xi1>
    %505 = arith.select %504, %498, %497 : vector<2x128xi1>, vector<2x128xf32>
    %506 = vector.extract_strided_slice %505 {offsets = [0, 0], sizes = [2, 32], strides = [1, 1]} : vector<2x128xf32> to vector<2x32xf32>
    %507 = vector.extract_strided_slice %505 {offsets = [0, 32], sizes = [2, 32], strides = [1, 1]} : vector<2x128xf32> to vector<2x32xf32>
    %508 = vector.extract_strided_slice %505 {offsets = [0, 64], sizes = [2, 32], strides = [1, 1]} : vector<2x128xf32> to vector<2x32xf32>
    %509 = vector.extract_strided_slice %505 {offsets = [0, 96], sizes = [2, 32], strides = [1, 1]} : vector<2x128xf32> to vector<2x32xf32>
    %510 = arith.mulf %507, %485 : vector<2x32xf32>
    %511 = arith.mulf %506, %508 : vector<2x32xf32>
    %512 = arith.addf %510, %511 : vector<2x32xf32>
    %513 = math.tanh %512 : vector<2x32xf32>
    %514 = arith.mulf %509, %513 : vector<2x32xf32>
    %c2_167 = arith.constant 2 : index
    %c0_168 = arith.constant 0 : index
    %515 = vector.load %arg18[%c2_167, %c0_168] : memref<16x64xf32, #tpu.memory_space<vmem>>, vector<2x32xf32>
    tpu.vector_store %arg18[%c2_167, %c0_168], %514 {strides = array<i32>} : memref<16x64xf32, #tpu.memory_space<vmem>>, vector<2x32xf32>,
    %c4_169 = arith.constant 4 : index
    %c0_170 = arith.constant 0 : index
    %516 = vector.load %arg16[%c4_169, %c0_170] : memref<16x128xf32, #tpu.memory_space<vmem>>, vector<2x128xf32>
    %517 = arith.truncf %514 : vector<2x32xf32> to vector<2x32xbf16>
    %cst_171 = arith.constant dense<0.000000e+00> : vector<2x128xf32>
    %518 = tpu.matmul %517, %459, %cst_171 {dimension_numbers = #tpu.dot_dimension_numbers<[1], [0], [0], [1], [0, 0, 1, 1], [], []>} : vector<2x32xbf16>, vector<32x128xbf16>, vector<2x128xf32> -> vector<2x128xf32>
    %519 = arith.addf %516, %518 : vector<2x128xf32>
    %520 = arith.negf %519 : vector<2x128xf32>
    %521 = math.exp %520 : vector<2x128xf32>
    %cst_172 = arith.constant 1.000000e+00 : f32
    %522 = vector.broadcast %cst_172 : f32 to vector<2x128xf32>
    %523 = arith.addf %522, %521 : vector<2x128xf32>
    %524 = arith.divf %522, %523 : vector<2x128xf32>
    %525 = math.tanh %519 : vector<2x128xf32>
    %526 = tpu.iota {dimensions = array<i32: 1>} : vector<2x128xi32>
    %c64_i32_173 = arith.constant 64 : i32
    %527 = vector.broadcast %c64_i32_173 : i32 to vector<2x128xi32>
    %528 = arith.cmpi sge, %526, %527 : vector<2x128xi32>
    %c96_i32_174 = arith.constant 96 : i32
    %529 = vector.broadcast %c96_i32_174 : i32 to vector<2x128xi32>
    %530 = arith.cmpi slt, %526, %529 : vector<2x128xi32>
    %531 = arith.andi %528, %530 : vector<2x128xi1>
    %532 = arith.select %531, %525, %524 : vector<2x128xi1>, vector<2x128xf32>
    %533 = vector.extract_strided_slice %532 {offsets = [0, 0], sizes = [2, 32], strides = [1, 1]} : vector<2x128xf32> to vector<2x32xf32>
    %534 = vector.extract_strided_slice %532 {offsets = [0, 32], sizes = [2, 32], strides = [1, 1]} : vector<2x128xf32> to vector<2x32xf32>
    %535 = vector.extract_strided_slice %532 {offsets = [0, 64], sizes = [2, 32], strides = [1, 1]} : vector<2x128xf32> to vector<2x32xf32>
    %536 = vector.extract_strided_slice %532 {offsets = [0, 96], sizes = [2, 32], strides = [1, 1]} : vector<2x128xf32> to vector<2x32xf32>
    %537 = arith.mulf %534, %512 : vector<2x32xf32>
    %538 = arith.mulf %533, %535 : vector<2x32xf32>
    %539 = arith.addf %537, %538 : vector<2x32xf32>
    %540 = math.tanh %539 : vector<2x32xf32>
    %541 = arith.mulf %536, %540 : vector<2x32xf32>
    %c4_175 = arith.constant 4 : index
    %c0_176 = arith.constant 0 : index
    %542 = vector.load %arg18[%c4_175, %c0_176] : memref<16x64xf32, #tpu.memory_space<vmem>>, vector<2x32xf32>
    tpu.vector_store %arg18[%c4_175, %c0_176], %541 {strides = array<i32>} : memref<16x64xf32, #tpu.memory_space<vmem>>, vector<2x32xf32>,
    %c6_177 = arith.constant 6 : index
    %c0_178 = arith.constant 0 : index
    %543 = vector.load %arg16[%c6_177, %c0_178] : memref<16x128xf32, #tpu.memory_space<vmem>>, vector<2x128xf32>
    %544 = arith.truncf %541 : vector<2x32xf32> to vector<2x32xbf16>
    %cst_179 = arith.constant dense<0.000000e+00> : vector<2x128xf32>
    %545 = tpu.matmul %544, %459, %cst_179 {dimension_numbers = #tpu.dot_dimension_numbers<[1], [0], [0], [1], [0, 0, 1, 1], [], []>} : vector<2x32xbf16>, vector<32x128xbf16>, vector<2x128xf32> -> vector<2x128xf32>
    %546 = arith.addf %543, %545 : vector<2x128xf32>
    %547 = arith.negf %546 : vector<2x128xf32>
    %548 = math.exp %547 : vector<2x128xf32>
    %cst_180 = arith.constant 1.000000e+00 : f32
    %549 = vector.broadcast %cst_180 : f32 to vector<2x128xf32>
    %550 = arith.addf %549, %548 : vector<2x128xf32>
    %551 = arith.divf %549, %550 : vector<2x128xf32>
    %552 = math.tanh %546 : vector<2x128xf32>
    %553 = tpu.iota {dimensions = array<i32: 1>} : vector<2x128xi32>
    %c64_i32_181 = arith.constant 64 : i32
    %554 = vector.broadcast %c64_i32_181 : i32 to vector<2x128xi32>
    %555 = arith.cmpi sge, %553, %554 : vector<2x128xi32>
    %c96_i32_182 = arith.constant 96 : i32
    %556 = vector.broadcast %c96_i32_182 : i32 to vector<2x128xi32>
    %557 = arith.cmpi slt, %553, %556 : vector<2x128xi32>
    %558 = arith.andi %555, %557 : vector<2x128xi1>
    %559 = arith.select %558, %552, %551 : vector<2x128xi1>, vector<2x128xf32>
    %560 = vector.extract_strided_slice %559 {offsets = [0, 0], sizes = [2, 32], strides = [1, 1]} : vector<2x128xf32> to vector<2x32xf32>
    %561 = vector.extract_strided_slice %559 {offsets = [0, 32], sizes = [2, 32], strides = [1, 1]} : vector<2x128xf32> to vector<2x32xf32>
    %562 = vector.extract_strided_slice %559 {offsets = [0, 64], sizes = [2, 32], strides = [1, 1]} : vector<2x128xf32> to vector<2x32xf32>
    %563 = vector.extract_strided_slice %559 {offsets = [0, 96], sizes = [2, 32], strides = [1, 1]} : vector<2x128xf32> to vector<2x32xf32>
    %564 = arith.mulf %561, %539 : vector<2x32xf32>
    %565 = arith.mulf %560, %562 : vector<2x32xf32>
    %566 = arith.addf %564, %565 : vector<2x32xf32>
    %567 = math.tanh %566 : vector<2x32xf32>
    %568 = arith.mulf %563, %567 : vector<2x32xf32>
    %c6_183 = arith.constant 6 : index
    %c0_184 = arith.constant 0 : index
    %569 = vector.load %arg18[%c6_183, %c0_184] : memref<16x64xf32, #tpu.memory_space<vmem>>, vector<2x32xf32>
    tpu.vector_store %arg18[%c6_183, %c0_184], %568 {strides = array<i32>} : memref<16x64xf32, #tpu.memory_space<vmem>>, vector<2x32xf32>,
    %c8_185 = arith.constant 8 : index
    %c0_186 = arith.constant 0 : index
    %570 = vector.load %arg16[%c8_185, %c0_186] : memref<16x128xf32, #tpu.memory_space<vmem>>, vector<2x128xf32>
    %571 = arith.truncf %568 : vector<2x32xf32> to vector<2x32xbf16>
    %cst_187 = arith.constant dense<0.000000e+00> : vector<2x128xf32>
    %572 = tpu.matmul %571, %459, %cst_187 {dimension_numbers = #tpu.dot_dimension_numbers<[1], [0], [0], [1], [0, 0, 1, 1], [], []>} : vector<2x32xbf16>, vector<32x128xbf16>, vector<2x128xf32> -> vector<2x128xf32>
    %573 = arith.addf %570, %572 : vector<2x128xf32>
    %574 = arith.negf %573 : vector<2x128xf32>
    %575 = math.exp %574 : vector<2x128xf32>
    %cst_188 = arith.constant 1.000000e+00 : f32
    %576 = vector.broadcast %cst_188 : f32 to vector<2x128xf32>
    %577 = arith.addf %576, %575 : vector<2x128xf32>
    %578 = arith.divf %576, %577 : vector<2x128xf32>
    %579 = math.tanh %573 : vector<2x128xf32>
    %580 = tpu.iota {dimensions = array<i32: 1>} : vector<2x128xi32>
    %c64_i32_189 = arith.constant 64 : i32
    %581 = vector.broadcast %c64_i32_189 : i32 to vector<2x128xi32>
    %582 = arith.cmpi sge, %580, %581 : vector<2x128xi32>
    %c96_i32_190 = arith.constant 96 : i32
    %583 = vector.broadcast %c96_i32_190 : i32 to vector<2x128xi32>
    %584 = arith.cmpi slt, %580, %583 : vector<2x128xi32>
    %585 = arith.andi %582, %584 : vector<2x128xi1>
    %586 = arith.select %585, %579, %578 : vector<2x128xi1>, vector<2x128xf32>
    %587 = vector.extract_strided_slice %586 {offsets = [0, 0], sizes = [2, 32], strides = [1, 1]} : vector<2x128xf32> to vector<2x32xf32>
    %588 = vector.extract_strided_slice %586 {offsets = [0, 32], sizes = [2, 32], strides = [1, 1]} : vector<2x128xf32> to vector<2x32xf32>
    %589 = vector.extract_strided_slice %586 {offsets = [0, 64], sizes = [2, 32], strides = [1, 1]} : vector<2x128xf32> to vector<2x32xf32>
    %590 = vector.extract_strided_slice %586 {offsets = [0, 96], sizes = [2, 32], strides = [1, 1]} : vector<2x128xf32> to vector<2x32xf32>
    %591 = arith.mulf %588, %566 : vector<2x32xf32>
    %592 = arith.mulf %587, %589 : vector<2x32xf32>
    %593 = arith.addf %591, %592 : vector<2x32xf32>
    %594 = math.tanh %593 : vector<2x32xf32>
    %595 = arith.mulf %590, %594 : vector<2x32xf32>
    %c8_191 = arith.constant 8 : index
    %c0_192 = arith.constant 0 : index
    %596 = vector.load %arg18[%c8_191, %c0_192] : memref<16x64xf32, #tpu.memory_space<vmem>>, vector<2x32xf32>
    tpu.vector_store %arg18[%c8_191, %c0_192], %595 {strides = array<i32>} : memref<16x64xf32, #tpu.memory_space<vmem>>, vector<2x32xf32>,
    %c10_193 = arith.constant 10 : index
    %c0_194 = arith.constant 0 : index
    %597 = vector.load %arg16[%c10_193, %c0_194] : memref<16x128xf32, #tpu.memory_space<vmem>>, vector<2x128xf32>
    %598 = arith.truncf %595 : vector<2x32xf32> to vector<2x32xbf16>
    %cst_195 = arith.constant dense<0.000000e+00> : vector<2x128xf32>
    %599 = tpu.matmul %598, %459, %cst_195 {dimension_numbers = #tpu.dot_dimension_numbers<[1], [0], [0], [1], [0, 0, 1, 1], [], []>} : vector<2x32xbf16>, vector<32x128xbf16>, vector<2x128xf32> -> vector<2x128xf32>
    %600 = arith.addf %597, %599 : vector<2x128xf32>
    %601 = arith.negf %600 : vector<2x128xf32>
    %602 = math.exp %601 : vector<2x128xf32>
    %cst_196 = arith.constant 1.000000e+00 : f32
    %603 = vector.broadcast %cst_196 : f32 to vector<2x128xf32>
    %604 = arith.addf %603, %602 : vector<2x128xf32>
    %605 = arith.divf %603, %604 : vector<2x128xf32>
    %606 = math.tanh %600 : vector<2x128xf32>
    %607 = tpu.iota {dimensions = array<i32: 1>} : vector<2x128xi32>
    %c64_i32_197 = arith.constant 64 : i32
    %608 = vector.broadcast %c64_i32_197 : i32 to vector<2x128xi32>
    %609 = arith.cmpi sge, %607, %608 : vector<2x128xi32>
    %c96_i32_198 = arith.constant 96 : i32
    %610 = vector.broadcast %c96_i32_198 : i32 to vector<2x128xi32>
    %611 = arith.cmpi slt, %607, %610 : vector<2x128xi32>
    %612 = arith.andi %609, %611 : vector<2x128xi1>
    %613 = arith.select %612, %606, %605 : vector<2x128xi1>, vector<2x128xf32>
    %614 = vector.extract_strided_slice %613 {offsets = [0, 0], sizes = [2, 32], strides = [1, 1]} : vector<2x128xf32> to vector<2x32xf32>
    %615 = vector.extract_strided_slice %613 {offsets = [0, 32], sizes = [2, 32], strides = [1, 1]} : vector<2x128xf32> to vector<2x32xf32>
    %616 = vector.extract_strided_slice %613 {offsets = [0, 64], sizes = [2, 32], strides = [1, 1]} : vector<2x128xf32> to vector<2x32xf32>
    %617 = vector.extract_strided_slice %613 {offsets = [0, 96], sizes = [2, 32], strides = [1, 1]} : vector<2x128xf32> to vector<2x32xf32>
    %618 = arith.mulf %615, %593 : vector<2x32xf32>
    %619 = arith.mulf %614, %616 : vector<2x32xf32>
    %620 = arith.addf %618, %619 : vector<2x32xf32>
    %621 = math.tanh %620 : vector<2x32xf32>
    %622 = arith.mulf %617, %621 : vector<2x32xf32>
    %c10_199 = arith.constant 10 : index
    %c0_200 = arith.constant 0 : index
    %623 = vector.load %arg18[%c10_199, %c0_200] : memref<16x64xf32, #tpu.memory_space<vmem>>, vector<2x32xf32>
    tpu.vector_store %arg18[%c10_199, %c0_200], %622 {strides = array<i32>} : memref<16x64xf32, #tpu.memory_space<vmem>>, vector<2x32xf32>,
    %c12_201 = arith.constant 12 : index
    %c0_202 = arith.constant 0 : index
    %624 = vector.load %arg16[%c12_201, %c0_202] : memref<16x128xf32, #tpu.memory_space<vmem>>, vector<2x128xf32>
    %625 = arith.truncf %622 : vector<2x32xf32> to vector<2x32xbf16>
    %cst_203 = arith.constant dense<0.000000e+00> : vector<2x128xf32>
    %626 = tpu.matmul %625, %459, %cst_203 {dimension_numbers = #tpu.dot_dimension_numbers<[1], [0], [0], [1], [0, 0, 1, 1], [], []>} : vector<2x32xbf16>, vector<32x128xbf16>, vector<2x128xf32> -> vector<2x128xf32>
    %627 = arith.addf %624, %626 : vector<2x128xf32>
    %628 = arith.negf %627 : vector<2x128xf32>
    %629 = math.exp %628 : vector<2x128xf32>
    %cst_204 = arith.constant 1.000000e+00 : f32
    %630 = vector.broadcast %cst_204 : f32 to vector<2x128xf32>
    %631 = arith.addf %630, %629 : vector<2x128xf32>
    %632 = arith.divf %630, %631 : vector<2x128xf32>
    %633 = math.tanh %627 : vector<2x128xf32>
    %634 = tpu.iota {dimensions = array<i32: 1>} : vector<2x128xi32>
    %c64_i32_205 = arith.constant 64 : i32
    %635 = vector.broadcast %c64_i32_205 : i32 to vector<2x128xi32>
    %636 = arith.cmpi sge, %634, %635 : vector<2x128xi32>
    %c96_i32_206 = arith.constant 96 : i32
    %637 = vector.broadcast %c96_i32_206 : i32 to vector<2x128xi32>
    %638 = arith.cmpi slt, %634, %637 : vector<2x128xi32>
    %639 = arith.andi %636, %638 : vector<2x128xi1>
    %640 = arith.select %639, %633, %632 : vector<2x128xi1>, vector<2x128xf32>
    %641 = vector.extract_strided_slice %640 {offsets = [0, 0], sizes = [2, 32], strides = [1, 1]} : vector<2x128xf32> to vector<2x32xf32>
    %642 = vector.extract_strided_slice %640 {offsets = [0, 32], sizes = [2, 32], strides = [1, 1]} : vector<2x128xf32> to vector<2x32xf32>
    %643 = vector.extract_strided_slice %640 {offsets = [0, 64], sizes = [2, 32], strides = [1, 1]} : vector<2x128xf32> to vector<2x32xf32>
    %644 = vector.extract_strided_slice %640 {offsets = [0, 96], sizes = [2, 32], strides = [1, 1]} : vector<2x128xf32> to vector<2x32xf32>
    %645 = arith.mulf %642, %620 : vector<2x32xf32>
    %646 = arith.mulf %641, %643 : vector<2x32xf32>
    %647 = arith.addf %645, %646 : vector<2x32xf32>
    %648 = math.tanh %647 : vector<2x32xf32>
    %649 = arith.mulf %644, %648 : vector<2x32xf32>
    %c12_207 = arith.constant 12 : index
    %c0_208 = arith.constant 0 : index
    %650 = vector.load %arg18[%c12_207, %c0_208] : memref<16x64xf32, #tpu.memory_space<vmem>>, vector<2x32xf32>
    tpu.vector_store %arg18[%c12_207, %c0_208], %649 {strides = array<i32>} : memref<16x64xf32, #tpu.memory_space<vmem>>, vector<2x32xf32>,
    %c14_209 = arith.constant 14 : index
    %c0_210 = arith.constant 0 : index
    %651 = vector.load %arg16[%c14_209, %c0_210] : memref<16x128xf32, #tpu.memory_space<vmem>>, vector<2x128xf32>
    %652 = arith.truncf %649 : vector<2x32xf32> to vector<2x32xbf16>
    %cst_211 = arith.constant dense<0.000000e+00> : vector<2x128xf32>
    %653 = tpu.matmul %652, %459, %cst_211 {dimension_numbers = #tpu.dot_dimension_numbers<[1], [0], [0], [1], [0, 0, 1, 1], [], []>} : vector<2x32xbf16>, vector<32x128xbf16>, vector<2x128xf32> -> vector<2x128xf32>
    %654 = arith.addf %651, %653 : vector<2x128xf32>
    %655 = arith.negf %654 : vector<2x128xf32>
    %656 = math.exp %655 : vector<2x128xf32>
    %cst_212 = arith.constant 1.000000e+00 : f32
    %657 = vector.broadcast %cst_212 : f32 to vector<2x128xf32>
    %658 = arith.addf %657, %656 : vector<2x128xf32>
    %659 = arith.divf %657, %658 : vector<2x128xf32>
    %660 = math.tanh %654 : vector<2x128xf32>
    %661 = tpu.iota {dimensions = array<i32: 1>} : vector<2x128xi32>
    %c64_i32_213 = arith.constant 64 : i32
    %662 = vector.broadcast %c64_i32_213 : i32 to vector<2x128xi32>
    %663 = arith.cmpi sge, %661, %662 : vector<2x128xi32>
    %c96_i32_214 = arith.constant 96 : i32
    %664 = vector.broadcast %c96_i32_214 : i32 to vector<2x128xi32>
    %665 = arith.cmpi slt, %661, %664 : vector<2x128xi32>
    %666 = arith.andi %663, %665 : vector<2x128xi1>
    %667 = arith.select %666, %660, %659 : vector<2x128xi1>, vector<2x128xf32>
    %668 = vector.extract_strided_slice %667 {offsets = [0, 0], sizes = [2, 32], strides = [1, 1]} : vector<2x128xf32> to vector<2x32xf32>
    %669 = vector.extract_strided_slice %667 {offsets = [0, 32], sizes = [2, 32], strides = [1, 1]} : vector<2x128xf32> to vector<2x32xf32>
    %670 = vector.extract_strided_slice %667 {offsets = [0, 64], sizes = [2, 32], strides = [1, 1]} : vector<2x128xf32> to vector<2x32xf32>
    %671 = vector.extract_strided_slice %667 {offsets = [0, 96], sizes = [2, 32], strides = [1, 1]} : vector<2x128xf32> to vector<2x32xf32>
    %672 = arith.mulf %669, %647 : vector<2x32xf32>
    %673 = arith.mulf %668, %670 : vector<2x32xf32>
    %674 = arith.addf %672, %673 : vector<2x32xf32>
    %675 = math.tanh %674 : vector<2x32xf32>
    %676 = arith.mulf %671, %675 : vector<2x32xf32>
    %c14_215 = arith.constant 14 : index
    %c0_216 = arith.constant 0 : index
    %677 = vector.load %arg18[%c14_215, %c0_216] : memref<16x64xf32, #tpu.memory_space<vmem>>, vector<2x32xf32>
    tpu.vector_store %arg18[%c14_215, %c0_216], %676 {strides = array<i32>} : memref<16x64xf32, #tpu.memory_space<vmem>>, vector<2x32xf32>,
    %c0_217 = arith.constant 0 : index
    %c0_218 = arith.constant 0 : index
    %678 = vector.load %arg10[%c0_217, %c0_218] : memref<64x128xbf16, #tpu.memory_space<vmem>>, vector<64x128xbf16>
    %cst_219 = arith.constant dense<0.000000e+00> : vector<16x128xf32>
    %679 = tpu.matmul %452, %678, %cst_219 {dimension_numbers = #tpu.dot_dimension_numbers<[1], [0], [0], [1], [0, 0, 1, 1], [], []>} : vector<16x64xbf16>, vector<64x128xbf16>, vector<16x128xf32> -> vector<16x128xf32>
    %c0_220 = arith.constant 0 : index
    %c0_221 = arith.constant 0 : index
    %680 = vector.load %arg12[%c0_220, %c0_221] : memref<1x128xf32, #tpu.memory_space<vmem>>, vector<1x128xf32>
    %681 = vector.broadcast %680 : vector<1x128xf32> to vector<16x128xf32>
    %682 = arith.addf %679, %681 : vector<16x128xf32>
    %c0_222 = arith.constant 0 : index
    %c0_223 = arith.constant 0 : index
    %683 = vector.load %arg16[%c0_222, %c0_223] : memref<16x128xf32, #tpu.memory_space<vmem>>, vector<16x128xf32>
    tpu.vector_store %arg16[%c0_222, %c0_223], %682 {strides = array<i32>} : memref<16x128xf32, #tpu.memory_space<vmem>>, vector<16x128xf32>,
    %c0_224 = arith.constant 0 : index
    %c0_225 = arith.constant 0 : index
    %684 = vector.load %arg11[%c0_224, %c0_225] : memref<32x128xbf16, #tpu.memory_space<vmem>>, vector<32x128xbf16>
    %cst_226 = arith.constant 0.000000e+00 : f32
    %685 = vector.broadcast %cst_226 : f32 to vector<2x32xf32>
    %cst_227 = arith.constant 0.000000e+00 : f32
    %686 = vector.broadcast %cst_227 : f32 to vector<2x32xf32>
    %c14_228 = arith.constant 14 : index
    %c0_229 = arith.constant 0 : index
    %687 = vector.load %arg16[%c14_228, %c0_229] : memref<16x128xf32, #tpu.memory_space<vmem>>, vector<2x128xf32>
    %688 = arith.truncf %685 : vector<2x32xf32> to vector<2x32xbf16>
    %cst_230 = arith.constant dense<0.000000e+00> : vector<2x128xf32>
    %689 = tpu.matmul %688, %684, %cst_230 {dimension_numbers = #tpu.dot_dimension_numbers<[1], [0], [0], [1], [0, 0, 1, 1], [], []>} : vector<2x32xbf16>, vector<32x128xbf16>, vector<2x128xf32> -> vector<2x128xf32>
    %690 = arith.addf %687, %689 : vector<2x128xf32>
    %691 = arith.negf %690 : vector<2x128xf32>
    %692 = math.exp %691 : vector<2x128xf32>
    %cst_231 = arith.constant 1.000000e+00 : f32
    %693 = vector.broadcast %cst_231 : f32 to vector<2x128xf32>
    %694 = arith.addf %693, %692 : vector<2x128xf32>
    %695 = arith.divf %693, %694 : vector<2x128xf32>
    %696 = math.tanh %690 : vector<2x128xf32>
    %697 = tpu.iota {dimensions = array<i32: 1>} : vector<2x128xi32>
    %c64_i32_232 = arith.constant 64 : i32
    %698 = vector.broadcast %c64_i32_232 : i32 to vector<2x128xi32>
    %699 = arith.cmpi sge, %697, %698 : vector<2x128xi32>
    %c96_i32_233 = arith.constant 96 : i32
    %700 = vector.broadcast %c96_i32_233 : i32 to vector<2x128xi32>
    %701 = arith.cmpi slt, %697, %700 : vector<2x128xi32>
    %702 = arith.andi %699, %701 : vector<2x128xi1>
    %703 = arith.select %702, %696, %695 : vector<2x128xi1>, vector<2x128xf32>
    %704 = vector.extract_strided_slice %703 {offsets = [0, 0], sizes = [2, 32], strides = [1, 1]} : vector<2x128xf32> to vector<2x32xf32>
    %705 = vector.extract_strided_slice %703 {offsets = [0, 32], sizes = [2, 32], strides = [1, 1]} : vector<2x128xf32> to vector<2x32xf32>
    %706 = vector.extract_strided_slice %703 {offsets = [0, 64], sizes = [2, 32], strides = [1, 1]} : vector<2x128xf32> to vector<2x32xf32>
    %707 = vector.extract_strided_slice %703 {offsets = [0, 96], sizes = [2, 32], strides = [1, 1]} : vector<2x128xf32> to vector<2x32xf32>
    %708 = arith.mulf %705, %686 : vector<2x32xf32>
    %709 = arith.mulf %704, %706 : vector<2x32xf32>
    %710 = arith.addf %708, %709 : vector<2x32xf32>
    %711 = math.tanh %710 : vector<2x32xf32>
    %712 = arith.mulf %707, %711 : vector<2x32xf32>
    %c14_234 = arith.constant 14 : index
    %c32_235 = arith.constant 32 : index
    %713 = vector.load %arg18[%c14_234, %c32_235] : memref<16x64xf32, #tpu.memory_space<vmem>>, vector<2x32xf32>
    tpu.vector_store %arg18[%c14_234, %c32_235], %712 {strides = array<i32>} : memref<16x64xf32, #tpu.memory_space<vmem>>, vector<2x32xf32>,
    %c12_236 = arith.constant 12 : index
    %c0_237 = arith.constant 0 : index
    %714 = vector.load %arg16[%c12_236, %c0_237] : memref<16x128xf32, #tpu.memory_space<vmem>>, vector<2x128xf32>
    %715 = arith.truncf %712 : vector<2x32xf32> to vector<2x32xbf16>
    %cst_238 = arith.constant dense<0.000000e+00> : vector<2x128xf32>
    %716 = tpu.matmul %715, %684, %cst_238 {dimension_numbers = #tpu.dot_dimension_numbers<[1], [0], [0], [1], [0, 0, 1, 1], [], []>} : vector<2x32xbf16>, vector<32x128xbf16>, vector<2x128xf32> -> vector<2x128xf32>
    %717 = arith.addf %714, %716 : vector<2x128xf32>
    %718 = arith.negf %717 : vector<2x128xf32>
    %719 = math.exp %718 : vector<2x128xf32>
    %cst_239 = arith.constant 1.000000e+00 : f32
    %720 = vector.broadcast %cst_239 : f32 to vector<2x128xf32>
    %721 = arith.addf %720, %719 : vector<2x128xf32>
    %722 = arith.divf %720, %721 : vector<2x128xf32>
    %723 = math.tanh %717 : vector<2x128xf32>
    %724 = tpu.iota {dimensions = array<i32: 1>} : vector<2x128xi32>
    %c64_i32_240 = arith.constant 64 : i32
    %725 = vector.broadcast %c64_i32_240 : i32 to vector<2x128xi32>
    %726 = arith.cmpi sge, %724, %725 : vector<2x128xi32>
    %c96_i32_241 = arith.constant 96 : i32
    %727 = vector.broadcast %c96_i32_241 : i32 to vector<2x128xi32>
    %728 = arith.cmpi slt, %724, %727 : vector<2x128xi32>
    %729 = arith.andi %726, %728 : vector<2x128xi1>
    %730 = arith.select %729, %723, %722 : vector<2x128xi1>, vector<2x128xf32>
    %731 = vector.extract_strided_slice %730 {offsets = [0, 0], sizes = [2, 32], strides = [1, 1]} : vector<2x128xf32> to vector<2x32xf32>
    %732 = vector.extract_strided_slice %730 {offsets = [0, 32], sizes = [2, 32], strides = [1, 1]} : vector<2x128xf32> to vector<2x32xf32>
    %733 = vector.extract_strided_slice %730 {offsets = [0, 64], sizes = [2, 32], strides = [1, 1]} : vector<2x128xf32> to vector<2x32xf32>
    %734 = vector.extract_strided_slice %730 {offsets = [0, 96], sizes = [2, 32], strides = [1, 1]} : vector<2x128xf32> to vector<2x32xf32>
    %735 = arith.mulf %732, %710 : vector<2x32xf32>
    %736 = arith.mulf %731, %733 : vector<2x32xf32>
    %737 = arith.addf %735, %736 : vector<2x32xf32>
    %738 = math.tanh %737 : vector<2x32xf32>
    %739 = arith.mulf %734, %738 : vector<2x32xf32>
    %c12_242 = arith.constant 12 : index
    %c32_243 = arith.constant 32 : index
    %740 = vector.load %arg18[%c12_242, %c32_243] : memref<16x64xf32, #tpu.memory_space<vmem>>, vector<2x32xf32>
    tpu.vector_store %arg18[%c12_242, %c32_243], %739 {strides = array<i32>} : memref<16x64xf32, #tpu.memory_space<vmem>>, vector<2x32xf32>,
    %c10_244 = arith.constant 10 : index
    %c0_245 = arith.constant 0 : index
    %741 = vector.load %arg16[%c10_244, %c0_245] : memref<16x128xf32, #tpu.memory_space<vmem>>, vector<2x128xf32>
    %742 = arith.truncf %739 : vector<2x32xf32> to vector<2x32xbf16>
    %cst_246 = arith.constant dense<0.000000e+00> : vector<2x128xf32>
    %743 = tpu.matmul %742, %684, %cst_246 {dimension_numbers = #tpu.dot_dimension_numbers<[1], [0], [0], [1], [0, 0, 1, 1], [], []>} : vector<2x32xbf16>, vector<32x128xbf16>, vector<2x128xf32> -> vector<2x128xf32>
    %744 = arith.addf %741, %743 : vector<2x128xf32>
    %745 = arith.negf %744 : vector<2x128xf32>
    %746 = math.exp %745 : vector<2x128xf32>
    %cst_247 = arith.constant 1.000000e+00 : f32
    %747 = vector.broadcast %cst_247 : f32 to vector<2x128xf32>
    %748 = arith.addf %747, %746 : vector<2x128xf32>
    %749 = arith.divf %747, %748 : vector<2x128xf32>
    %750 = math.tanh %744 : vector<2x128xf32>
    %751 = tpu.iota {dimensions = array<i32: 1>} : vector<2x128xi32>
    %c64_i32_248 = arith.constant 64 : i32
    %752 = vector.broadcast %c64_i32_248 : i32 to vector<2x128xi32>
    %753 = arith.cmpi sge, %751, %752 : vector<2x128xi32>
    %c96_i32_249 = arith.constant 96 : i32
    %754 = vector.broadcast %c96_i32_249 : i32 to vector<2x128xi32>
    %755 = arith.cmpi slt, %751, %754 : vector<2x128xi32>
    %756 = arith.andi %753, %755 : vector<2x128xi1>
    %757 = arith.select %756, %750, %749 : vector<2x128xi1>, vector<2x128xf32>
    %758 = vector.extract_strided_slice %757 {offsets = [0, 0], sizes = [2, 32], strides = [1, 1]} : vector<2x128xf32> to vector<2x32xf32>
    %759 = vector.extract_strided_slice %757 {offsets = [0, 32], sizes = [2, 32], strides = [1, 1]} : vector<2x128xf32> to vector<2x32xf32>
    %760 = vector.extract_strided_slice %757 {offsets = [0, 64], sizes = [2, 32], strides = [1, 1]} : vector<2x128xf32> to vector<2x32xf32>
    %761 = vector.extract_strided_slice %757 {offsets = [0, 96], sizes = [2, 32], strides = [1, 1]} : vector<2x128xf32> to vector<2x32xf32>
    %762 = arith.mulf %759, %737 : vector<2x32xf32>
    %763 = arith.mulf %758, %760 : vector<2x32xf32>
    %764 = arith.addf %762, %763 : vector<2x32xf32>
    %765 = math.tanh %764 : vector<2x32xf32>
    %766 = arith.mulf %761, %765 : vector<2x32xf32>
    %c10_250 = arith.constant 10 : index
    %c32_251 = arith.constant 32 : index
    %767 = vector.load %arg18[%c10_250, %c32_251] : memref<16x64xf32, #tpu.memory_space<vmem>>, vector<2x32xf32>
    tpu.vector_store %arg18[%c10_250, %c32_251], %766 {strides = array<i32>} : memref<16x64xf32, #tpu.memory_space<vmem>>, vector<2x32xf32>,
    %c8_252 = arith.constant 8 : index
    %c0_253 = arith.constant 0 : index
    %768 = vector.load %arg16[%c8_252, %c0_253] : memref<16x128xf32, #tpu.memory_space<vmem>>, vector<2x128xf32>
    %769 = arith.truncf %766 : vector<2x32xf32> to vector<2x32xbf16>
    %cst_254 = arith.constant dense<0.000000e+00> : vector<2x128xf32>
    %770 = tpu.matmul %769, %684, %cst_254 {dimension_numbers = #tpu.dot_dimension_numbers<[1], [0], [0], [1], [0, 0, 1, 1], [], []>} : vector<2x32xbf16>, vector<32x128xbf16>, vector<2x128xf32> -> vector<2x128xf32>
    %771 = arith.addf %768, %770 : vector<2x128xf32>
    %772 = arith.negf %771 : vector<2x128xf32>
    %773 = math.exp %772 : vector<2x128xf32>
    %cst_255 = arith.constant 1.000000e+00 : f32
    %774 = vector.broadcast %cst_255 : f32 to vector<2x128xf32>
    %775 = arith.addf %774, %773 : vector<2x128xf32>
    %776 = arith.divf %774, %775 : vector<2x128xf32>
    %777 = math.tanh %771 : vector<2x128xf32>
    %778 = tpu.iota {dimensions = array<i32: 1>} : vector<2x128xi32>
    %c64_i32_256 = arith.constant 64 : i32
    %779 = vector.broadcast %c64_i32_256 : i32 to vector<2x128xi32>
    %780 = arith.cmpi sge, %778, %779 : vector<2x128xi32>
    %c96_i32_257 = arith.constant 96 : i32
    %781 = vector.broadcast %c96_i32_257 : i32 to vector<2x128xi32>
    %782 = arith.cmpi slt, %778, %781 : vector<2x128xi32>
    %783 = arith.andi %780, %782 : vector<2x128xi1>
    %784 = arith.select %783, %777, %776 : vector<2x128xi1>, vector<2x128xf32>
    %785 = vector.extract_strided_slice %784 {offsets = [0, 0], sizes = [2, 32], strides = [1, 1]} : vector<2x128xf32> to vector<2x32xf32>
    %786 = vector.extract_strided_slice %784 {offsets = [0, 32], sizes = [2, 32], strides = [1, 1]} : vector<2x128xf32> to vector<2x32xf32>
    %787 = vector.extract_strided_slice %784 {offsets = [0, 64], sizes = [2, 32], strides = [1, 1]} : vector<2x128xf32> to vector<2x32xf32>
    %788 = vector.extract_strided_slice %784 {offsets = [0, 96], sizes = [2, 32], strides = [1, 1]} : vector<2x128xf32> to vector<2x32xf32>
    %789 = arith.mulf %786, %764 : vector<2x32xf32>
    %790 = arith.mulf %785, %787 : vector<2x32xf32>
    %791 = arith.addf %789, %790 : vector<2x32xf32>
    %792 = math.tanh %791 : vector<2x32xf32>
    %793 = arith.mulf %788, %792 : vector<2x32xf32>
    %c8_258 = arith.constant 8 : index
    %c32_259 = arith.constant 32 : index
    %794 = vector.load %arg18[%c8_258, %c32_259] : memref<16x64xf32, #tpu.memory_space<vmem>>, vector<2x32xf32>
    tpu.vector_store %arg18[%c8_258, %c32_259], %793 {strides = array<i32>} : memref<16x64xf32, #tpu.memory_space<vmem>>, vector<2x32xf32>,
    %c6_260 = arith.constant 6 : index
    %c0_261 = arith.constant 0 : index
    %795 = vector.load %arg16[%c6_260, %c0_261] : memref<16x128xf32, #tpu.memory_space<vmem>>, vector<2x128xf32>
    %796 = arith.truncf %793 : vector<2x32xf32> to vector<2x32xbf16>
    %cst_262 = arith.constant dense<0.000000e+00> : vector<2x128xf32>
    %797 = tpu.matmul %796, %684, %cst_262 {dimension_numbers = #tpu.dot_dimension_numbers<[1], [0], [0], [1], [0, 0, 1, 1], [], []>} : vector<2x32xbf16>, vector<32x128xbf16>, vector<2x128xf32> -> vector<2x128xf32>
    %798 = arith.addf %795, %797 : vector<2x128xf32>
    %799 = arith.negf %798 : vector<2x128xf32>
    %800 = math.exp %799 : vector<2x128xf32>
    %cst_263 = arith.constant 1.000000e+00 : f32
    %801 = vector.broadcast %cst_263 : f32 to vector<2x128xf32>
    %802 = arith.addf %801, %800 : vector<2x128xf32>
    %803 = arith.divf %801, %802 : vector<2x128xf32>
    %804 = math.tanh %798 : vector<2x128xf32>
    %805 = tpu.iota {dimensions = array<i32: 1>} : vector<2x128xi32>
    %c64_i32_264 = arith.constant 64 : i32
    %806 = vector.broadcast %c64_i32_264 : i32 to vector<2x128xi32>
    %807 = arith.cmpi sge, %805, %806 : vector<2x128xi32>
    %c96_i32_265 = arith.constant 96 : i32
    %808 = vector.broadcast %c96_i32_265 : i32 to vector<2x128xi32>
    %809 = arith.cmpi slt, %805, %808 : vector<2x128xi32>
    %810 = arith.andi %807, %809 : vector<2x128xi1>
    %811 = arith.select %810, %804, %803 : vector<2x128xi1>, vector<2x128xf32>
    %812 = vector.extract_strided_slice %811 {offsets = [0, 0], sizes = [2, 32], strides = [1, 1]} : vector<2x128xf32> to vector<2x32xf32>
    %813 = vector.extract_strided_slice %811 {offsets = [0, 32], sizes = [2, 32], strides = [1, 1]} : vector<2x128xf32> to vector<2x32xf32>
    %814 = vector.extract_strided_slice %811 {offsets = [0, 64], sizes = [2, 32], strides = [1, 1]} : vector<2x128xf32> to vector<2x32xf32>
    %815 = vector.extract_strided_slice %811 {offsets = [0, 96], sizes = [2, 32], strides = [1, 1]} : vector<2x128xf32> to vector<2x32xf32>
    %816 = arith.mulf %813, %791 : vector<2x32xf32>
    %817 = arith.mulf %812, %814 : vector<2x32xf32>
    %818 = arith.addf %816, %817 : vector<2x32xf32>
    %819 = math.tanh %818 : vector<2x32xf32>
    %820 = arith.mulf %815, %819 : vector<2x32xf32>
    %c6_266 = arith.constant 6 : index
    %c32_267 = arith.constant 32 : index
    %821 = vector.load %arg18[%c6_266, %c32_267] : memref<16x64xf32, #tpu.memory_space<vmem>>, vector<2x32xf32>
    tpu.vector_store %arg18[%c6_266, %c32_267], %820 {strides = array<i32>} : memref<16x64xf32, #tpu.memory_space<vmem>>, vector<2x32xf32>,
    %c4_268 = arith.constant 4 : index
    %c0_269 = arith.constant 0 : index
    %822 = vector.load %arg16[%c4_268, %c0_269] : memref<16x128xf32, #tpu.memory_space<vmem>>, vector<2x128xf32>
    %823 = arith.truncf %820 : vector<2x32xf32> to vector<2x32xbf16>
    %cst_270 = arith.constant dense<0.000000e+00> : vector<2x128xf32>
    %824 = tpu.matmul %823, %684, %cst_270 {dimension_numbers = #tpu.dot_dimension_numbers<[1], [0], [0], [1], [0, 0, 1, 1], [], []>} : vector<2x32xbf16>, vector<32x128xbf16>, vector<2x128xf32> -> vector<2x128xf32>
    %825 = arith.addf %822, %824 : vector<2x128xf32>
    %826 = arith.negf %825 : vector<2x128xf32>
    %827 = math.exp %826 : vector<2x128xf32>
    %cst_271 = arith.constant 1.000000e+00 : f32
    %828 = vector.broadcast %cst_271 : f32 to vector<2x128xf32>
    %829 = arith.addf %828, %827 : vector<2x128xf32>
    %830 = arith.divf %828, %829 : vector<2x128xf32>
    %831 = math.tanh %825 : vector<2x128xf32>
    %832 = tpu.iota {dimensions = array<i32: 1>} : vector<2x128xi32>
    %c64_i32_272 = arith.constant 64 : i32
    %833 = vector.broadcast %c64_i32_272 : i32 to vector<2x128xi32>
    %834 = arith.cmpi sge, %832, %833 : vector<2x128xi32>
    %c96_i32_273 = arith.constant 96 : i32
    %835 = vector.broadcast %c96_i32_273 : i32 to vector<2x128xi32>
    %836 = arith.cmpi slt, %832, %835 : vector<2x128xi32>
    %837 = arith.andi %834, %836 : vector<2x128xi1>
    %838 = arith.select %837, %831, %830 : vector<2x128xi1>, vector<2x128xf32>
    %839 = vector.extract_strided_slice %838 {offsets = [0, 0], sizes = [2, 32], strides = [1, 1]} : vector<2x128xf32> to vector<2x32xf32>
    %840 = vector.extract_strided_slice %838 {offsets = [0, 32], sizes = [2, 32], strides = [1, 1]} : vector<2x128xf32> to vector<2x32xf32>
    %841 = vector.extract_strided_slice %838 {offsets = [0, 64], sizes = [2, 32], strides = [1, 1]} : vector<2x128xf32> to vector<2x32xf32>
    %842 = vector.extract_strided_slice %838 {offsets = [0, 96], sizes = [2, 32], strides = [1, 1]} : vector<2x128xf32> to vector<2x32xf32>
    %843 = arith.mulf %840, %818 : vector<2x32xf32>
    %844 = arith.mulf %839, %841 : vector<2x32xf32>
    %845 = arith.addf %843, %844 : vector<2x32xf32>
    %846 = math.tanh %845 : vector<2x32xf32>
    %847 = arith.mulf %842, %846 : vector<2x32xf32>
    %c4_274 = arith.constant 4 : index
    %c32_275 = arith.constant 32 : index
    %848 = vector.load %arg18[%c4_274, %c32_275] : memref<16x64xf32, #tpu.memory_space<vmem>>, vector<2x32xf32>
    tpu.vector_store %arg18[%c4_274, %c32_275], %847 {strides = array<i32>} : memref<16x64xf32, #tpu.memory_space<vmem>>, vector<2x32xf32>,
    %c2_276 = arith.constant 2 : index
    %c0_277 = arith.constant 0 : index
    %849 = vector.load %arg16[%c2_276, %c0_277] : memref<16x128xf32, #tpu.memory_space<vmem>>, vector<2x128xf32>
    %850 = arith.truncf %847 : vector<2x32xf32> to vector<2x32xbf16>
    %cst_278 = arith.constant dense<0.000000e+00> : vector<2x128xf32>
    %851 = tpu.matmul %850, %684, %cst_278 {dimension_numbers = #tpu.dot_dimension_numbers<[1], [0], [0], [1], [0, 0, 1, 1], [], []>} : vector<2x32xbf16>, vector<32x128xbf16>, vector<2x128xf32> -> vector<2x128xf32>
    %852 = arith.addf %849, %851 : vector<2x128xf32>
    %853 = arith.negf %852 : vector<2x128xf32>
    %854 = math.exp %853 : vector<2x128xf32>
    %cst_279 = arith.constant 1.000000e+00 : f32
    %855 = vector.broadcast %cst_279 : f32 to vector<2x128xf32>
    %856 = arith.addf %855, %854 : vector<2x128xf32>
    %857 = arith.divf %855, %856 : vector<2x128xf32>
    %858 = math.tanh %852 : vector<2x128xf32>
    %859 = tpu.iota {dimensions = array<i32: 1>} : vector<2x128xi32>
    %c64_i32_280 = arith.constant 64 : i32
    %860 = vector.broadcast %c64_i32_280 : i32 to vector<2x128xi32>
    %861 = arith.cmpi sge, %859, %860 : vector<2x128xi32>
    %c96_i32_281 = arith.constant 96 : i32
    %862 = vector.broadcast %c96_i32_281 : i32 to vector<2x128xi32>
    %863 = arith.cmpi slt, %859, %862 : vector<2x128xi32>
    %864 = arith.andi %861, %863 : vector<2x128xi1>
    %865 = arith.select %864, %858, %857 : vector<2x128xi1>, vector<2x128xf32>
    %866 = vector.extract_strided_slice %865 {offsets = [0, 0], sizes = [2, 32], strides = [1, 1]} : vector<2x128xf32> to vector<2x32xf32>
    %867 = vector.extract_strided_slice %865 {offsets = [0, 32], sizes = [2, 32], strides = [1, 1]} : vector<2x128xf32> to vector<2x32xf32>
    %868 = vector.extract_strided_slice %865 {offsets = [0, 64], sizes = [2, 32], strides = [1, 1]} : vector<2x128xf32> to vector<2x32xf32>
    %869 = vector.extract_strided_slice %865 {offsets = [0, 96], sizes = [2, 32], strides = [1, 1]} : vector<2x128xf32> to vector<2x32xf32>
    %870 = arith.mulf %867, %845 : vector<2x32xf32>
    %871 = arith.mulf %866, %868 : vector<2x32xf32>
    %872 = arith.addf %870, %871 : vector<2x32xf32>
    %873 = math.tanh %872 : vector<2x32xf32>
    %874 = arith.mulf %869, %873 : vector<2x32xf32>
    %c2_282 = arith.constant 2 : index
    %c32_283 = arith.constant 32 : index
    %875 = vector.load %arg18[%c2_282, %c32_283] : memref<16x64xf32, #tpu.memory_space<vmem>>, vector<2x32xf32>
    tpu.vector_store %arg18[%c2_282, %c32_283], %874 {strides = array<i32>} : memref<16x64xf32, #tpu.memory_space<vmem>>, vector<2x32xf32>,
    %c0_284 = arith.constant 0 : index
    %c0_285 = arith.constant 0 : index
    %876 = vector.load %arg16[%c0_284, %c0_285] : memref<16x128xf32, #tpu.memory_space<vmem>>, vector<2x128xf32>
    %877 = arith.truncf %874 : vector<2x32xf32> to vector<2x32xbf16>
    %cst_286 = arith.constant dense<0.000000e+00> : vector<2x128xf32>
    %878 = tpu.matmul %877, %684, %cst_286 {dimension_numbers = #tpu.dot_dimension_numbers<[1], [0], [0], [1], [0, 0, 1, 1], [], []>} : vector<2x32xbf16>, vector<32x128xbf16>, vector<2x128xf32> -> vector<2x128xf32>
    %879 = arith.addf %876, %878 : vector<2x128xf32>
    %880 = arith.negf %879 : vector<2x128xf32>
    %881 = math.exp %880 : vector<2x128xf32>
    %cst_287 = arith.constant 1.000000e+00 : f32
    %882 = vector.broadcast %cst_287 : f32 to vector<2x128xf32>
    %883 = arith.addf %882, %881 : vector<2x128xf32>
    %884 = arith.divf %882, %883 : vector<2x128xf32>
    %885 = math.tanh %879 : vector<2x128xf32>
    %886 = tpu.iota {dimensions = array<i32: 1>} : vector<2x128xi32>
    %c64_i32_288 = arith.constant 64 : i32
    %887 = vector.broadcast %c64_i32_288 : i32 to vector<2x128xi32>
    %888 = arith.cmpi sge, %886, %887 : vector<2x128xi32>
    %c96_i32_289 = arith.constant 96 : i32
    %889 = vector.broadcast %c96_i32_289 : i32 to vector<2x128xi32>
    %890 = arith.cmpi slt, %886, %889 : vector<2x128xi32>
    %891 = arith.andi %888, %890 : vector<2x128xi1>
    %892 = arith.select %891, %885, %884 : vector<2x128xi1>, vector<2x128xf32>
    %893 = vector.extract_strided_slice %892 {offsets = [0, 0], sizes = [2, 32], strides = [1, 1]} : vector<2x128xf32> to vector<2x32xf32>
    %894 = vector.extract_strided_slice %892 {offsets = [0, 32], sizes = [2, 32], strides = [1, 1]} : vector<2x128xf32> to vector<2x32xf32>
    %895 = vector.extract_strided_slice %892 {offsets = [0, 64], sizes = [2, 32], strides = [1, 1]} : vector<2x128xf32> to vector<2x32xf32>
    %896 = vector.extract_strided_slice %892 {offsets = [0, 96], sizes = [2, 32], strides = [1, 1]} : vector<2x128xf32> to vector<2x32xf32>
    %897 = arith.mulf %894, %872 : vector<2x32xf32>
    %898 = arith.mulf %893, %895 : vector<2x32xf32>
    %899 = arith.addf %897, %898 : vector<2x32xf32>
    %900 = math.tanh %899 : vector<2x32xf32>
    %901 = arith.mulf %896, %900 : vector<2x32xf32>
    %c0_290 = arith.constant 0 : index
    %c32_291 = arith.constant 32 : index
    %902 = vector.load %arg18[%c0_290, %c32_291] : memref<16x64xf32, #tpu.memory_space<vmem>>, vector<2x32xf32>
    tpu.vector_store %arg18[%c0_290, %c32_291], %901 {strides = array<i32>} : memref<16x64xf32, #tpu.memory_space<vmem>>, vector<2x32xf32>,
    %cst_292 = arith.constant 0.000000e+00 : f32
    %903 = vector.broadcast %cst_292 : f32 to vector<2x10xf32>
    %c0_293 = arith.constant 0 : index
    %c0_294 = arith.constant 0 : index
    %904 = vector.load %arg18[%c0_293, %c0_294] : memref<16x64xf32, #tpu.memory_space<vmem>>, vector<2x64xf32>
    %905 = arith.truncf %904 : vector<2x64xf32> to vector<2x64xbf16>
    %c0_295 = arith.constant 0 : index
    %c0_296 = arith.constant 0 : index
    %c0_297 = arith.constant 0 : index
    %906 = vector.load %arg13[%c0_295, %c0_296, %c0_297] : memref<8x64x10xbf16, #tpu.memory_space<vmem>>, vector<1x64x10xbf16>
    %907 = vector.shape_cast %906 : vector<1x64x10xbf16> to vector<64x10xbf16>
    %cst_298 = arith.constant dense<0.000000e+00> : vector<2x10xf32>
    %908 = tpu.matmul %905, %907, %cst_298 {dimension_numbers = #tpu.dot_dimension_numbers<[1], [0], [0], [1], [0, 0, 1, 1], [], []>} : vector<2x64xbf16>, vector<64x10xbf16>, vector<2x10xf32> -> vector<2x10xf32>
    %909 = arith.addf %903, %908 : vector<2x10xf32>
    %c2_299 = arith.constant 2 : index
    %c0_300 = arith.constant 0 : index
    %910 = vector.load %arg18[%c2_299, %c0_300] : memref<16x64xf32, #tpu.memory_space<vmem>>, vector<2x64xf32>
    %911 = arith.truncf %910 : vector<2x64xf32> to vector<2x64xbf16>
    %c1 = arith.constant 1 : index
    %c0_301 = arith.constant 0 : index
    %c0_302 = arith.constant 0 : index
    %912 = vector.load %arg13[%c1, %c0_301, %c0_302] : memref<8x64x10xbf16, #tpu.memory_space<vmem>>, vector<1x64x10xbf16>
    %913 = vector.shape_cast %912 : vector<1x64x10xbf16> to vector<64x10xbf16>
    %cst_303 = arith.constant dense<0.000000e+00> : vector<2x10xf32>
    %914 = tpu.matmul %911, %913, %cst_303 {dimension_numbers = #tpu.dot_dimension_numbers<[1], [0], [0], [1], [0, 0, 1, 1], [], []>} : vector<2x64xbf16>, vector<64x10xbf16>, vector<2x10xf32> -> vector<2x10xf32>
    %915 = arith.addf %909, %914 : vector<2x10xf32>
    %c4_304 = arith.constant 4 : index
    %c0_305 = arith.constant 0 : index
    %916 = vector.load %arg18[%c4_304, %c0_305] : memref<16x64xf32, #tpu.memory_space<vmem>>, vector<2x64xf32>
    %917 = arith.truncf %916 : vector<2x64xf32> to vector<2x64xbf16>
    %c2_306 = arith.constant 2 : index
    %c0_307 = arith.constant 0 : index
    %c0_308 = arith.constant 0 : index
    %918 = vector.load %arg13[%c2_306, %c0_307, %c0_308] : memref<8x64x10xbf16, #tpu.memory_space<vmem>>, vector<1x64x10xbf16>
    %919 = vector.shape_cast %918 : vector<1x64x10xbf16> to vector<64x10xbf16>
    %cst_309 = arith.constant dense<0.000000e+00> : vector<2x10xf32>
    %920 = tpu.matmul %917, %919, %cst_309 {dimension_numbers = #tpu.dot_dimension_numbers<[1], [0], [0], [1], [0, 0, 1, 1], [], []>} : vector<2x64xbf16>, vector<64x10xbf16>, vector<2x10xf32> -> vector<2x10xf32>
    %921 = arith.addf %915, %920 : vector<2x10xf32>
    %c6_310 = arith.constant 6 : index
    %c0_311 = arith.constant 0 : index
    %922 = vector.load %arg18[%c6_310, %c0_311] : memref<16x64xf32, #tpu.memory_space<vmem>>, vector<2x64xf32>
    %923 = arith.truncf %922 : vector<2x64xf32> to vector<2x64xbf16>
    %c3 = arith.constant 3 : index
    %c0_312 = arith.constant 0 : index
    %c0_313 = arith.constant 0 : index
    %924 = vector.load %arg13[%c3, %c0_312, %c0_313] : memref<8x64x10xbf16, #tpu.memory_space<vmem>>, vector<1x64x10xbf16>
    %925 = vector.shape_cast %924 : vector<1x64x10xbf16> to vector<64x10xbf16>
    %cst_314 = arith.constant dense<0.000000e+00> : vector<2x10xf32>
    %926 = tpu.matmul %923, %925, %cst_314 {dimension_numbers = #tpu.dot_dimension_numbers<[1], [0], [0], [1], [0, 0, 1, 1], [], []>} : vector<2x64xbf16>, vector<64x10xbf16>, vector<2x10xf32> -> vector<2x10xf32>
    %927 = arith.addf %921, %926 : vector<2x10xf32>
    %c8_315 = arith.constant 8 : index
    %c0_316 = arith.constant 0 : index
    %928 = vector.load %arg18[%c8_315, %c0_316] : memref<16x64xf32, #tpu.memory_space<vmem>>, vector<2x64xf32>
    %929 = arith.truncf %928 : vector<2x64xf32> to vector<2x64xbf16>
    %c4_317 = arith.constant 4 : index
    %c0_318 = arith.constant 0 : index
    %c0_319 = arith.constant 0 : index
    %930 = vector.load %arg13[%c4_317, %c0_318, %c0_319] : memref<8x64x10xbf16, #tpu.memory_space<vmem>>, vector<1x64x10xbf16>
    %931 = vector.shape_cast %930 : vector<1x64x10xbf16> to vector<64x10xbf16>
    %cst_320 = arith.constant dense<0.000000e+00> : vector<2x10xf32>
    %932 = tpu.matmul %929, %931, %cst_320 {dimension_numbers = #tpu.dot_dimension_numbers<[1], [0], [0], [1], [0, 0, 1, 1], [], []>} : vector<2x64xbf16>, vector<64x10xbf16>, vector<2x10xf32> -> vector<2x10xf32>
    %933 = arith.addf %927, %932 : vector<2x10xf32>
    %c10_321 = arith.constant 10 : index
    %c0_322 = arith.constant 0 : index
    %934 = vector.load %arg18[%c10_321, %c0_322] : memref<16x64xf32, #tpu.memory_space<vmem>>, vector<2x64xf32>
    %935 = arith.truncf %934 : vector<2x64xf32> to vector<2x64xbf16>
    %c5 = arith.constant 5 : index
    %c0_323 = arith.constant 0 : index
    %c0_324 = arith.constant 0 : index
    %936 = vector.load %arg13[%c5, %c0_323, %c0_324] : memref<8x64x10xbf16, #tpu.memory_space<vmem>>, vector<1x64x10xbf16>
    %937 = vector.shape_cast %936 : vector<1x64x10xbf16> to vector<64x10xbf16>
    %cst_325 = arith.constant dense<0.000000e+00> : vector<2x10xf32>
    %938 = tpu.matmul %935, %937, %cst_325 {dimension_numbers = #tpu.dot_dimension_numbers<[1], [0], [0], [1], [0, 0, 1, 1], [], []>} : vector<2x64xbf16>, vector<64x10xbf16>, vector<2x10xf32> -> vector<2x10xf32>
    %939 = arith.addf %933, %938 : vector<2x10xf32>
    %c12_326 = arith.constant 12 : index
    %c0_327 = arith.constant 0 : index
    %940 = vector.load %arg18[%c12_326, %c0_327] : memref<16x64xf32, #tpu.memory_space<vmem>>, vector<2x64xf32>
    %941 = arith.truncf %940 : vector<2x64xf32> to vector<2x64xbf16>
    %c6_328 = arith.constant 6 : index
    %c0_329 = arith.constant 0 : index
    %c0_330 = arith.constant 0 : index
    %942 = vector.load %arg13[%c6_328, %c0_329, %c0_330] : memref<8x64x10xbf16, #tpu.memory_space<vmem>>, vector<1x64x10xbf16>
    %943 = vector.shape_cast %942 : vector<1x64x10xbf16> to vector<64x10xbf16>
    %cst_331 = arith.constant dense<0.000000e+00> : vector<2x10xf32>
    %944 = tpu.matmul %941, %943, %cst_331 {dimension_numbers = #tpu.dot_dimension_numbers<[1], [0], [0], [1], [0, 0, 1, 1], [], []>} : vector<2x64xbf16>, vector<64x10xbf16>, vector<2x10xf32> -> vector<2x10xf32>
    %945 = arith.addf %939, %944 : vector<2x10xf32>
    %c14_332 = arith.constant 14 : index
    %c0_333 = arith.constant 0 : index
    %946 = vector.load %arg18[%c14_332, %c0_333] : memref<16x64xf32, #tpu.memory_space<vmem>>, vector<2x64xf32>
    %947 = arith.truncf %946 : vector<2x64xf32> to vector<2x64xbf16>
    %c7 = arith.constant 7 : index
    %c0_334 = arith.constant 0 : index
    %c0_335 = arith.constant 0 : index
    %948 = vector.load %arg13[%c7, %c0_334, %c0_335] : memref<8x64x10xbf16, #tpu.memory_space<vmem>>, vector<1x64x10xbf16>
    %949 = vector.shape_cast %948 : vector<1x64x10xbf16> to vector<64x10xbf16>
    %cst_336 = arith.constant dense<0.000000e+00> : vector<2x10xf32>
    %950 = tpu.matmul %947, %949, %cst_336 {dimension_numbers = #tpu.dot_dimension_numbers<[1], [0], [0], [1], [0, 0, 1, 1], [], []>} : vector<2x64xbf16>, vector<64x10xbf16>, vector<2x10xf32> -> vector<2x10xf32>
    %951 = arith.addf %945, %950 : vector<2x10xf32>
    %c0_337 = arith.constant 0 : index
    %c0_338 = arith.constant 0 : index
    %952 = vector.load %arg14[%c0_337, %c0_338] : memref<1x10xf32, #tpu.memory_space<vmem>>, vector<1x10xf32>
    %953 = vector.broadcast %952 : vector<1x10xf32> to vector<2x10xf32>
    %954 = arith.addf %951, %953 : vector<2x10xf32>
    %c0_339 = arith.constant 0 : index
    %c0_340 = arith.constant 0 : index
    %955 = vector.load %arg15[%c0_339, %c0_340] : memref<2x10xf32, #tpu.memory_space<vmem>>, vector<2x10xf32>
    tpu.vector_store %arg15[%c0_339, %c0_340], %954 {strides = array<i32>} : memref<2x10xf32, #tpu.memory_space<vmem>>, vector<2x10xf32>,
    return
  }
}

</mosaic_0001>

<bundles_post_ra>
// kernel: brnn_forward.1
= control target key start
LH: loop header
LB: loop body
LE: loop exit
PB: predicated region body
PF: predicated region fallthrough
CT: control target
= control target key end

     0   :  { %v4637_v1 = vmov 0.0   ;;  %vm4638_vm0 = vmmov 0   ;;  %vm74_vm1 = vcmask 130048   ;;  %v4639_v5 = vmov 0   ;;  %s5651_s0 = inlined_call_operand.vmem [shape: bf16[16,16], index: 0, kind: input, shape index: {}]   ;;  %s5652_s1 = inlined_call_operand.vmem [shape: bf16[16,128], index: 1, kind: input, shape index: {}]   ;;  %s5653_s2 = inlined_call_operand.vmem [shape: bf16[32,128], index: 2, kind: input, shape index: {}]   ;;  %s5654_s3 = inlined_call_operand.vmem [shape: f32[1,128], index: 3, kind: input, shape index: {}]   ;;  %s5655_s4 = inlined_call_operand.vmem [shape: bf16[16,128], index: 4, kind: input, shape index: {}]   ;;  %s5656_s5 = inlined_call_operand.vmem [shape: bf16[32,128], index: 5, kind: input, shape index: {}]   ;;  %s5657_s6 = inlined_call_operand.vmem [shape: f32[1,128], index: 6, kind: input, shape index: {}]   ;;  %s5658_s7 = inlined_call_operand.vmem [shape: bf16[64,128], index: 7, kind: input, shape index: {}]   ;;  %s5659_s8 = inlined_call_operand.vmem [shape: bf16[32,128], index: 8, kind: input, shape index: {}]   ;;  %s5660_s9 = inlined_call_operand.vmem [shape: f32[1,128], index: 9, kind: input, shape index: {}]   ;;  %s5661_s10 = inlined_call_operand.vmem [shape: bf16[64,128], index: 10, kind: input, shape index: {}]   ;;  %s5662_s11 = inlined_call_operand.vmem [shape: bf16[32,128], index: 11, kind: input, shape index: {}]   ;;  %s5663_s12 = inlined_call_operand.vmem [shape: f32[1,128], index: 12, kind: input, shape index: {}]   ;;  %s5664_s13 = inlined_call_operand.vmem [shape: bf16[8,64,10], index: 13, kind: input, shape index: {}]   ;;  %s5665_s14 = inlined_call_operand.vmem [shape: f32[1,10], index: 14, kind: input, shape index: {}]   ;;  %s5666_s15 = inlined_call_operand.hbm [shape: f32[2,10], index: 15, kind: output, shape index: {}]  }
   0x1   :  { %v4306_v0 = vld [vmem:[%s5652_s1] sm:$0xff]   ;;  %3912 = vmatprep.subr.bf16.mxu0 %v4637_v1  ;;  %3918 = vmatprep.subr.bf16.mxu1 %v4637_v1  ;;  %v4747_v4 = vld [vmem:[%s5653_s2 + $0x8] sm:$0xff]  }
   0x2   :  { %v4731_v2 = vld [vmem:[%s5651_s0] sm:$0xff]   ;;  %3913 = vmatpush3.bf16.msra.mxu0 %v4306_v0  ;;  %3914 = vmatprep.mubr.msk.bf16.mxu0 %vm4638_vm0, %v4637_v1 }
   0x3   :  { %v4738_v3 = vld [vmem:[%s5653_s2] sm:$0xff]   ;;  %3922 = vmatprep.mubr.msk.bf16.mxu1 %vm4638_vm0, %v4637_v1  ;;  %3926 = vmatprep.subr.bf16.mxu0 %v4637_v1 }
   0x4   :  { %3919 = vmatpush3.bf16.msra.mxu1 %v4738_v3 }
   0x5   :  { %3915 = vmatmul.mubr.msk.bf16.vlgmr.msra.gmra.mrb[0].mxu0 %vm74_vm1, %v4731_v2  ;;  %3920 = vmatprep.subr.bf16.mxu1 %v4637_v1 }
   0x6   :  { %3927 = vmatpush3.bf16.msra.mxu0 %v4738_v3  ;;  %3930 = vmatprep.mubr.msk.bf16.mxu0 %vm4638_vm0, %v4637_v1 }
   0x7   :  { %3928 = vmatprep.subr.bf16.mxu0 %v4637_v1 }
   0x8   :  { %3921 = vmatpush3.bf16.msra.mxu1 %v4747_v4 }
   0x9   :  { %3934 = vmatprep.subr.bf16.mxu1 %v4637_v1 }
   0xa   :  { %3929 = vmatpush3.bf16.msra.mxu0 %v4747_v4 }
   0xb   :  { %3923 = vmatmul.mubr.bf16.vlgmr.msra.gmra.mrb[0].mxu1 %v4639_v5  ;;  %3942 = vmatprep.subr.bf16.mxu0 %v4637_v1 }
   0xc   :  { %3935 = vmatpush3.bf16.msra.mxu1 %v4738_v3  ;;  %3938 = vmatprep.mubr.msk.bf16.mxu1 %vm4638_vm0, %v4637_v1 }
   0xd   :  { %3936 = vmatprep.subr.bf16.mxu1 %v4637_v1 }
  0x10   :  { %3937 = vmatpush3.bf16.msra.mxu1 %v4747_v4 }
  0x11   :  { %3950 = vmatprep.subr.bf16.mxu1 %v4637_v1 }
  0x12   :  { %20 = vsyncpa [#allocation6], 0  ;;  %v3578_v6 = vld [vmem:[%s5654_s3] ss:$0 sm:$0xff]  ;;  %v190_v21 = vlaneseq  ;;  %s4640_s3 = smov 64   ;;  %s4641_s25 = smov 32  }
  0x13   :  { %vm138_vm5 = vcmask 261120   ;;  %vm217_vm6 = vcmask 254976   ;;  %vm917_vm7 = vcmask 517376   ;;  %vm1514_vm8 = vcmask 523264   ;;  %v4326_v24 = vld [vmem:[%s5664_s13 + $0x28] sm:$0xff]   ;;  %s4642_s24 = smov [#allocation5]  }
  0x14   :  { %v191_v23 = vand.u32 127, %v190_v21  ;;  %vm3562_vm9 = vcmask 74752  }
  0x16   :  { %vm192_vm2 = vcmp.ge.s32.totalorder %v191_v23, 64  ;;  %vm193_vm3 = vcmp.lt.s32.totalorder %v191_v23, 96 }
  0x17   :  { %vm4770_vm4 = vmand %vm192_vm2, %vm193_vm3 }
  0xd8   :  { %v112_v7 = vpop.f32.mrb[0].mxu0 }
  0xd9   :  { %v113_v8 = vadd.f32 %v3578_v6, %v112_v7  ;;  %v3916_v9 = vpop.f32.mrb[1].mxu0 }
  0xda   :  { %v115_v10 = vpop.f32.mrb[2].mxu0 }
  0xdb   :  { %119 = vst [vmem:[#allocation2] sm:$0xff] %v113_v8  ;;  %v116_v11 = vadd.f32 %v3578_v6, %v115_v10  ;;  %v3917_v12 = vpop.f32.mrb[3].mxu0 }
  0xdd   :  { %120 = vst [vmem:[#allocation2 + $0x8] sm:$0xff] %v116_v11 }
  0xde   :  { %v176_v13 = vpop.f32.mrb[0].mxu1 }
  0xdf   :  { %v3924_v14 = vpop.f32.mrb[1].mxu1 }
  0xe0   :  { %v179_v15 = vpop.f32.mrb[2].mxu1 }
  0xe1   :  { %v3925_v16 = vpop.f32.mrb[3].mxu1 }
  0xe2   :  { %v125_v17 = vld [vmem:[#allocation2] sm:$0x3]  ;;  %v219_v38 = vld [vmem:[#allocation2 + $0x2] sm:$0x3]  ;;  %v298_v60 = vld [vmem:[#allocation2 + $0x4] sm:$0x3] }
  0xe3   :  { %v182_v18 = vadd.f32 %v176_v13, %v125_v17  ;;  %v377_v23 = vld [vmem:[#allocation2 + $0x6] sm:$0x3] }
  0xe5   :  { %v3584_v19 = vmul.f32 -1.442695, %v182_v18 }
  0xe7   :  { %4357 = vpow2.f32 %v3584_v19 }
  0xe8   :  { %4359 = vtanh.f32 %v182_v18 }
  0xf1   :  { %v4358_v20 = vpop.eup %4357 }
  0xf2   :  { %v186_v22 = vadd.f32 1.0, %v4358_v20  ;;  %v4360_v25 = vpop.eup %4359 }
  0xf4   :  { %4361 = vrcp.f32 %v186_v22 }
  0xfe   :  { %v4362_v26 = vpop.eup %4361 }
  0xff   :  { %v195_v27 = vsel %vm4770_vm4, %v4360_v25, %v4362_v26 }
 0x100   :  { %198 = vrot.lane.b32.xlu0 %v195_v27, %s4640_s3  ;;  %v196_v30 = vmul.f32 0.0, %v195_v27 }
 0x172   :  { %v199_v28 = vpop.permute.xlu0 %198 }
 0x173   :  { %v201_v29 = vmul.f32 %v199_v28, %v195_v27 }
 0x175   :  { %203 = vrot.lane.b32.xlu0 %v201_v29, %s4641_s25 }
 0x1e7   :  { %v204_v31 = vpop.permute.xlu0 %203 }
 0x1e8   :  { %v206_v32 = vadd.f32 %v204_v31, %v196_v30 }
 0x1ea   :  { %4363 = vtanh.f32 %v206_v32 }
 0x1f4   :  { %v4364_v33 = vpop.eup %4363 }
 0x1f5   :  { %209 = vrot.lane.b32.xlu1 %v4364_v33, %s4640_s3 }
 0x267   :  { %v210_v34 = vpop.permute.xlu1 %209 }
 0x268   :  { %v4779_v35 = vmul.f32 %v210_v34, %v195_v27 }
 0x26a   :  { %v220_v36 = vpack.c.bf16 %v4779_v35, %v4779_v35 }
 0x26c   :  { %222 = vrot.lane.b32.xlu1 %v220_v36, %s4641_s25 }
 0x2de   :  { %v223_v37 = vpop.permute.xlu1 %222 }
 0x2df   :  { %3931 = vmatmul.mubr.msk.bf16.vlgmr.msra.gmra.mrb[4].mxu0 %vm138_vm5, %v223_v37 }
 0x2e0   :  { %3943 = vmatpush3.bf16.msra.mxu0 %v4738_v3  ;;  %3946 = vmatprep.mubr.msk.bf16.mxu0 %vm4638_vm0, %v4637_v1 }
 0x2e1   :  { %3944 = vmatprep.subr.bf16.mxu0 %v4637_v1 }
 0x2e4   :  { %3945 = vmatpush3.bf16.msra.mxu0 %v4747_v4 }
 0x2e5   :  { %3958 = vmatprep.subr.bf16.mxu0 %v4637_v1 }
 0x3b2   :  { %v261_v39 = vpop.f32.mrb[4].mxu0 }
 0x3b3   :  { %v267_v40 = vadd.f32 %v261_v39, %v219_v38  ;;  %v3932_v41 = vpop.f32.mrb[5].mxu0 }
 0x3b4   :  { %v264_v42 = vpop.f32.mrb[6].mxu0 }
 0x3b5   :  { %v3586_v43 = vmul.f32 -1.442695, %v267_v40  ;;  %v3933_v44 = vpop.f32.mrb[7].mxu0 }
 0x3b7   :  { %4365 = vpow2.f32 %v3586_v43 }
 0x3b8   :  { %4367 = vtanh.f32 %v267_v40 }
 0x3c1   :  { %v4366_v45 = vpop.eup %4365 }
 0x3c2   :  { %v271_v46 = vadd.f32 1.0, %v4366_v45  ;;  %v4368_v47 = vpop.eup %4367 }
 0x3c4   :  { %4369 = vrcp.f32 %v271_v46 }
 0x3ce   :  { %v4370_v48 = vpop.eup %4369 }
 0x3cf   :  { %v275_v49 = vsel %vm4770_vm4, %v4368_v47, %v4370_v48  ;;  %v456_v47 = vld [vmem:[#allocation2 + $0x8] sm:$0x3] }
 0x3d0   :  { %278 = vrot.lane.b32.xlu0 %v275_v49, %s4640_s3  ;;  %v276_v52 = vmul.f32 %v275_v49, %v206_v32 }
 0x442   :  { %v279_v50 = vpop.permute.xlu0 %278 }
 0x443   :  { %v281_v51 = vmul.f32 %v279_v50, %v275_v49 }
 0x445   :  { %283 = vrot.lane.b32.xlu1 %v281_v51, %s4641_s25 }
 0x4b7   :  { %v284_v53 = vpop.permute.xlu1 %283 }
 0x4b8   :  { %v286_v54 = vadd.f32 %v284_v53, %v276_v52 }
 0x4ba   :  { %4371 = vtanh.f32 %v286_v54 }
 0x4c4   :  { %v4372_v55 = vpop.eup %4371 }
 0x4c5   :  { %289 = vrot.lane.b32.xlu0 %v4372_v55, %s4640_s3 }
 0x537   :  { %v290_v56 = vpop.permute.xlu0 %289 }
 0x538   :  { %v4796_v57 = vmul.f32 %v290_v56, %v275_v49 }
 0x53a   :  { %v299_v58 = vpack.c.bf16 %v4796_v57, %v4796_v57 }
 0x53c   :  { %301 = vrot.lane.b32.xlu1 %v299_v58, %s4641_s25 }
 0x5ae   :  { %v302_v59 = vpop.permute.xlu1 %301 }
 0x5af   :  { %3939 = vmatmul.mubr.msk.bf16.vlgmr.msra.gmra.mrb[4].mxu1 %vm138_vm5, %v302_v59 }
 0x5b0   :  { %3951 = vmatpush3.bf16.msra.mxu1 %v4738_v3  ;;  %3954 = vmatprep.mubr.msk.bf16.mxu1 %vm4638_vm0, %v4637_v1 }
 0x5b1   :  { %3952 = vmatprep.subr.bf16.mxu1 %v4637_v1 }
 0x5b4   :  { %3953 = vmatpush3.bf16.msra.mxu1 %v4747_v4 }
 0x5b5   :  { %3966 = vmatprep.subr.bf16.mxu1 %v4637_v1 }
 0x682   :  { %v340_v61 = vpop.f32.mrb[4].mxu1 }
 0x683   :  { %v346_v62 = vadd.f32 %v340_v61, %v298_v60  ;;  %v3940_v63 = vpop.f32.mrb[5].mxu1 }
 0x684   :  { %v343_v0 = vpop.f32.mrb[6].mxu1 }
 0x685   :  { %v3588_v6 = vmul.f32 -1.442695, %v346_v62  ;;  %v3941_v7 = vpop.f32.mrb[7].mxu1 }
 0x687   :  { %4373 = vpow2.f32 %v3588_v6 }
 0x688   :  { %4375 = vtanh.f32 %v346_v62 }
 0x691   :  { %v4374_v8 = vpop.eup %4373 }
 0x692   :  { %v350_v9 = vadd.f32 1.0, %v4374_v8  ;;  %v4376_v10 = vpop.eup %4375 }
 0x694   :  { %4377 = vrcp.f32 %v350_v9 }
 0x69e   :  { %v4378_v11 = vpop.eup %4377 }
 0x69f   :  { %v354_v12 = vsel %vm4770_vm4, %v4376_v10, %v4378_v11  ;;  %v535_v11 = vld [vmem:[#allocation2 + $0xa] sm:$0x3] }
 0x6a0   :  { %357 = vrot.lane.b32.xlu0 %v354_v12, %s4640_s3  ;;  %v355_v15 = vmul.f32 %v354_v12, %v286_v54 }
 0x712   :  { %v358_v13 = vpop.permute.xlu0 %357 }
 0x713   :  { %v360_v14 = vmul.f32 %v358_v13, %v354_v12 }
 0x715   :  { %362 = vrot.lane.b32.xlu1 %v360_v14, %s4641_s25 }
 0x787   :  { %v363_v16 = vpop.permute.xlu1 %362 }
 0x788   :  { %v365_v17 = vadd.f32 %v363_v16, %v355_v15 }
 0x78a   :  { %4379 = vtanh.f32 %v365_v17 }
 0x794   :  { %v4380_v18 = vpop.eup %4379 }
 0x795   :  { %368 = vrot.lane.b32.xlu0 %v4380_v18, %s4640_s3 }
 0x807   :  { %v369_v19 = vpop.permute.xlu0 %368 }
 0x808   :  { %v4813_v20 = vmul.f32 %v369_v19, %v354_v12 }
 0x80a   :  { %v378_v21 = vpack.c.bf16 %v4813_v20, %v4813_v20 }
 0x80c   :  { %380 = vrot.lane.b32.xlu1 %v378_v21, %s4641_s25 }
 0x87e   :  { %v381_v22 = vpop.permute.xlu1 %380 }
 0x87f   :  { %3947 = vmatmul.mubr.msk.bf16.vlgmr.msra.gmra.mrb[8].mxu0 %vm138_vm5, %v381_v22 }
 0x880   :  { %3959 = vmatpush3.bf16.msra.mxu0 %v4738_v3  ;;  %3962 = vmatprep.mubr.msk.bf16.mxu0 %vm4638_vm0, %v4637_v1 }
 0x881   :  { %3960 = vmatprep.subr.bf16.mxu0 %v4637_v1 }
 0x884   :  { %3961 = vmatpush3.bf16.msra.mxu0 %v4747_v4 }
 0x885   :  { %3974 = vmatprep.subr.bf16.mxu0 %v4637_v1 }
 0x952   :  { %v419_v25 = vpop.f32.mrb[8].mxu0 }
 0x953   :  { %v425_v26 = vadd.f32 %v419_v25, %v377_v23  ;;  %v3948_v27 = vpop.f32.mrb[9].mxu0 }
 0x954   :  { %v422_v28 = vpop.f32.mrb[10].mxu0 }
 0x955   :  { %v3590_v29 = vmul.f32 -1.442695, %v425_v26  ;;  %v3949_v30 = vpop.f32.mrb[11].mxu0 }
 0x957   :  { %4381 = vpow2.f32 %v3590_v29 }
 0x958   :  { %4383 = vtanh.f32 %v425_v26 }
 0x961   :  { %v4382_v31 = vpop.eup %4381 }
 0x962   :  { %v429_v32 = vadd.f32 1.0, %v4382_v31  ;;  %v4384_v33 = vpop.eup %4383 }
 0x964   :  { %4385 = vrcp.f32 %v429_v32 }
 0x96e   :  { %v4386_v34 = vpop.eup %4385 }
 0x96f   :  { %v433_v36 = vsel %vm4770_vm4, %v4384_v33, %v4386_v34  ;;  %v614_v33 = vld [vmem:[#allocation2 + $0xc] sm:$0x3] }
 0x970   :  { %436 = vrot.lane.b32.xlu0 %v433_v36, %s4640_s3  ;;  %v434_v39 = vmul.f32 %v433_v36, %v365_v17 }
 0x9e2   :  { %v437_v37 = vpop.permute.xlu0 %436 }
 0x9e3   :  { %v439_v38 = vmul.f32 %v437_v37, %v433_v36 }
 0x9e5   :  { %441 = vrot.lane.b32.xlu1 %v439_v38, %s4641_s25 }
 0xa57   :  { %v442_v40 = vpop.permute.xlu1 %441 }
 0xa58   :  { %v444_v41 = vadd.f32 %v442_v40, %v434_v39 }
 0xa5a   :  { %4387 = vtanh.f32 %v444_v41 }
 0xa64   :  { %v4388_v42 = vpop.eup %4387 }
 0xa65   :  { %447 = vrot.lane.b32.xlu0 %v4388_v42, %s4640_s3 }
 0xad7   :  { %v448_v43 = vpop.permute.xlu0 %447 }
 0xad8   :  { %v4830_v44 = vmul.f32 %v448_v43, %v433_v36 }
 0xada   :  { %v457_v45 = vpack.c.bf16 %v4830_v44, %v4830_v44 }
 0xadc   :  { %459 = vrot.lane.b32.xlu1 %v457_v45, %s4641_s25 }
 0xb4e   :  { %v460_v46 = vpop.permute.xlu1 %459 }
 0xb4f   :  { %3955 = vmatmul.mubr.msk.bf16.vlgmr.msra.gmra.mrb[8].mxu1 %vm138_vm5, %v460_v46 }
 0xb50   :  { %3967 = vmatpush3.bf16.msra.mxu1 %v4738_v3  ;;  %3970 = vmatprep.mubr.msk.bf16.mxu1 %vm4638_vm0, %v4637_v1 }
 0xb51   :  { %3968 = vmatprep.subr.bf16.mxu1 %v4637_v1 }
 0xb54   :  { %3969 = vmatpush3.bf16.msra.mxu1 %v4747_v4 }
 0xb55   :  { %3982 = vmatprep.subr.bf16.mxu1 %v4637_v1 }
 0xc22   :  { %v498_v48 = vpop.f32.mrb[8].mxu1 }
 0xc23   :  { %v504_v49 = vadd.f32 %v498_v48, %v456_v47  ;;  %v3956_v50 = vpop.f32.mrb[9].mxu1 }
 0xc24   :  { %v501_v51 = vpop.f32.mrb[10].mxu1 }
 0xc25   :  { %v3592_v52 = vmul.f32 -1.442695, %v504_v49  ;;  %v3957_v53 = vpop.f32.mrb[11].mxu1 }
 0xc27   :  { %4389 = vpow2.f32 %v3592_v52  ;;  %v4310_v52 = vld [vmem:[%s5655_s4] sm:$0xff]  }
 0xc28   :  { %4391 = vtanh.f32 %v504_v49 }
 0xc31   :  { %v4390_v54 = vpop.eup %4389 }
 0xc32   :  { %v508_v55 = vadd.f32 1.0, %v4390_v54  ;;  %v4392_v56 = vpop.eup %4391  ;;  %v4891_v54 = vld [vmem:[%s5656_s5] sm:$0xff]  }
 0xc34   :  { %4393 = vrcp.f32 %v508_v55  ;;  %v4898_v55 = vld [vmem:[%s5656_s5 + $0x8] sm:$0xff]  }
 0xc3e   :  { %v4394_v58 = vpop.eup %4393 }
 0xc3f   :  { %v512_v59 = vsel %vm4770_vm4, %v4392_v56, %v4394_v58 }
 0xc40   :  { %515 = vrot.lane.b32.xlu0 %v512_v59, %s4640_s3  ;;  %v513_v62 = vmul.f32 %v512_v59, %v444_v41 }
 0xcb2   :  { %v516_v60 = vpop.permute.xlu0 %515 }
 0xcb3   :  { %v518_v61 = vmul.f32 %v516_v60, %v512_v59 }
 0xcb5   :  { %520 = vrot.lane.b32.xlu1 %v518_v61, %s4641_s25 }
 0xd27   :  { %v521_v63 = vpop.permute.xlu1 %520 }
 0xd28   :  { %v523_v0 = vadd.f32 %v521_v63, %v513_v62 }
 0xd2a   :  { %4395 = vtanh.f32 %v523_v0 }
 0xd34   :  { %v4396_v6 = vpop.eup %4395 }
 0xd35   :  { %526 = vrot.lane.b32.xlu0 %v4396_v6, %s4640_s3 }
 0xda7   :  { %v527_v7 = vpop.permute.xlu0 %526 }
 0xda8   :  { %v4847_v8 = vmul.f32 %v527_v7, %v512_v59  ;;  %v3599_v59 = vld [vmem:[%s5657_s6] ss:$0 sm:$0xff]  ;;  %v4910_v7 = vld [vmem:[#allocation2 + $0xe] sm:$0x3] }
 0xdaa   :  { %v536_v9 = vpack.c.bf16 %v4847_v8, %v4847_v8 }
 0xdac   :  { %538 = vrot.lane.b32.xlu1 %v536_v9, %s4641_s25 }
 0xe1e   :  { %v539_v10 = vpop.permute.xlu1 %538 }
 0xe1f   :  { %3963 = vmatmul.mubr.msk.bf16.vlgmr.msra.gmra.mrb[12].mxu0 %vm138_vm5, %v539_v10 }
 0xe20   :  { %3975 = vmatpush3.bf16.msra.mxu0 %v4738_v3  ;;  %3978 = vmatprep.mubr.msk.bf16.mxu0 %vm4638_vm0, %v4637_v1 }
 0xe21   :  { %3976 = vmatprep.subr.bf16.mxu0 %v4637_v1 }
 0xe24   :  { %3977 = vmatpush3.bf16.msra.mxu0 %v4747_v4 }
 0xe25   :  { %3988 = vmatprep.subr.bf16.mxu0 %v4637_v1 }
 0xef2   :  { %v577_v12 = vpop.f32.mrb[12].mxu0 }
 0xef3   :  { %v583_v13 = vadd.f32 %v577_v12, %v535_v11  ;;  %v3964_v14 = vpop.f32.mrb[13].mxu0 }
 0xef4   :  { %v580_v15 = vpop.f32.mrb[14].mxu0 }
 0xef5   :  { %v3594_v16 = vmul.f32 -1.442695, %v583_v13  ;;  %v3965_v17 = vpop.f32.mrb[15].mxu0 }
 0xef7   :  { %4397 = vpow2.f32 %v3594_v16 }
 0xef8   :  { %4399 = vtanh.f32 %v583_v13 }
 0xf01   :  { %v4398_v18 = vpop.eup %4397 }
 0xf02   :  { %v587_v19 = vadd.f32 1.0, %v4398_v18  ;;  %v4400_v3 = vpop.eup %4399 }
 0xf04   :  { %4401 = vrcp.f32 %v587_v19 }
 0xf0e   :  { %v4402_v21 = vpop.eup %4401 }
 0xf0f   :  { %v591_v22 = vsel %vm4770_vm4, %v4400_v3, %v4402_v21 }
 0xf10   :  { %594 = vrot.lane.b32.xlu0 %v591_v22, %s4640_s3  ;;  %v592_v25 = vmul.f32 %v591_v22, %v523_v0 }
 0xf82   :  { %v595_v4 = vpop.permute.xlu0 %594 }
 0xf83   :  { %v597_v23 = vmul.f32 %v595_v4, %v591_v22 }
 0xf85   :  { %599 = vrot.lane.b32.xlu1 %v597_v23, %s4641_s25 }
 0xff7   :  { %v600_v26 = vpop.permute.xlu1 %599 }
 0xff8   :  { %v602_v27 = vadd.f32 %v600_v26, %v592_v25 }
 0xffa   :  { %4403 = vtanh.f32 %v602_v27 }
0x1004   :  { %v4404_v28 = vpop.eup %4403 }
0x1005   :  { %605 = vrot.lane.b32.xlu0 %v4404_v28, %s4640_s3 }
0x1077   :  { %v606_v29 = vpop.permute.xlu0 %605 }
0x1078   :  { %v4864_v30 = vmul.f32 %v606_v29, %v591_v22 }
0x107a   :  { %v615_v31 = vpack.c.bf16 %v4864_v30, %v4864_v30 }
0x107c   :  { %617 = vrot.lane.b32.xlu1 %v615_v31, %s4641_s25 }
0x10ee   :  { %v618_v32 = vpop.permute.xlu1 %617 }
0x10ef   :  { %3971 = vmatmul.mubr.msk.bf16.vlgmr.msra.gmra.mrb[12].mxu1 %vm138_vm5, %v618_v32 }
0x10f0   :  { %3984 = vmatprep.mubr.msk.bf16.mxu1 %vm4638_vm0, %v4637_v1  ;;  %3983 = vmatpush3.bf16.msra.mxu1 %v4310_v52 }
0x10f1   :  { %3996 = vmatprep.subr.bf16.mxu1 %v4637_v1 }
0x10f7   :  { %3985 = vmatmul.mubr.msk.bf16.vlgmr.msra.gmra.mrb[16].mxu1 %vm74_vm1, %v4731_v2 }
0x10f8   :  { %4000 = vmatprep.mubr.msk.bf16.mxu1 %vm4638_vm0, %v4637_v1  ;;  %3997 = vmatpush3.bf16.msra.mxu1 %v4891_v54 }
0x10f9   :  { %3998 = vmatprep.subr.bf16.mxu1 %v4637_v1 }
0x10fc   :  { %3999 = vmatpush3.bf16.msra.mxu1 %v4898_v55 }
0x10fd   :  { %4012 = vmatprep.subr.bf16.mxu1 %v4637_v1 }
0x11c2   :  { %v656_v34 = vpop.f32.mrb[12].mxu1 }
0x11c3   :  { %v662_v36 = vadd.f32 %v656_v34, %v614_v33  ;;  %v3972_v37 = vpop.f32.mrb[13].mxu1 }
0x11c4   :  { %v659_v38 = vpop.f32.mrb[14].mxu1 }
0x11c5   :  { %v3596_v39 = vmul.f32 -1.442695, %v662_v36  ;;  %v3973_v40 = vpop.f32.mrb[15].mxu1 }
0x11c7   :  { %4405 = vpow2.f32 %v3596_v39 }
0x11c8   :  { %4407 = vtanh.f32 %v662_v36 }
0x11ca   :  { %v821_v60 = vpop.f32.mrb[16].mxu1 }
0x11cb   :  { %v822_v61 = vadd.f32 %v3599_v59, %v821_v60  ;;  %v3986_v62 = vpop.f32.mrb[17].mxu1 }
0x11cc   :  { %v824_v63 = vpop.f32.mrb[18].mxu1 }
0x11cd   :  { %828 = vst [vmem:[#allocation2] sm:$0xff] %v822_v61  ;;  %v825_v0 = vadd.f32 %v3599_v59, %v824_v63  ;;  %v3987_v6 = vpop.f32.mrb[19].mxu1 }
0x11cf   :  { %829 = vst [vmem:[#allocation2 + $0x8] sm:$0xff] %v825_v0 }
0x11d1   :  { %v4406_v41 = vpop.eup %4405 }
0x11d2   :  { %v666_v42 = vadd.f32 1.0, %v4406_v41  ;;  %v4408_v43 = vpop.eup %4407 }
0x11d4   :  { %4409 = vrcp.f32 %v666_v42 }
0x11d6   :  { %v834_v14 = vld [vmem:[#allocation2 + $0xe] sm:$0x3]  ;;  %v919_v38 = vld [vmem:[#allocation2 + $0xc] sm:$0x3]  ;;  %v998_v6 = vld [vmem:[#allocation2 + $0xa] sm:$0x3] }
0x11de   :  { %v4410_v45 = vpop.eup %4409 }
0x11df   :  { %v670_v46 = vsel %vm4770_vm4, %v4408_v43, %v4410_v45 }
0x11e0   :  { %673 = vrot.lane.b32.xlu0 %v670_v46, %s4640_s3  ;;  %v671_v49 = vmul.f32 %v670_v46, %v602_v27 }
0x1252   :  { %v674_v47 = vpop.permute.xlu0 %673 }
0x1253   :  { %v676_v48 = vmul.f32 %v674_v47, %v670_v46 }
0x1255   :  { %678 = vrot.lane.b32.xlu1 %v676_v48, %s4641_s25 }
0x12c7   :  { %v679_v50 = vpop.permute.xlu1 %678 }
0x12c8   :  { %v4876_v51 = vadd.f32 %v679_v50, %v671_v49 }
0x12ca   :  { %4411 = vtanh.f32 %v4876_v51 }
0x12d4   :  { %v4412_v53 = vpop.eup %4411 }
0x12d5   :  { %684 = vrot.lane.b32.xlu0 %v4412_v53, %s4640_s3 }
0x1347   :  { %v685_v2 = vpop.permute.xlu0 %684 }
0x1348   :  { %v4902_v56 = vmul.f32 %v685_v2, %v670_v46 }
0x134a   :  { %v694_v58 = vpack.c.bf16 %v4902_v56, %v4902_v56 }
0x134c   :  { %696 = vrot.lane.b32.xlu1 %v694_v58, %s4641_s25 }
0x13be   :  { %v697_v9 = vpop.permute.xlu1 %696 }
0x13bf   :  { %3979 = vmatmul.mubr.msk.bf16.vlgmr.msra.gmra.mrb[16].mxu0 %vm138_vm5, %v697_v9 }
0x13c0   :  { %3989 = vmatpush3.bf16.msra.mxu0 %v4891_v54  ;;  %3992 = vmatprep.mubr.msk.bf16.mxu0 %vm4638_vm0, %v4637_v1 }
0x13c1   :  { %3990 = vmatprep.subr.bf16.mxu0 %v4637_v1 }
0x13c4   :  { %3991 = vmatpush3.bf16.msra.mxu0 %v4898_v55 }
0x13c5   :  { %4004 = vmatprep.subr.bf16.mxu0 %v4637_v1 }
0x13c7   :  { %3993 = vmatmul.mubr.bf16.vlgmr.msra.gmra.mrb[20].mxu0 %v4639_v5 }
0x13c8   :  { %4005 = vmatpush3.bf16.msra.mxu0 %v4891_v54  ;;  %4008 = vmatprep.mubr.msk.bf16.mxu0 %vm4638_vm0, %v4637_v1 }
0x13c9   :  { %4006 = vmatprep.subr.bf16.mxu0 %v4637_v1 }
0x13cc   :  { %4007 = vmatpush3.bf16.msra.mxu0 %v4898_v55 }
0x13cd   :  { %4020 = vmatprep.subr.bf16.mxu0 %v4637_v1 }
0x1492   :  { %v4926_v10 = vpop.f32.mrb[16].mxu0 }
0x1493   :  { %v3980_v11 = vpop.f32.mrb[17].mxu0 }
0x1494   :  { %v738_v12 = vpop.f32.mrb[18].mxu0 }
0x1495   :  { %v3981_v13 = vpop.f32.mrb[19].mxu0 }
0x149a   :  { %v881_v15 = vpop.f32.mrb[20].mxu0 }
0x149b   :  { %v887_v16 = vadd.f32 %v881_v15, %v834_v14  ;;  %v3994_v17 = vpop.f32.mrb[21].mxu0 }
0x149c   :  { %v884_v18 = vpop.f32.mrb[22].mxu0 }
0x149d   :  { %v3604_v19 = vmul.f32 -1.442695, %v887_v16  ;;  %v3995_v3 = vpop.f32.mrb[23].mxu0 }
0x149f   :  { %4413 = vpow2.f32 %v3604_v19 }
0x14a0   :  { %4415 = vtanh.f32 %v887_v16 }
0x14a9   :  { %v4414_v21 = vpop.eup %4413 }
0x14aa   :  { %v891_v22 = vadd.f32 1.0, %v4414_v21  ;;  %v4416_v4 = vpop.eup %4415 }
0x14ac   :  { %4417 = vrcp.f32 %v891_v22 }
0x14b6   :  { %v4418_v23 = vpop.eup %4417 }
0x14b7   :  { %v895_v25 = vsel %vm4770_vm4, %v4416_v4, %v4418_v23 }
0x14b8   :  { %898 = vrot.lane.b32.xlu0 %v895_v25, %s4640_s3  ;;  %v896_v28 = vmul.f32 0.0, %v895_v25 }
0x152a   :  { %v899_v26 = vpop.permute.xlu0 %898 }
0x152b   :  { %v901_v27 = vmul.f32 %v899_v26, %v895_v25 }
0x152d   :  { %903 = vrot.lane.b32.xlu1 %v901_v27, %s4641_s25 }
0x159f   :  { %v904_v29 = vpop.permute.xlu1 %903 }
0x15a0   :  { %v906_v31 = vadd.f32 %v904_v29, %v896_v28 }
0x15a2   :  { %4419 = vtanh.f32 %v906_v31 }
0x15ac   :  { %v4420_v32 = vpop.eup %4419 }
0x15ad   :  { %909 = vrot.lane.b32.xlu0 %v4420_v32, %s4640_s3  ;;  %v1077_v32 = vld [vmem:[#allocation2 + $0x8] sm:$0x3] }
0x161f   :  { %v910_v33 = vpop.permute.xlu0 %909 }
0x1620   :  { %v4933_v34 = vmul.f32 %v910_v33, %v895_v25 }
0x1622   :  { %v920_v36 = vpack.c.bf16 %v4933_v34, %v4933_v34 }
0x1624   :  { %922 = vrot.lane.b32.xlu1 %v920_v36, %s4641_s25 }
0x1696   :  { %v923_v37 = vpop.permute.xlu1 %922 }
0x1697   :  { %4001 = vmatmul.mubr.msk.bf16.vlgmr.msra.gmra.mrb[20].mxu1 %vm138_vm5, %v923_v37 }
0x1698   :  { %4013 = vmatpush3.bf16.msra.mxu1 %v4891_v54  ;;  %4016 = vmatprep.mubr.msk.bf16.mxu1 %vm4638_vm0, %v4637_v1 }
0x1699   :  { %4014 = vmatprep.subr.bf16.mxu1 %v4637_v1 }
0x169c   :  { %4015 = vmatpush3.bf16.msra.mxu1 %v4898_v55 }
0x169d   :  { %4028 = vmatprep.subr.bf16.mxu1 %v4637_v1 }
0x176a   :  { %v961_v39 = vpop.f32.mrb[20].mxu1 }
0x176b   :  { %v967_v40 = vadd.f32 %v961_v39, %v919_v38  ;;  %v4002_v41 = vpop.f32.mrb[21].mxu1 }
0x176c   :  { %v964_v42 = vpop.f32.mrb[22].mxu1 }
0x176d   :  { %v3606_v43 = vmul.f32 -1.442695, %v967_v40  ;;  %v4003_v45 = vpop.f32.mrb[23].mxu1 }
0x176f   :  { %4421 = vpow2.f32 %v3606_v43 }
0x1770   :  { %4423 = vtanh.f32 %v967_v40 }
0x1779   :  { %v4422_v46 = vpop.eup %4421 }
0x177a   :  { %v971_v47 = vadd.f32 1.0, %v4422_v46  ;;  %v4424_v48 = vpop.eup %4423 }
0x177c   :  { %4425 = vrcp.f32 %v971_v47 }
0x1786   :  { %v4426_v49 = vpop.eup %4425 }
0x1787   :  { %v975_v50 = vsel %vm4770_vm4, %v4424_v48, %v4426_v49 }
0x1788   :  { %978 = vrot.lane.b32.xlu0 %v975_v50, %s4640_s3  ;;  %v976_v2 = vmul.f32 %v975_v50, %v906_v31 }
0x17fa   :  { %v979_v52 = vpop.permute.xlu0 %978 }
0x17fb   :  { %v981_v53 = vmul.f32 %v979_v52, %v975_v50 }
0x17fd   :  { %983 = vrot.lane.b32.xlu1 %v981_v53, %s4641_s25 }
0x186f   :  { %v984_v58 = vpop.permute.xlu1 %983 }
0x1870   :  { %v986_v59 = vadd.f32 %v984_v58, %v976_v2 }
0x1872   :  { %4427 = vtanh.f32 %v986_v59 }
0x187c   :  { %v4428_v60 = vpop.eup %4427 }
0x187d   :  { %989 = vrot.lane.b32.xlu0 %v4428_v60, %s4640_s3 }
0x18ef   :  { %v990_v61 = vpop.permute.xlu0 %989 }
0x18f0   :  { %v4950_v62 = vmul.f32 %v990_v61, %v975_v50  ;;  %v1156_v61 = vld [vmem:[#allocation2 + $0x6] sm:$0x3] }
0x18f2   :  { %v999_v63 = vpack.c.bf16 %v4950_v62, %v4950_v62 }
0x18f4   :  { %1001 = vrot.lane.b32.xlu1 %v999_v63, %s4641_s25 }
0x1966   :  { %v1002_v0 = vpop.permute.xlu1 %1001 }
0x1967   :  { %4009 = vmatmul.mubr.msk.bf16.vlgmr.msra.gmra.mrb[24].mxu0 %vm138_vm5, %v1002_v0 }
0x1968   :  { %4021 = vmatpush3.bf16.msra.mxu0 %v4891_v54  ;;  %4024 = vmatprep.mubr.msk.bf16.mxu0 %vm4638_vm0, %v4637_v1 }
0x1969   :  { %4022 = vmatprep.subr.bf16.mxu0 %v4637_v1 }
0x196c   :  { %4023 = vmatpush3.bf16.msra.mxu0 %v4898_v55 }
0x196d   :  { %4036 = vmatprep.subr.bf16.mxu0 %v4637_v1 }
0x1a3a   :  { %v1040_v9 = vpop.f32.mrb[24].mxu0 }
0x1a3b   :  { %v1046_v11 = vadd.f32 %v1040_v9, %v998_v6  ;;  %v4010_v12 = vpop.f32.mrb[25].mxu0 }
0x1a3c   :  { %v1043_v13 = vpop.f32.mrb[26].mxu0 }
0x1a3d   :  { %v3608_v14 = vmul.f32 -1.442695, %v1046_v11  ;;  %v4011_v15 = vpop.f32.mrb[27].mxu0 }
0x1a3f   :  { %4429 = vpow2.f32 %v3608_v14 }
0x1a40   :  { %4431 = vtanh.f32 %v1046_v11 }
0x1a49   :  { %v4430_v16 = vpop.eup %4429 }
0x1a4a   :  { %v1050_v17 = vadd.f32 1.0, %v4430_v16  ;;  %v4432_v18 = vpop.eup %4431 }
0x1a4c   :  { %4433 = vrcp.f32 %v1050_v17 }
0x1a56   :  { %v4434_v19 = vpop.eup %4433 }
0x1a57   :  { %v1054_v3 = vsel %vm4770_vm4, %v4432_v18, %v4434_v19 }
0x1a58   :  { %1057 = vrot.lane.b32.xlu0 %v1054_v3, %s4640_s3  ;;  %v1055_v4 = vmul.f32 %v1054_v3, %v986_v59 }
0x1aca   :  { %v1058_v21 = vpop.permute.xlu0 %1057 }
0x1acb   :  { %v1060_v22 = vmul.f32 %v1058_v21, %v1054_v3 }
0x1acd   :  { %1062 = vrot.lane.b32.xlu1 %v1060_v22, %s4641_s25 }
0x1b3f   :  { %v1063_v23 = vpop.permute.xlu1 %1062 }
0x1b40   :  { %v1065_v25 = vadd.f32 %v1063_v23, %v1055_v4 }
0x1b42   :  { %4435 = vtanh.f32 %v1065_v25 }
0x1b4c   :  { %v4436_v26 = vpop.eup %4435 }
0x1b4d   :  { %1068 = vrot.lane.b32.xlu0 %v4436_v26, %s4640_s3 }
0x1bbf   :  { %v1069_v27 = vpop.permute.xlu0 %1068 }
0x1bc0   :  { %v4967_v28 = vmul.f32 %v1069_v27, %v1054_v3 }
0x1bc2   :  { %v1078_v29 = vpack.c.bf16 %v4967_v28, %v4967_v28 }
0x1bc4   :  { %1080 = vrot.lane.b32.xlu1 %v1078_v29, %s4641_s25  ;;  %v1235_v29 = vld [vmem:[#allocation2 + $0x4] sm:$0x3] }
0x1c36   :  { %v1081_v31 = vpop.permute.xlu1 %1080 }
0x1c37   :  { %4017 = vmatmul.mubr.msk.bf16.vlgmr.msra.gmra.mrb[24].mxu1 %vm138_vm5, %v1081_v31 }
0x1c38   :  { %4029 = vmatpush3.bf16.msra.mxu1 %v4891_v54  ;;  %4032 = vmatprep.mubr.msk.bf16.mxu1 %vm4638_vm0, %v4637_v1 }
0x1c39   :  { %4030 = vmatprep.subr.bf16.mxu1 %v4637_v1 }
0x1c3c   :  { %4031 = vmatpush3.bf16.msra.mxu1 %v4898_v55 }
0x1c3d   :  { %4044 = vmatprep.subr.bf16.mxu1 %v4637_v1 }
0x1d0a   :  { %v1119_v33 = vpop.f32.mrb[24].mxu1 }
0x1d0b   :  { %v1125_v36 = vadd.f32 %v1119_v33, %v1077_v32  ;;  %v4018_v37 = vpop.f32.mrb[25].mxu1 }
0x1d0c   :  { %v1122_v38 = vpop.f32.mrb[26].mxu1 }
0x1d0d   :  { %v3610_v39 = vmul.f32 -1.442695, %v1125_v36  ;;  %v4019_v40 = vpop.f32.mrb[27].mxu1 }
0x1d0f   :  { %4437 = vpow2.f32 %v3610_v39 }
0x1d10   :  { %4439 = vtanh.f32 %v1125_v36 }
0x1d19   :  { %v4438_v41 = vpop.eup %4437 }
0x1d1a   :  { %v1129_v42 = vadd.f32 1.0, %v4438_v41  ;;  %v4440_v43 = vpop.eup %4439 }
0x1d1c   :  { %4441 = vrcp.f32 %v1129_v42 }
0x1d26   :  { %v4442_v45 = vpop.eup %4441 }
0x1d27   :  { %v1133_v46 = vsel %vm4770_vm4, %v4440_v43, %v4442_v45 }
0x1d28   :  { %1136 = vrot.lane.b32.xlu0 %v1133_v46, %s4640_s3  ;;  %v1134_v49 = vmul.f32 %v1133_v46, %v1065_v25 }
0x1d9a   :  { %v1137_v47 = vpop.permute.xlu0 %1136 }
0x1d9b   :  { %v1139_v48 = vmul.f32 %v1137_v47, %v1133_v46 }
0x1d9d   :  { %1141 = vrot.lane.b32.xlu1 %v1139_v48, %s4641_s25 }
0x1e0f   :  { %v1142_v50 = vpop.permute.xlu1 %1141 }
0x1e10   :  { %v1144_v52 = vadd.f32 %v1142_v50, %v1134_v49 }
0x1e12   :  { %4443 = vtanh.f32 %v1144_v52 }
0x1e1c   :  { %v4444_v53 = vpop.eup %4443 }
0x1e1d   :  { %1147 = vrot.lane.b32.xlu0 %v4444_v53, %s4640_s3 }
0x1e8f   :  { %v1148_v2 = vpop.permute.xlu0 %1147 }
0x1e90   :  { %v4984_v58 = vmul.f32 %v1148_v2, %v1133_v46  ;;  %v1314_v2 = vld [vmem:[#allocation2 + $0x2] sm:$0x3] }
0x1e92   :  { %v1157_v59 = vpack.c.bf16 %v4984_v58, %v4984_v58 }
0x1e94   :  { %1159 = vrot.lane.b32.xlu1 %v1157_v59, %s4641_s25 }
0x1f06   :  { %v1160_v60 = vpop.permute.xlu1 %1159 }
0x1f07   :  { %4025 = vmatmul.mubr.msk.bf16.vlgmr.msra.gmra.mrb[28].mxu0 %vm138_vm5, %v1160_v60 }
0x1f08   :  { %4037 = vmatpush3.bf16.msra.mxu0 %v4891_v54  ;;  %4040 = vmatprep.mubr.msk.bf16.mxu0 %vm4638_vm0, %v4637_v1 }
0x1f09   :  { %4038 = vmatprep.subr.bf16.mxu0 %v4637_v1 }
0x1f0c   :  { %4039 = vmatpush3.bf16.msra.mxu0 %v4898_v55 }
0x1f0d   :  { %4052 = vmatprep.subr.bf16.mxu0 %v4637_v1 }
0x1fda   :  { %v1198_v63 = vpop.f32.mrb[28].mxu0 }
0x1fdb   :  { %v1204_v0 = vadd.f32 %v1198_v63, %v1156_v61  ;;  %v4026_v6 = vpop.f32.mrb[29].mxu0 }
0x1fdc   :  { %v1201_v9 = vpop.f32.mrb[30].mxu0 }
0x1fdd   :  { %v3612_v11 = vmul.f32 -1.442695, %v1204_v0  ;;  %v4027_v12 = vpop.f32.mrb[31].mxu0 }
0x1fdf   :  { %4445 = vpow2.f32 %v3612_v11 }
0x1fe0   :  { %4447 = vtanh.f32 %v1204_v0 }
0x1fe9   :  { %v4446_v13 = vpop.eup %4445 }
0x1fea   :  { %v1208_v14 = vadd.f32 1.0, %v4446_v13  ;;  %v4448_v15 = vpop.eup %4447 }
0x1fec   :  { %4449 = vrcp.f32 %v1208_v14 }
0x1ff6   :  { %v4450_v16 = vpop.eup %4449 }
0x1ff7   :  { %v1212_v17 = vsel %vm4770_vm4, %v4448_v15, %v4450_v16 }
0x1ff8   :  { %1215 = vrot.lane.b32.xlu0 %v1212_v17, %s4640_s3  ;;  %v1213_v3 = vmul.f32 %v1212_v17, %v1144_v52 }
0x206a   :  { %v1216_v18 = vpop.permute.xlu0 %1215 }
0x206b   :  { %v1218_v19 = vmul.f32 %v1216_v18, %v1212_v17 }
0x206d   :  { %1220 = vrot.lane.b32.xlu1 %v1218_v19, %s4641_s25 }
0x20df   :  { %v1221_v21 = vpop.permute.xlu1 %1220 }
0x20e0   :  { %v1223_v22 = vadd.f32 %v1221_v21, %v1213_v3 }
0x20e2   :  { %4451 = vtanh.f32 %v1223_v22 }
0x20ec   :  { %v4452_v4 = vpop.eup %4451 }
0x20ed   :  { %1226 = vrot.lane.b32.xlu0 %v4452_v4, %s4640_s3 }
0x215f   :  { %v1227_v23 = vpop.permute.xlu0 %1226 }
0x2160   :  { %v5001_v25 = vmul.f32 %v1227_v23, %v1212_v17  ;;  %v741_v17 = vadd.f32 %v4926_v10, %v4910_v7 }
0x2162   :  { %v1236_v26 = vpack.c.bf16 %v5001_v25, %v5001_v25  ;;  %v3598_v18 = vmul.f32 -1.442695, %v741_v17 }
0x2164   :  { %1238 = vrot.lane.b32.xlu1 %v1236_v26, %s4641_s25 }
0x21d6   :  { %v1239_v27 = vpop.permute.xlu1 %1238 }
0x21d7   :  { %4033 = vmatmul.mubr.msk.bf16.vlgmr.msra.gmra.mrb[28].mxu1 %vm138_vm5, %v1239_v27 }
0x21d8   :  { %4045 = vmatpush3.bf16.msra.mxu1 %v4891_v54  ;;  %4048 = vmatprep.mubr.msk.bf16.mxu1 %vm4638_vm0, %v4637_v1 }
0x21d9   :  { %4046 = vmatprep.subr.bf16.mxu1 %v4637_v1 }
0x21dc   :  { %4047 = vmatpush3.bf16.msra.mxu1 %v4898_v55 }
0x21dd   :  { %4064 = vmatprep.subr.bf16.mxu1 %v4637_v1 }
0x22aa   :  { %v1277_v31 = vpop.f32.mrb[28].mxu1 }
0x22ab   :  { %v1283_v32 = vadd.f32 %v1277_v31, %v1235_v29  ;;  %v4034_v33 = vpop.f32.mrb[29].mxu1 }
0x22ac   :  { %v1280_v36 = vpop.f32.mrb[30].mxu1 }
0x22ad   :  { %v3614_v37 = vmul.f32 -1.442695, %v1283_v32  ;;  %v4035_v38 = vpop.f32.mrb[31].mxu1 }
0x22af   :  { %4453 = vpow2.f32 %v3614_v37 }
0x22b0   :  { %4455 = vtanh.f32 %v1283_v32 }
0x22b9   :  { %v4454_v39 = vpop.eup %4453 }
0x22ba   :  { %v1287_v40 = vadd.f32 1.0, %v4454_v39  ;;  %v4456_v54 = vpop.eup %4455 }
0x22bc   :  { %4457 = vrcp.f32 %v1287_v40 }
0x22c6   :  { %v4458_v41 = vpop.eup %4457 }
0x22c7   :  { %v1291_v42 = vsel %vm4770_vm4, %v4456_v54, %v4458_v41 }
0x22c8   :  { %1294 = vrot.lane.b32.xlu0 %v1291_v42, %s4640_s3  ;;  %v1292_v45 = vmul.f32 %v1291_v42, %v1223_v22 }
0x233a   :  { %v1295_v55 = vpop.permute.xlu0 %1294 }
0x233b   :  { %v1297_v43 = vmul.f32 %v1295_v55, %v1291_v42 }
0x233d   :  { %1299 = vrot.lane.b32.xlu1 %v1297_v43, %s4641_s25 }
0x23af   :  { %v1300_v46 = vpop.permute.xlu1 %1299 }
0x23b0   :  { %v1302_v47 = vadd.f32 %v1300_v46, %v1292_v45 }
0x23b2   :  { %4459 = vtanh.f32 %v1302_v47 }
0x23bc   :  { %v4460_v48 = vpop.eup %4459 }
0x23bd   :  { %1305 = vrot.lane.b32.xlu0 %v4460_v48, %s4640_s3 }
0x242f   :  { %v1306_v49 = vpop.permute.xlu0 %1305 }
0x2430   :  { %v5018_v50 = vmul.f32 %v1306_v49, %v1291_v42 }
0x2432   :  { %v1315_v52 = vpack.c.bf16 %v5018_v50, %v5018_v50 }
0x2434   :  { %1317 = vrot.lane.b32.xlu1 %v1315_v52, %s4641_s25 }
0x24a6   :  { %v1318_v53 = vpop.permute.xlu1 %1317 }
0x24a7   :  { %4041 = vmatmul.mubr.msk.bf16.vlgmr.msra.gmra.mrb[32].mxu0 %vm138_vm5, %v1318_v53 }
0x24a8   :  { %4060 = vmatprep.mubr.msk.bf16.mxu0 %vm4638_vm0, %v4637_v1 }
0x257a   :  { %v1356_v59 = vpop.f32.mrb[32].mxu0 }
0x257b   :  { %v1362_v60 = vadd.f32 %v1356_v59, %v1314_v2  ;;  %v4042_v61 = vpop.f32.mrb[33].mxu0 }
0x257c   :  { %v1359_v63 = vpop.f32.mrb[34].mxu0 }
0x257d   :  { %v3616_v0 = vmul.f32 -1.442695, %v1362_v60  ;;  %v4043_v6 = vpop.f32.mrb[35].mxu0  ;;  %v4313_v63 = vld [vmem:[%s5658_s7] sm:$0xff]  }
0x257e   :  { %4053 = vmatpush3.bf16.msra.mxu0 %v4313_v63 }
0x257f   :  { %4461 = vpow2.f32 %v3616_v0  ;;  %v4314_v0 = vld [vmem:[%s5658_s7 + $0x8] sm:$0xff]   ;;  %4054 = vmatprep.subr.bf16.mxu0 %v4637_v1 }
0x2580   :  { %4463 = vtanh.f32 %v1362_v60 }
0x2582   :  { %4055 = vmatpush3.bf16.msra.mxu0 %v4314_v0 }
0x2583   :  { %4056 = vmatprep.subr.bf16.mxu0 %v4637_v1 }
0x2589   :  { %v4462_v9 = vpop.eup %4461 }
0x258a   :  { %v1366_v11 = vadd.f32 1.0, %v4462_v9  ;;  %v4464_v12 = vpop.eup %4463 }
0x258c   :  { %4465 = vrcp.f32 %v1366_v11  ;;  %v5115_v11 = vld [vmem:[%s5659_s8 + $0x8] sm:$0xff]  }
0x258d   :  { %4467 = vpow2.f32 %v3598_v18 }
0x2596   :  { %v4466_v13 = vpop.eup %4465 }
0x2597   :  { %v1370_v14 = vsel %vm4770_vm4, %v4464_v12, %v4466_v13  ;;  %v4468_v19 = vpop.eup %4467 }
0x2598   :  { %1373 = vrot.lane.b32.xlu0 %v1370_v14, %s4640_s3  ;;  %v1371_v3 = vmul.f32 %v1370_v14, %v1302_v47  ;;  %v745_v21 = vadd.f32 1.0, %v4468_v19 }
0x260a   :  { %v1374_v15 = vpop.permute.xlu0 %1373 }
0x260b   :  { %v1376_v16 = vmul.f32 %v1374_v15, %v1370_v14 }
0x260d   :  { %1378 = vrot.lane.b32.xlu1 %v1376_v16, %s4641_s25 }
0x267f   :  { %v1379_v22 = vpop.permute.xlu1 %1378 }
0x2680   :  { %v5032_v4 = vadd.f32 %v1379_v22, %v1371_v3 }
0x2682   :  { %4469 = vtanh.f32 %v5032_v4 }
0x2683   :  { %4471 = vrcp.f32 %v745_v21 }
0x2684   :  { %4473 = vtanh.f32 %v741_v17 }
0x268c   :  { %v4470_v23 = vpop.eup %4469 }
0x268d   :  { %v4472_v26 = vpop.eup %4471  ;;  %1384 = vrot.lane.b32.xlu0 %v4470_v23, %s4640_s3 }
0x268e   :  { %v4474_v27 = vpop.eup %4473 }
0x268f   :  { %v5038_v7 = vsel %vm4770_vm4, %v4474_v27, %v4472_v26 }
0x2690   :  { %v750_v37 = vmul.f32 %v5038_v7, %v4876_v51 }
0x2691   :  { %752 = vrot.lane.b32.xlu0 %v5038_v7, %s4640_s3 }
0x26ff   :  { %v1385_v10 = vpop.permute.xlu0 %1384 }
0x2700   :  { %v1387_v29 = vmul.f32 %v1385_v10, %v1370_v14  ;;  %v3619_v10 = vld [vmem:[%s5660_s9] ss:$0 sm:$0xff] }
0x2702   :  { %v1394_v31 = vpack.c.bf16 %v1387_v29, %v1387_v29 }
0x2703   :  { %v753_v32 = vpop.permute.xlu0 %752 }
0x2704   :  { %v755_v33 = vmul.f32 %v753_v32, %v5038_v7  ;;  %1396 = vrot.lane.b32.xlu1 %v1394_v31, %s4641_s25 }
0x2706   :  { %757 = vrot.lane.b32.xlu0 %v755_v33, %s4641_s25 }
0x2776   :  { %v1397_v36 = vpop.permute.xlu1 %1396 }
0x2777   :  { %4049 = vmatmul.mubr.msk.bf16.vlgmr.msra.gmra.mrb[32].mxu1 %vm138_vm5, %v1397_v36 }
0x2778   :  { %v758_v38 = vpop.permute.xlu0 %757  ;;  %4068 = vmatprep.mubr.msk.bf16.mxu1 %vm4638_vm0, %v4637_v1 }
0x2779   :  { %v760_v39 = vadd.f32 %v758_v38, %v750_v37 }
0x277b   :  { %4475 = vtanh.f32 %v760_v39 }
0x2785   :  { %v4476_v40 = vpop.eup %4475 }
0x2786   :  { %763 = vrot.lane.b32.xlu0 %v4476_v40, %s4640_s3 }
0x278a   :  { %214 = vrot.lane.b32.xlu0 %v4779_v35, %s4641_s25 }
0x278e   :  { %373 = vrot.lane.b32.xlu0 %v4813_v20, %s4641_s25 }
0x2792   :  { %531 = vrot.lane.b32.xlu0 %v4847_v8, %s4641_s25 }
0x2796   :  { %689 = vrot.lane.b32.xlu0 %v4902_v56, %s4641_s25 }
0x279a   :  { %914 = vrot.lane.b32.xlu0 %v4933_v34, %s4640_s3  ;;  %v1393_v34 = vld [vmem:[#allocation2] sm:$0x3] }
0x279e   :  { %1073 = vrot.lane.b32.xlu0 %v4967_v28, %s4640_s3 }
0x27a2   :  { %1231 = vrot.lane.b32.xlu0 %v5001_v25, %s4640_s3 }
0x27a6   :  { %1389 = vrot.lane.b32.xlu0 %v1387_v29, %s4640_s3 }
0x27f8   :  { %v764_v35 = vpop.permute.xlu0 %763 }
0x27f9   :  { %v766_v61 = vmul.f32 %v764_v35, %v5038_v7 }
0x27fc   :  { %v215_v20 = vpop.permute.xlu0 %214 }
0x27fd   :  { %218 = vst.msk [vmem:[#allocation3] sm:$0x3] %vm217_vm6, %v215_v20 }
0x2800   :  { %v374_v8 = vpop.permute.xlu0 %373 }
0x2801   :  { %376 = vst.msk [vmem:[#allocation3 + $0x4] sm:$0x3] %vm217_vm6, %v374_v8 }
0x2804   :  { %v532_v51 = vpop.permute.xlu0 %531 }
0x2805   :  { %534 = vst.msk [vmem:[#allocation3 + $0x8] sm:$0x3] %vm217_vm6, %v532_v51 }
0x2808   :  { %v690_v56 = vpop.permute.xlu0 %689 }
0x2809   :  { %692 = vst.msk [vmem:[#allocation3 + $0xc] sm:$0x3] %vm217_vm6, %v690_v56 }
0x284a   :  { %v1435_v28 = vpop.f32.mrb[32].mxu1 }
0x284b   :  { %v1441_v54 = vadd.f32 %v1435_v28, %v1393_v34  ;;  %v4050_v25 = vpop.f32.mrb[33].mxu1 }
0x284c   :  { %v1438_v41 = vpop.f32.mrb[34].mxu1 }
0x284d   :  { %v3618_v42 = vmul.f32 -1.442695, %v1441_v54  ;;  %v4051_v55 = vpop.f32.mrb[35].mxu1 }
0x284f   :  { %4477 = vpow2.f32 %v3618_v42 }
0x2850   :  { %4479 = vtanh.f32 %v1441_v54 }
0x2859   :  { %v4478_v43 = vpop.eup %4477 }
0x285a   :  { %v1445_v45 = vadd.f32 1.0, %v4478_v43  ;;  %v4480_v46 = vpop.eup %4479 }
0x285c   :  { %4481 = vrcp.f32 %v1445_v45 }
0x2866   :  { %v4482_v47 = vpop.eup %4481 }
0x2867   :  { %v1449_v48 = vsel %vm4770_vm4, %v4480_v46, %v4482_v47 }
0x2868   :  { %1452 = vrot.lane.b32.xlu1 %v1449_v48, %s4640_s3  ;;  %v1450_v53 = vmul.f32 %v1449_v48, %v5032_v4 }
0x28da   :  { %v1453_v49 = vpop.permute.xlu1 %1452 }
0x28db   :  { %v1455_v52 = vmul.f32 %v1453_v49, %v1449_v48 }
0x28dd   :  { %1457 = vrot.lane.b32.xlu1 %v1455_v52, %s4641_s25 }
0x294f   :  { %v1458_v2 = vpop.permute.xlu1 %1457 }
0x2950   :  { %v1460_v59 = vadd.f32 %v1458_v2, %v1450_v53 }
0x2952   :  { %4483 = vtanh.f32 %v1460_v59 }
0x295c   :  { %v4484_v60 = vpop.eup %4483 }
0x295d   :  { %1463 = vrot.lane.b32.xlu1 %v4484_v60, %s4640_s3 }
0x2961   :  { %294 = vrot.lane.b32.xlu1 %v4796_v57, %s4641_s25  ;;  %v915_v57 = vpop.permute.xlu0 %914 }
0x2965   :  { %452 = vrot.lane.b32.xlu1 %v4830_v44, %s4641_s25  ;;  %v4315_v44 = vld [vmem:[%s5658_s7 + $0x10] sm:$0xff]  }
0x2966   :  { %4057 = vmatpush3.bf16.msra.mxu0 %v4315_v44 }
0x2967   :  { %4058 = vmatprep.subr.bf16.mxu0 %v4637_v1 }
0x2969   :  { %610 = vrot.lane.b32.xlu1 %v4864_v30, %s4641_s25  ;;  %v4316_v30 = vld [vmem:[%s5658_s7 + $0x18] sm:$0xff]   ;;  %s3570_s7 = sshll.u32 %s4642_s24, 4  ;;  %s3571_s7 = int_to_ptr.vmem [resolvable:$true] %s3570_s7 }
0x296a   :  { %4059 = vmatpush3.bf16.msra.mxu0 %v4316_v30  ;;  %p4618_p1 = scmp.lt.s32.totalorder %s3571_s7, %s3571_s7 }
0x296b   :  { %4080 = vmatprep.subr.bf16.mxu0 %v4637_v1 }
0x296d   :  { %768 = vrot.lane.b32.xlu1 %v766_v61, %s4641_s25 }
0x2971   :  { %994 = vrot.lane.b32.xlu1 %v4950_v62, %s4640_s3  ;;  %v1074_v62 = vpop.permute.xlu0 %1073 }
0x2975   :  { %1152 = vrot.lane.b32.xlu1 %v4984_v58, %s4640_s3  ;;  %v1232_v58 = vpop.permute.xlu0 %1231 }
0x2979   :  { %1310 = vrot.lane.b32.xlu1 %v5018_v50, %s4640_s3  ;;  %v5109_v50 = vld [vmem:[%s5659_s8] sm:$0xff]   ;;  %v1390_v13 = vpop.permute.xlu0 %1389  ;;  %s4613_s8 = scalar_lea.vmem %s3571_s7, 32 }
0x297a   :  { %4065 = vmatpush3.bf16.msra.mxu1 %v5109_v50  ;;  %p4614_p0 = scmp.ne.s32.totalorder %s3571_s7, %s4613_s8  ;;  %p4619_p2 = scmp.lt.s32.totalorder %s4613_s8, %s4613_s8 }
0x297b   :  { %4066 = vmatprep.subr.bf16.mxu1 %v4637_v1 }
0x297c   :  { %p4620_p3 = por %p4619_p2, %p4618_p1 }
0x297e   :  { %4067 = vmatpush3.bf16.msra.mxu1 %v5115_v11  ;;  %p4621_p4 = pnand %p4620_p3, %p4614_p0 }
0x297f   :  { %4072 = vmatprep.subr.bf16.mxu1 %v4637_v1 }
0x2981   :  { %4069 = vmatmul.mubr.bf16.vlgmr.msra.gmra.mrb[36].mxu1 %v4639_v5 }
0x2982   :  { %4073 = vmatpush3.bf16.msra.mxu1 %v5109_v50  ;;  %4076 = vmatprep.mubr.msk.bf16.mxu1 %vm4638_vm0, %v4637_v1 }
0x2983   :  { %4074 = vmatprep.subr.bf16.mxu1 %v4637_v1 }
0x2986   :  { %4075 = vmatpush3.bf16.msra.mxu1 %v5115_v11 }
0x2987   :  { %4088 = vmatprep.subr.bf16.mxu1 %v4637_v1 }
0x29cf   :  { %v1464_v6 = vpop.permute.xlu1 %1463 }
0x29d0   :  { %v1466_v9 = vmul.f32 %v1464_v6, %v1449_v48 }
0x29d2   :  { %1468 = vrot.lane.b32.xlu1 %v1466_v9, %s4640_s3 }
0x29d3   :  { %v295_v12 = vpop.permute.xlu1 %294 }
0x29d4   :  { %297 = vst.msk [vmem:[#allocation3 + $0x2] sm:$0x3] %vm217_vm6, %v295_v12 }
0x29d5   :  { %1392 = vst.msk [vmem:[#allocation3 + $0x2] sm:$0x3] %vm917_vm7, %v1390_v13 }
0x29d7   :  { %v453_v14 = vpop.permute.xlu1 %452 }
0x29d8   :  { %455 = vst.msk [vmem:[#allocation3 + $0x6] sm:$0x3] %vm217_vm6, %v453_v14 }
0x29d9   :  { %1234 = vst.msk [vmem:[#allocation3 + $0x6] sm:$0x3] %vm917_vm7, %v1232_v58 }
0x29db   :  { %v611_v15 = vpop.permute.xlu1 %610 }
0x29dc   :  { %613 = vst.msk [vmem:[#allocation3 + $0xa] sm:$0x3] %vm217_vm6, %v611_v15 }
0x29dd   :  { %1076 = vst.msk [vmem:[#allocation3 + $0xa] sm:$0x3] %vm917_vm7, %v1074_v62 }
0x29df   :  { %v769_v16 = vpop.permute.xlu1 %768 }
0x29e0   :  { %771 = vst.msk [vmem:[#allocation3 + $0xe] sm:$0x3] %vm217_vm6, %v769_v16 }
0x29e1   :  { %918 = vst.msk [vmem:[#allocation3 + $0xe] sm:$0x3] %vm917_vm7, %v915_v57 }
0x29e3   :  { %v995_v17 = vpop.permute.xlu1 %994 }
0x29e4   :  { %997 = vst.msk [vmem:[#allocation3 + $0xc] sm:$0x3] %vm917_vm7, %v995_v17 }
0x29e7   :  { %v1153_v18 = vpop.permute.xlu1 %1152 }
0x29e8   :  { %1155 = vst.msk [vmem:[#allocation3 + $0x8] sm:$0x3] %vm917_vm7, %v1153_v18 }
0x29eb   :  { %v1311_v19 = vpop.permute.xlu1 %1310 }
0x29ec   :  { %1313 = vst.msk [vmem:[#allocation3 + $0x4] sm:$0x3] %vm917_vm7, %v1311_v19 }
0x29ef   :  { %v1473_v22 = vld [vmem:[#allocation3 + $0x8] sm:$0xff] }
0x2a44   :  { %v1469_v3 = vpop.permute.xlu1 %1468 }
0x2a45   :  { %1471 = vst.msk [vmem:[#allocation3] sm:$0x3] %vm917_vm7, %v1469_v3 }
0x2a4c   :  { %v1472_v21 = vld [vmem:[#allocation3] sm:$0xff] }
0x2a4d   :  { %v5140_v4 = vpack.c.bf16 %v1473_v22, %v1472_v21 }
0x2a4f   :  { %4061 = vmatmul.mubr.msk.bf16.vlgmr.msra.gmra.mrb[36].mxu0 %vm1514_vm8, %v5140_v4 }
0x2a50   :  { %4081 = vmatpush3.bf16.msra.mxu0 %v5109_v50  ;;  %4084 = vmatprep.mubr.msk.bf16.mxu0 %vm4638_vm0, %v4637_v1 }
0x2a51   :  { %4082 = vmatprep.subr.bf16.mxu0 %v4637_v1 }
0x2a54   :  { %4083 = vmatpush3.bf16.msra.mxu0 %v5115_v11  ;;  %v1612_v23 = vpop.f32.mrb[36].mxu1 }
0x2a55   :  { %4096 = vmatprep.subr.bf16.mxu0 %v4637_v1  ;;  %v4070_v26 = vpop.f32.mrb[37].mxu1 }
0x2a56   :  { %v1615_v27 = vpop.f32.mrb[38].mxu1 }
0x2a57   :  { %v4071_v7 = vpop.f32.mrb[39].mxu1 }
0x2b22   :  { %v1552_v29 = vpop.f32.mrb[36].mxu0 }
0x2b23   :  { %v1553_v31 = vadd.f32 %v3619_v10, %v1552_v29  ;;  %v4062_v32 = vpop.f32.mrb[37].mxu0 }
0x2b24   :  { %v1555_v33 = vpop.f32.mrb[38].mxu0 }
0x2b25   :  { %1559 = vst [vmem:[#allocation2] sm:$0xff] %v1553_v31  ;;  %v1556_v36 = vadd.f32 %v3619_v10, %v1555_v33  ;;  %v4063_v37 = vpop.f32.mrb[39].mxu0 }
0x2b27   :  { %1560 = vst [vmem:[#allocation2 + $0x8] sm:$0xff] %v1556_v36 }
0x2b2c   :  { %v1565_v38 = vld [vmem:[#allocation2] sm:$0x3]  ;;  %v1649_v47 = vld [vmem:[#allocation2 + $0x2] sm:$0x3]  ;;  %v1728_v16 = vld [vmem:[#allocation2 + $0x4] sm:$0x3] }
0x2b2d   :  { %v1618_v39 = vadd.f32 %v1612_v23, %v1565_v38 }
0x2b2f   :  { %v3627_v40 = vmul.f32 -1.442695, %v1618_v39 }
0x2b31   :  { %4485 = vpow2.f32 %v3627_v40 }
0x2b32   :  { %4487 = vtanh.f32 %v1618_v39 }
0x2b3b   :  { %v4486_v35 = vpop.eup %4485 }
0x2b3c   :  { %v1622_v20 = vadd.f32 1.0, %v4486_v35  ;;  %v4488_v8 = vpop.eup %4487 }
0x2b3e   :  { %4489 = vrcp.f32 %v1622_v20  ;;  %v1807_v20 = vld [vmem:[#allocation2 + $0x6] sm:$0x3] }
0x2b48   :  { %v4490_v51 = vpop.eup %4489 }
0x2b49   :  { %v1626_v56 = vsel %vm4770_vm4, %v4488_v8, %v4490_v51 }
0x2b4a   :  { %1629 = vrot.lane.b32.xlu0 %v1626_v56, %s4640_s3  ;;  %v1627_v54 = vmul.f32 0.0, %v1626_v56 }
0x2bbc   :  { %v1630_v34 = vpop.permute.xlu0 %1629 }
0x2bbd   :  { %v1632_v28 = vmul.f32 %v1630_v34, %v1626_v56 }
0x2bbf   :  { %1634 = vrot.lane.b32.xlu1 %v1632_v28, %s4641_s25 }
0x2c31   :  { %v1635_v25 = vpop.permute.xlu1 %1634 }
0x2c32   :  { %v1637_v41 = vadd.f32 %v1635_v25, %v1627_v54 }
0x2c34   :  { %4491 = vtanh.f32 %v1637_v41 }
0x2c3e   :  { %v4492_v42 = vpop.eup %4491 }
0x2c3f   :  { %1640 = vrot.lane.b32.xlu0 %v4492_v42, %s4640_s3 }
0x2cb1   :  { %v1641_v55 = vpop.permute.xlu0 %1640 }
0x2cb2   :  { %v5158_v43 = vmul.f32 %v1641_v55, %v1626_v56 }
0x2cb4   :  { %v1650_v45 = vpack.c.bf16 %v5158_v43, %v5158_v43 }
0x2cb6   :  { %1652 = vrot.lane.b32.xlu1 %v1650_v45, %s4641_s25 }
0x2d28   :  { %v1653_v46 = vpop.permute.xlu1 %1652 }
0x2d29   :  { %4077 = vmatmul.mubr.msk.bf16.vlgmr.msra.gmra.mrb[40].mxu1 %vm138_vm5, %v1653_v46 }
0x2d2a   :  { %4089 = vmatpush3.bf16.msra.mxu1 %v5109_v50  ;;  %4092 = vmatprep.mubr.msk.bf16.mxu1 %vm4638_vm0, %v4637_v1 }
0x2d2b   :  { %4090 = vmatprep.subr.bf16.mxu1 %v4637_v1 }
0x2d2e   :  { %4091 = vmatpush3.bf16.msra.mxu1 %v5115_v11 }
0x2d2f   :  { %4104 = vmatprep.subr.bf16.mxu1 %v4637_v1 }
0x2dfc   :  { %v1691_v48 = vpop.f32.mrb[40].mxu1 }
0x2dfd   :  { %v1697_v49 = vadd.f32 %v1691_v48, %v1649_v47  ;;  %v4078_v52 = vpop.f32.mrb[41].mxu1 }
0x2dfe   :  { %v1694_v53 = vpop.f32.mrb[42].mxu1 }
0x2dff   :  { %v3629_v2 = vmul.f32 -1.442695, %v1697_v49  ;;  %v4079_v59 = vpop.f32.mrb[43].mxu1 }
0x2e01   :  { %4493 = vpow2.f32 %v3629_v2 }
0x2e02   :  { %4495 = vtanh.f32 %v1697_v49 }
0x2e0b   :  { %v4494_v60 = vpop.eup %4493 }
0x2e0c   :  { %v1701_v61 = vadd.f32 1.0, %v4494_v60  ;;  %v4496_v63 = vpop.eup %4495 }
0x2e0e   :  { %4497 = vrcp.f32 %v1701_v61 }
0x2e18   :  { %v4498_v0 = vpop.eup %4497 }
0x2e19   :  { %v1705_v57 = vsel %vm4770_vm4, %v4496_v63, %v4498_v0  ;;  %v1886_v63 = vld [vmem:[#allocation2 + $0x8] sm:$0x3] }
0x2e1a   :  { %1708 = vrot.lane.b32.xlu0 %v1705_v57, %s4640_s3  ;;  %v1706_v62 = vmul.f32 %v1705_v57, %v1637_v41 }
0x2e8c   :  { %v1709_v44 = vpop.permute.xlu0 %1708 }
0x2e8d   :  { %v1711_v30 = vmul.f32 %v1709_v44, %v1705_v57 }
0x2e8f   :  { %1713 = vrot.lane.b32.xlu1 %v1711_v30, %s4641_s25 }
0x2f01   :  { %v1714_v58 = vpop.permute.xlu1 %1713 }
0x2f02   :  { %v1716_v6 = vadd.f32 %v1714_v58, %v1706_v62 }
0x2f04   :  { %4499 = vtanh.f32 %v1716_v6 }
0x2f0e   :  { %v4500_v9 = vpop.eup %4499 }
0x2f0f   :  { %1719 = vrot.lane.b32.xlu0 %v4500_v9, %s4640_s3 }
0x2f81   :  { %v1720_v12 = vpop.permute.xlu0 %1719 }
0x2f82   :  { %v5175_v13 = vmul.f32 %v1720_v12, %v1705_v57 }
0x2f84   :  { %v1729_v14 = vpack.c.bf16 %v5175_v13, %v5175_v13 }
0x2f86   :  { %1731 = vrot.lane.b32.xlu1 %v1729_v14, %s4641_s25 }
0x2ff8   :  { %v1732_v15 = vpop.permute.xlu1 %1731 }
0x2ff9   :  { %4085 = vmatmul.mubr.msk.bf16.vlgmr.msra.gmra.mrb[40].mxu0 %vm138_vm5, %v1732_v15 }
0x2ffa   :  { %4097 = vmatpush3.bf16.msra.mxu0 %v5109_v50  ;;  %4100 = vmatprep.mubr.msk.bf16.mxu0 %vm4638_vm0, %v4637_v1 }
0x2ffb   :  { %4098 = vmatprep.subr.bf16.mxu0 %v4637_v1 }
0x2ffe   :  { %4099 = vmatpush3.bf16.msra.mxu0 %v5115_v11 }
0x2fff   :  { %4112 = vmatprep.subr.bf16.mxu0 %v4637_v1 }
0x30cc   :  { %v1770_v17 = vpop.f32.mrb[40].mxu0 }
0x30cd   :  { %v1776_v18 = vadd.f32 %v1770_v17, %v1728_v16  ;;  %v4086_v19 = vpop.f32.mrb[41].mxu0 }
0x30ce   :  { %v1773_v3 = vpop.f32.mrb[42].mxu0 }
0x30cf   :  { %v3631_v21 = vmul.f32 -1.442695, %v1776_v18  ;;  %v4087_v22 = vpop.f32.mrb[43].mxu0 }
0x30d1   :  { %4501 = vpow2.f32 %v3631_v21 }
0x30d2   :  { %4503 = vtanh.f32 %v1776_v18 }
0x30db   :  { %v4502_v23 = vpop.eup %4501 }
0x30dc   :  { %v1780_v26 = vadd.f32 1.0, %v4502_v23  ;;  %v4504_v27 = vpop.eup %4503 }
0x30de   :  { %4505 = vrcp.f32 %v1780_v26 }
0x30e8   :  { %v4506_v7 = vpop.eup %4505 }
0x30e9   :  { %v1784_v10 = vsel %vm4770_vm4, %v4504_v27, %v4506_v7  ;;  %v1965_v7 = vld [vmem:[#allocation2 + $0xa] sm:$0x3] }
0x30ea   :  { %1787 = vrot.lane.b32.xlu0 %v1784_v10, %s4640_s3  ;;  %v1785_v32 = vmul.f32 %v1784_v10, %v1716_v6 }
0x315c   :  { %v1788_v29 = vpop.permute.xlu0 %1787 }
0x315d   :  { %v1790_v31 = vmul.f32 %v1788_v29, %v1784_v10 }
0x315f   :  { %1792 = vrot.lane.b32.xlu1 %v1790_v31, %s4641_s25 }
0x31d1   :  { %v1793_v33 = vpop.permute.xlu1 %1792 }
0x31d2   :  { %v1795_v36 = vadd.f32 %v1793_v33, %v1785_v32 }
0x31d4   :  { %4507 = vtanh.f32 %v1795_v36 }
0x31de   :  { %v4508_v37 = vpop.eup %4507 }
0x31df   :  { %1798 = vrot.lane.b32.xlu0 %v4508_v37, %s4640_s3 }
0x3251   :  { %v1799_v38 = vpop.permute.xlu0 %1798 }
0x3252   :  { %v5192_v39 = vmul.f32 %v1799_v38, %v1784_v10 }
0x3254   :  { %v1808_v40 = vpack.c.bf16 %v5192_v39, %v5192_v39 }
0x3256   :  { %1810 = vrot.lane.b32.xlu1 %v1808_v40, %s4641_s25 }
0x32c8   :  { %v1811_v35 = vpop.permute.xlu1 %1810 }
0x32c9   :  { %4093 = vmatmul.mubr.msk.bf16.vlgmr.msra.gmra.mrb[44].mxu1 %vm138_vm5, %v1811_v35 }
0x32ca   :  { %4105 = vmatpush3.bf16.msra.mxu1 %v5109_v50  ;;  %4108 = vmatprep.mubr.msk.bf16.mxu1 %vm4638_vm0, %v4637_v1 }
0x32cb   :  { %4106 = vmatprep.subr.bf16.mxu1 %v4637_v1 }
0x32ce   :  { %4107 = vmatpush3.bf16.msra.mxu1 %v5115_v11 }
0x32cf   :  { %4120 = vmatprep.subr.bf16.mxu1 %v4637_v1 }
0x339c   :  { %v1849_v8 = vpop.f32.mrb[44].mxu1 }
0x339d   :  { %v1855_v51 = vadd.f32 %v1849_v8, %v1807_v20  ;;  %v4094_v56 = vpop.f32.mrb[45].mxu1 }
0x339e   :  { %v1852_v34 = vpop.f32.mrb[46].mxu1 }
0x339f   :  { %v3633_v28 = vmul.f32 -1.442695, %v1855_v51  ;;  %v4095_v54 = vpop.f32.mrb[47].mxu1 }
0x33a1   :  { %4509 = vpow2.f32 %v3633_v28 }
0x33a2   :  { %4511 = vtanh.f32 %v1855_v51 }
0x33ab   :  { %v4510_v25 = vpop.eup %4509 }
0x33ac   :  { %v1859_v41 = vadd.f32 1.0, %v4510_v25  ;;  %v4512_v42 = vpop.eup %4511 }
0x33ae   :  { %4513 = vrcp.f32 %v1859_v41  ;;  %v4319_v41 = vld [vmem:[%s5661_s10] sm:$0xff]  }
0x33b8   :  { %v4514_v55 = vpop.eup %4513 }
0x33b9   :  { %v1863_v45 = vsel %vm4770_vm4, %v4512_v42, %v4514_v55  ;;  %v4320_v55 = vld [vmem:[%s5661_s10 + $0x8] sm:$0xff]  }
0x33ba   :  { %1866 = vrot.lane.b32.xlu0 %v1863_v45, %s4640_s3  ;;  %v1864_v48 = vmul.f32 %v1863_v45, %v1795_v36 }
0x342c   :  { %v1867_v46 = vpop.permute.xlu0 %1866 }
0x342d   :  { %v1869_v47 = vmul.f32 %v1867_v46, %v1863_v45  ;;  %v4322_v46 = vld [vmem:[%s5661_s10 + $0x18] sm:$0xff]  }
0x342f   :  { %1871 = vrot.lane.b32.xlu1 %v1869_v47, %s4641_s25  ;;  %v2044_v47 = vld [vmem:[#allocation2 + $0xc] sm:$0x3] }
0x34a1   :  { %v1872_v49 = vpop.permute.xlu1 %1871 }
0x34a2   :  { %v1874_v52 = vadd.f32 %v1872_v49, %v1864_v48 }
0x34a4   :  { %4515 = vtanh.f32 %v1874_v52 }
0x34ae   :  { %v4516_v53 = vpop.eup %4515 }
0x34af   :  { %1877 = vrot.lane.b32.xlu0 %v4516_v53, %s4640_s3 }
0x3521   :  { %v1878_v2 = vpop.permute.xlu0 %1877 }
0x3522   :  { %v5209_v59 = vmul.f32 %v1878_v2, %v1863_v45  ;;  %v4321_v45 = vld [vmem:[%s5661_s10 + $0x10] sm:$0xff]  }
0x3524   :  { %v1887_v60 = vpack.c.bf16 %v5209_v59, %v5209_v59 }
0x3526   :  { %1889 = vrot.lane.b32.xlu1 %v1887_v60, %s4641_s25 }
0x3598   :  { %v1890_v61 = vpop.permute.xlu1 %1889 }
0x3599   :  { %4101 = vmatmul.mubr.msk.bf16.vlgmr.msra.gmra.mrb[44].mxu0 %vm138_vm5, %v1890_v61  ;;  %v3642_v61 = vld [vmem:[%s5663_s12] ss:$0 sm:$0xff] }
0x359a   :  { %4113 = vmatpush3.bf16.msra.mxu0 %v5109_v50  ;;  %4116 = vmatprep.mubr.msk.bf16.mxu0 %vm4638_vm0, %v4637_v1 }
0x359b   :  { %4114 = vmatprep.subr.bf16.mxu0 %v4637_v1 }
0x359e   :  { %4115 = vmatpush3.bf16.msra.mxu0 %v5115_v11 }
0x359f   :  { %4128 = vmatprep.subr.bf16.mxu0 %v4637_v1 }
0x366c   :  { %v1928_v0 = vpop.f32.mrb[44].mxu0 }
0x366d   :  { %v1934_v57 = vadd.f32 %v1928_v0, %v1886_v63  ;;  %v4102_v44 = vpop.f32.mrb[45].mxu0 }
0x366e   :  { %v1931_v30 = vpop.f32.mrb[46].mxu0 }
0x366f   :  { %v3635_v62 = vmul.f32 -1.442695, %v1934_v57  ;;  %v4103_v58 = vpop.f32.mrb[47].mxu0 }
0x3671   :  { %4517 = vpow2.f32 %v3635_v62 }
0x3672   :  { %4519 = vtanh.f32 %v1934_v57 }
0x367b   :  { %v4518_v6 = vpop.eup %4517 }
0x367c   :  { %v1938_v9 = vadd.f32 1.0, %v4518_v6  ;;  %v4520_v12 = vpop.eup %4519  ;;  %v5274_v6 = vld [vmem:[#allocation2 + $0xe] sm:$0x3] }
0x367e   :  { %4521 = vrcp.f32 %v1938_v9 }
0x3688   :  { %v4522_v14 = vpop.eup %4521 }
0x3689   :  { %v1942_v15 = vsel %vm4770_vm4, %v4520_v12, %v4522_v14 }
0x368a   :  { %1945 = vrot.lane.b32.xlu0 %v1942_v15, %s4640_s3  ;;  %v1943_v18 = vmul.f32 %v1942_v15, %v1874_v52 }
0x36fc   :  { %v1946_v16 = vpop.permute.xlu0 %1945 }
0x36fd   :  { %v1948_v17 = vmul.f32 %v1946_v16, %v1942_v15 }
0x36ff   :  { %1950 = vrot.lane.b32.xlu1 %v1948_v17, %s4641_s25 }
0x3771   :  { %v1951_v19 = vpop.permute.xlu1 %1950 }
0x3772   :  { %v1953_v3 = vadd.f32 %v1951_v19, %v1943_v18 }
0x3774   :  { %4523 = vtanh.f32 %v1953_v3 }
0x377e   :  { %v4524_v21 = vpop.eup %4523 }
0x377f   :  { %1956 = vrot.lane.b32.xlu0 %v4524_v21, %s4640_s3  ;;  %v5287_v21 = vld [vmem:[%s5662_s11] sm:$0xff]  }
0x37f1   :  { %v1957_v22 = vpop.permute.xlu0 %1956 }
0x37f2   :  { %v5226_v23 = vmul.f32 %v1957_v22, %v1942_v15  ;;  %v5294_v22 = vld [vmem:[%s5662_s11 + $0x8] sm:$0xff]  }
0x37f4   :  { %v1966_v26 = vpack.c.bf16 %v5226_v23, %v5226_v23 }
0x37f6   :  { %1968 = vrot.lane.b32.xlu1 %v1966_v26, %s4641_s25 }
0x3868   :  { %v1969_v27 = vpop.permute.xlu1 %1968 }
0x3869   :  { %4109 = vmatmul.mubr.msk.bf16.vlgmr.msra.gmra.mrb[48].mxu1 %vm138_vm5, %v1969_v27 }
0x386a   :  { %4121 = vmatpush3.bf16.msra.mxu1 %v5109_v50  ;;  %4124 = vmatprep.mubr.msk.bf16.mxu1 %vm4638_vm0, %v4637_v1 }
0x386b   :  { %4122 = vmatprep.subr.bf16.mxu1 %v4637_v1 }
0x386e   :  { %4123 = vmatpush3.bf16.msra.mxu1 %v5115_v11 }
0x386f   :  { %4140 = vmatprep.subr.bf16.mxu1 %v4637_v1 }
0x393c   :  { %v2007_v10 = vpop.f32.mrb[48].mxu1 }
0x393d   :  { %v2013_v29 = vadd.f32 %v2007_v10, %v1965_v7  ;;  %v4110_v31 = vpop.f32.mrb[49].mxu1 }
0x393e   :  { %v2010_v32 = vpop.f32.mrb[50].mxu1 }
0x393f   :  { %v3637_v33 = vmul.f32 -1.442695, %v2013_v29  ;;  %v4111_v36 = vpop.f32.mrb[51].mxu1 }
0x3941   :  { %4525 = vpow2.f32 %v3637_v33 }
0x3942   :  { %4527 = vtanh.f32 %v2013_v29 }
0x394b   :  { %v4526_v37 = vpop.eup %4525 }
0x394c   :  { %v2017_v38 = vadd.f32 1.0, %v4526_v37  ;;  %v4528_v50 = vpop.eup %4527 }
0x394e   :  { %4529 = vrcp.f32 %v2017_v38 }
0x3958   :  { %v4530_v40 = vpop.eup %4529 }
0x3959   :  { %v2021_v35 = vsel %vm4770_vm4, %v4528_v50, %v4530_v40 }
0x395a   :  { %2024 = vrot.lane.b32.xlu0 %v2021_v35, %s4640_s3  ;;  %v2022_v8 = vmul.f32 %v2021_v35, %v1953_v3 }
0x39cc   :  { %v2025_v11 = vpop.permute.xlu0 %2024 }
0x39cd   :  { %v2027_v20 = vmul.f32 %v2025_v11, %v2021_v35 }
0x39cf   :  { %2029 = vrot.lane.b32.xlu1 %v2027_v20, %s4641_s25 }
0x3a41   :  { %v2030_v51 = vpop.permute.xlu1 %2029 }
0x3a42   :  { %v2032_v56 = vadd.f32 %v2030_v51, %v2022_v8 }
0x3a44   :  { %4531 = vtanh.f32 %v2032_v56 }
0x3a4e   :  { %v4532_v34 = vpop.eup %4531 }
0x3a4f   :  { %2035 = vrot.lane.b32.xlu0 %v4532_v34, %s4640_s3 }
0x3ac1   :  { %v2036_v28 = vpop.permute.xlu0 %2035 }
0x3ac2   :  { %v5243_v54 = vmul.f32 %v2036_v28, %v2021_v35 }
0x3ac4   :  { %v2045_v25 = vpack.c.bf16 %v5243_v54, %v5243_v54 }
0x3ac6   :  { %2047 = vrot.lane.b32.xlu1 %v2045_v25, %s4641_s25 }
0x3b38   :  { %v2048_v42 = vpop.permute.xlu1 %2047 }
0x3b39   :  { %4117 = vmatmul.mubr.msk.bf16.vlgmr.msra.gmra.mrb[48].mxu0 %vm138_vm5, %v2048_v42 }
0x3b3a   :  { %4129 = vmatpush3.bf16.msra.mxu0 %v4319_v41  ;;  %4136 = vmatprep.mubr.msk.bf16.mxu0 %vm4638_vm0, %v4637_v1 }
0x3b3b   :  { %4130 = vmatprep.subr.bf16.mxu0 %v4637_v1 }
0x3b3e   :  { %4131 = vmatpush3.bf16.msra.mxu0 %v4320_v55 }
0x3b3f   :  { %4132 = vmatprep.subr.bf16.mxu0 %v4637_v1 }
0x3b42   :  { %4133 = vmatpush3.bf16.msra.mxu0 %v4321_v45 }
0x3b43   :  { %4134 = vmatprep.subr.bf16.mxu0 %v4637_v1 }
0x3b46   :  { %4135 = vmatpush3.bf16.msra.mxu0 %v4322_v46 }
0x3b47   :  { %4156 = vmatprep.subr.bf16.mxu0 %v4637_v1 }
0x3b49   :  { %4137 = vmatmul.mubr.msk.bf16.vlgmr.msra.gmra.mrb[52].mxu0 %vm1514_vm8, %v5140_v4 }
0x3b4a   :  { %4160 = vmatprep.mubr.msk.bf16.mxu0 %vm4638_vm0, %v4637_v1  ;;  %4157 = vmatpush3.bf16.msra.mxu0 %v5287_v21 }
0x3b4b   :  { %4158 = vmatprep.subr.bf16.mxu0 %v4637_v1 }
0x3b4e   :  { %4159 = vmatpush3.bf16.msra.mxu0 %v5294_v22 }
0x3b4f   :  { %4172 = vmatprep.subr.bf16.mxu0 %v4637_v1 }
0x3c0c   :  { %v2086_v48 = vpop.f32.mrb[48].mxu0 }
0x3c0d   :  { %v2092_v49 = vadd.f32 %v2086_v48, %v2044_v47  ;;  %v4118_v52 = vpop.f32.mrb[49].mxu0 }
0x3c0e   :  { %v2089_v53 = vpop.f32.mrb[50].mxu0 }
0x3c0f   :  { %v3639_v2 = vmul.f32 -1.442695, %v2092_v49  ;;  %v4119_v60 = vpop.f32.mrb[51].mxu0 }
0x3c11   :  { %4533 = vpow2.f32 %v3639_v2 }
0x3c12   :  { %4535 = vtanh.f32 %v2092_v49 }
0x3c1b   :  { %v4534_v63 = vpop.eup %4533 }
0x3c1c   :  { %v2096_v0 = vadd.f32 1.0, %v4534_v63  ;;  %v2275_v57 = vpop.f32.mrb[52].mxu0  ;;  %v4536_v9 = vpop.eup %4535 }
0x3c1d   :  { %v2276_v4 = vadd.f32 %v3642_v61, %v2275_v57  ;;  %v4138_v44 = vpop.f32.mrb[53].mxu0 }
0x3c1e   :  { %4537 = vrcp.f32 %v2096_v0  ;;  %v2278_v30 = vpop.f32.mrb[54].mxu0 }
0x3c1f   :  { %2282 = vst [vmem:[#allocation2] sm:$0xff] %v2276_v4  ;;  %v2279_v62 = vadd.f32 %v3642_v61, %v2278_v30  ;;  %v4139_v58 = vpop.f32.mrb[55].mxu0 }
0x3c21   :  { %2283 = vst [vmem:[#allocation2 + $0x8] sm:$0xff] %v2279_v62 }
0x3c28   :  { %v4538_v12 = vpop.eup %4537  ;;  %v2288_v36 = vld [vmem:[#allocation2 + $0xe] sm:$0x3]  ;;  %v2372_v49 = vld [vmem:[#allocation2 + $0xc] sm:$0x3] }
0x3c29   :  { %v2100_v14 = vsel %vm4770_vm4, %v4536_v9, %v4538_v12 }
0x3c2a   :  { %2103 = vrot.lane.b32.xlu0 %v2100_v14, %s4640_s3  ;;  %v2101_v17 = vmul.f32 %v2100_v14, %v2032_v56 }
0x3c9c   :  { %v2104_v15 = vpop.permute.xlu0 %2103 }
0x3c9d   :  { %v2106_v16 = vmul.f32 %v2104_v15, %v2100_v14 }
0x3c9f   :  { %2108 = vrot.lane.b32.xlu1 %v2106_v16, %s4641_s25 }
0x3d11   :  { %v2109_v18 = vpop.permute.xlu1 %2108 }
0x3d12   :  { %v5280_v19 = vadd.f32 %v2109_v18, %v2101_v17 }
0x3d14   :  { %4539 = vtanh.f32 %v5280_v19 }
0x3d1e   :  { %v4540_v3 = vpop.eup %4539 }
0x3d1f   :  { %2114 = vrot.lane.b32.xlu0 %v4540_v3, %s4640_s3 }
0x3d91   :  { %v2115_v26 = vpop.permute.xlu0 %2114 }
0x3d92   :  { %v5298_v27 = vmul.f32 %v2115_v26, %v2100_v14  ;;  %v2451_v26 = vld [vmem:[#allocation2 + $0xa] sm:$0x3] }
0x3d94   :  { %v2124_v7 = vpack.c.bf16 %v5298_v27, %v5298_v27 }
0x3d96   :  { %2126 = vrot.lane.b32.xlu1 %v2124_v7, %s4641_s25 }
0x3e08   :  { %v2127_v10 = vpop.permute.xlu1 %2126 }
0x3e09   :  { %4125 = vmatmul.mubr.msk.bf16.vlgmr.msra.gmra.mrb[52].mxu1 %vm138_vm5, %v2127_v10 }
0x3e0a   :  { %4141 = vmatpush3.bf16.msra.mxu1 %v5287_v21  ;;  %4144 = vmatprep.mubr.msk.bf16.mxu1 %vm4638_vm0, %v4637_v1 }
0x3e0b   :  { %4142 = vmatprep.subr.bf16.mxu1 %v4637_v1 }
0x3e0e   :  { %4143 = vmatpush3.bf16.msra.mxu1 %v5294_v22 }
0x3e0f   :  { %4148 = vmatprep.subr.bf16.mxu1 %v4637_v1 }
0x3e11   :  { %4145 = vmatmul.mubr.bf16.vlgmr.msra.gmra.mrb[56].mxu1 %v4639_v5 }
0x3e12   :  { %4149 = vmatpush3.bf16.msra.mxu1 %v5287_v21  ;;  %4152 = vmatprep.mubr.msk.bf16.mxu1 %vm4638_vm0, %v4637_v1 }
0x3e13   :  { %4150 = vmatprep.subr.bf16.mxu1 %v4637_v1 }
0x3e16   :  { %4151 = vmatpush3.bf16.msra.mxu1 %v5294_v22 }
0x3e17   :  { %4164 = vmatprep.subr.bf16.mxu1 %v4637_v1 }
0x3edc   :  { %v5317_v29 = vpop.f32.mrb[52].mxu1 }
0x3edd   :  { %v4126_v31 = vpop.f32.mrb[53].mxu1 }
0x3ede   :  { %v2168_v32 = vpop.f32.mrb[54].mxu1 }
0x3edf   :  { %v4127_v33 = vpop.f32.mrb[55].mxu1 }
0x3ee4   :  { %v2335_v37 = vpop.f32.mrb[56].mxu1 }
0x3ee5   :  { %v2341_v38 = vadd.f32 %v2335_v37, %v2288_v36  ;;  %v4146_v5 = vpop.f32.mrb[57].mxu1 }
0x3ee6   :  { %v2338_v50 = vpop.f32.mrb[58].mxu1 }
0x3ee7   :  { %v3650_v40 = vmul.f32 -1.442695, %v2341_v38  ;;  %v4147_v35 = vpop.f32.mrb[59].mxu1 }
0x3ee9   :  { %4541 = vpow2.f32 %v3650_v40 }
0x3eea   :  { %4543 = vtanh.f32 %v2341_v38 }
0x3ef3   :  { %v4542_v11 = vpop.eup %4541 }
0x3ef4   :  { %v2345_v20 = vadd.f32 1.0, %v4542_v11  ;;  %v4544_v8 = vpop.eup %4543 }
0x3ef6   :  { %4545 = vrcp.f32 %v2345_v20 }
0x3f00   :  { %v4546_v51 = vpop.eup %4545 }
0x3f01   :  { %v2349_v56 = vsel %vm4770_vm4, %v4544_v8, %v4546_v51 }
0x3f02   :  { %2352 = vrot.lane.b32.xlu0 %v2349_v56, %s4640_s3  ;;  %v2350_v25 = vmul.f32 0.0, %v2349_v56 }
0x3f74   :  { %v2353_v34 = vpop.permute.xlu0 %2352 }
0x3f75   :  { %v2355_v28 = vmul.f32 %v2353_v34, %v2349_v56 }
0x3f77   :  { %2357 = vrot.lane.b32.xlu1 %v2355_v28, %s4641_s25 }
0x3fe9   :  { %v2358_v41 = vpop.permute.xlu1 %2357 }
0x3fea   :  { %v2360_v42 = vadd.f32 %v2358_v41, %v2350_v25 }
0x3fec   :  { %4547 = vtanh.f32 %v2360_v42 }
0x3ff6   :  { %v4548_v55 = vpop.eup %4547 }
0x3ff7   :  { %2363 = vrot.lane.b32.xlu0 %v4548_v55, %s4640_s3 }
0x4069   :  { %v2364_v45 = vpop.permute.xlu0 %2363 }
0x406a   :  { %v5324_v46 = vmul.f32 %v2364_v45, %v2349_v56 }
0x406c   :  { %v2373_v47 = vpack.c.bf16 %v5324_v46, %v5324_v46 }
0x406e   :  { %2375 = vrot.lane.b32.xlu1 %v2373_v47, %s4641_s25 }
0x40e0   :  { %v2376_v48 = vpop.permute.xlu1 %2375 }
0x40e1   :  { %4153 = vmatmul.mubr.msk.bf16.vlgmr.msra.gmra.mrb[60].mxu1 %vm138_vm5, %v2376_v48 }
0x40e2   :  { %4165 = vmatpush3.bf16.msra.mxu1 %v5287_v21  ;;  %4168 = vmatprep.mubr.msk.bf16.mxu1 %vm4638_vm0, %v4637_v1 }
0x40e3   :  { %4166 = vmatprep.subr.bf16.mxu1 %v4637_v1 }
0x40e6   :  { %4167 = vmatpush3.bf16.msra.mxu1 %v5294_v22 }
0x40e7   :  { %4180 = vmatprep.subr.bf16.mxu1 %v4637_v1 }
0x41b4   :  { %v2414_v52 = vpop.f32.mrb[60].mxu1 }
0x41b5   :  { %v2420_v53 = vadd.f32 %v2414_v52, %v2372_v49  ;;  %v4154_v2 = vpop.f32.mrb[61].mxu1 }
0x41b6   :  { %v2417_v60 = vpop.f32.mrb[62].mxu1 }
0x41b7   :  { %v3652_v61 = vmul.f32 -1.442695, %v2420_v53  ;;  %v4155_v63 = vpop.f32.mrb[63].mxu1 }
0x41b9   :  { %4549 = vpow2.f32 %v3652_v61 }
0x41ba   :  { %4551 = vtanh.f32 %v2420_v53 }
0x41c3   :  { %v4550_v0 = vpop.eup %4549 }
0x41c4   :  { %v2424_v57 = vadd.f32 1.0, %v4550_v0  ;;  %v4552_v4 = vpop.eup %4551 }
0x41c6   :  { %4553 = vrcp.f32 %v2424_v57 }
0x41d0   :  { %v4554_v44 = vpop.eup %4553 }
0x41d1   :  { %v2428_v30 = vsel %vm4770_vm4, %v4552_v4, %v4554_v44 }
0x41d2   :  { %2431 = vrot.lane.b32.xlu0 %v2428_v30, %s4640_s3  ;;  %v2429_v9 = vmul.f32 %v2428_v30, %v2360_v42  ;;  %v2530_v42 = vld [vmem:[#allocation2 + $0x8] sm:$0x3] }
0x4244   :  { %v2432_v62 = vpop.permute.xlu0 %2431 }
0x4245   :  { %v2434_v58 = vmul.f32 %v2432_v62, %v2428_v30 }
0x4247   :  { %2436 = vrot.lane.b32.xlu1 %v2434_v58, %s4641_s25 }
0x42b9   :  { %v2437_v12 = vpop.permute.xlu1 %2436 }
0x42ba   :  { %v2439_v14 = vadd.f32 %v2437_v12, %v2429_v9 }
0x42bc   :  { %4555 = vtanh.f32 %v2439_v14 }
0x42c6   :  { %v4556_v15 = vpop.eup %4555 }
0x42c7   :  { %2442 = vrot.lane.b32.xlu0 %v4556_v15, %s4640_s3  ;;  %v2609_v15 = vld [vmem:[#allocation2 + $0x6] sm:$0x3] }
0x4339   :  { %v2443_v16 = vpop.permute.xlu0 %2442 }
0x433a   :  { %v5341_v17 = vmul.f32 %v2443_v16, %v2428_v30 }
0x433c   :  { %v2452_v18 = vpack.c.bf16 %v5341_v17, %v5341_v17 }
0x433e   :  { %2454 = vrot.lane.b32.xlu1 %v2452_v18, %s4641_s25 }
0x43b0   :  { %v2455_v3 = vpop.permute.xlu1 %2454 }
0x43b1   :  { %4161 = vmatmul.mubr.msk.bf16.vlgmr.msra.gmra.mrb[56].mxu0 %vm138_vm5, %v2455_v3 }
0x43b2   :  { %4173 = vmatpush3.bf16.msra.mxu0 %v5287_v21  ;;  %4176 = vmatprep.mubr.msk.bf16.mxu0 %vm4638_vm0, %v4637_v1 }
0x43b3   :  { %4174 = vmatprep.subr.bf16.mxu0 %v4637_v1 }
0x43b6   :  { %4175 = vmatpush3.bf16.msra.mxu0 %v5294_v22 }
0x43b7   :  { %4188 = vmatprep.subr.bf16.mxu0 %v4637_v1 }
0x4484   :  { %v2493_v7 = vpop.f32.mrb[56].mxu0 }
0x4485   :  { %v2499_v10 = vadd.f32 %v2493_v7, %v2451_v26  ;;  %v4162_v31 = vpop.f32.mrb[57].mxu0 }
0x4486   :  { %v2496_v32 = vpop.f32.mrb[58].mxu0 }
0x4487   :  { %v3654_v33 = vmul.f32 -1.442695, %v2499_v10  ;;  %v4163_v36 = vpop.f32.mrb[59].mxu0 }
0x4489   :  { %4557 = vpow2.f32 %v3654_v33 }
0x448a   :  { %4559 = vtanh.f32 %v2499_v10 }
0x4493   :  { %v4558_v37 = vpop.eup %4557 }
0x4494   :  { %v2503_v38 = vadd.f32 1.0, %v4558_v37  ;;  %v4560_v5 = vpop.eup %4559 }
0x4496   :  { %4561 = vrcp.f32 %v2503_v38 }
0x44a0   :  { %v4562_v50 = vpop.eup %4561 }
0x44a1   :  { %v2507_v40 = vsel %vm4770_vm4, %v4560_v5, %v4562_v50 }
0x44a2   :  { %2510 = vrot.lane.b32.xlu0 %v2507_v40, %s4640_s3  ;;  %v2508_v20 = vmul.f32 %v2507_v40, %v2439_v14 }
0x4514   :  { %v2511_v35 = vpop.permute.xlu0 %2510 }
0x4515   :  { %v2513_v11 = vmul.f32 %v2511_v35, %v2507_v40 }
0x4517   :  { %2515 = vrot.lane.b32.xlu1 %v2513_v11, %s4641_s25 }
0x4589   :  { %v2516_v8 = vpop.permute.xlu1 %2515 }
0x458a   :  { %v2518_v51 = vadd.f32 %v2516_v8, %v2508_v20 }
0x458c   :  { %4563 = vtanh.f32 %v2518_v51 }
0x4596   :  { %v4564_v56 = vpop.eup %4563 }
0x4597   :  { %2521 = vrot.lane.b32.xlu0 %v4564_v56, %s4640_s3 }
0x4609   :  { %v2522_v34 = vpop.permute.xlu0 %2521 }
0x460a   :  { %v5358_v28 = vmul.f32 %v2522_v34, %v2507_v40  ;;  %v2688_v34 = vld [vmem:[#allocation2 + $0x4] sm:$0x3] }
0x460c   :  { %v2531_v25 = vpack.c.bf16 %v5358_v28, %v5358_v28 }
0x460e   :  { %2533 = vrot.lane.b32.xlu1 %v2531_v25, %s4641_s25 }
0x4680   :  { %v2534_v41 = vpop.permute.xlu1 %2533 }
0x4681   :  { %4169 = vmatmul.mubr.msk.bf16.vlgmr.msra.gmra.mrb[64].mxu1 %vm138_vm5, %v2534_v41 }
0x4682   :  { %4181 = vmatpush3.bf16.msra.mxu1 %v5287_v21  ;;  %4184 = vmatprep.mubr.msk.bf16.mxu1 %vm4638_vm0, %v4637_v1 }
0x4683   :  { %4182 = vmatprep.subr.bf16.mxu1 %v4637_v1 }
0x4686   :  { %4183 = vmatpush3.bf16.msra.mxu1 %v5294_v22 }
0x4687   :  { %4196 = vmatprep.subr.bf16.mxu1 %v4637_v1 }
0x4754   :  { %v2572_v55 = vpop.f32.mrb[64].mxu1 }
0x4755   :  { %v2578_v45 = vadd.f32 %v2572_v55, %v2530_v42  ;;  %v4170_v47 = vpop.f32.mrb[65].mxu1 }
0x4756   :  { %v2575_v48 = vpop.f32.mrb[66].mxu1 }
0x4757   :  { %v3656_v49 = vmul.f32 -1.442695, %v2578_v45  ;;  %v4171_v52 = vpop.f32.mrb[67].mxu1 }
0x4759   :  { %4565 = vpow2.f32 %v3656_v49 }
0x475a   :  { %4567 = vtanh.f32 %v2578_v45 }
0x4763   :  { %v4566_v53 = vpop.eup %4565 }
0x4764   :  { %v2582_v2 = vadd.f32 1.0, %v4566_v53  ;;  %v4568_v60 = vpop.eup %4567 }
0x4766   :  { %4569 = vrcp.f32 %v2582_v2 }
0x4770   :  { %v4570_v61 = vpop.eup %4569 }
0x4771   :  { %v2586_v63 = vsel %vm4770_vm4, %v4568_v60, %v4570_v61 }
0x4772   :  { %2589 = vrot.lane.b32.xlu0 %v2586_v63, %s4640_s3  ;;  %v2587_v4 = vmul.f32 %v2586_v63, %v2518_v51 }
0x47e4   :  { %v2590_v0 = vpop.permute.xlu0 %2589 }
0x47e5   :  { %v2592_v57 = vmul.f32 %v2590_v0, %v2586_v63 }
0x47e7   :  { %2594 = vrot.lane.b32.xlu1 %v2592_v57, %s4641_s25 }
0x4859   :  { %v2595_v44 = vpop.permute.xlu1 %2594 }
0x485a   :  { %v2597_v30 = vadd.f32 %v2595_v44, %v2587_v4 }
0x485c   :  { %4571 = vtanh.f32 %v2597_v30 }
0x4866   :  { %v4572_v62 = vpop.eup %4571 }
0x4867   :  { %2600 = vrot.lane.b32.xlu0 %v4572_v62, %s4640_s3  ;;  %v2767_v62 = vld [vmem:[#allocation2 + $0x2] sm:$0x3] }
0x48d9   :  { %v2601_v58 = vpop.permute.xlu0 %2600 }
0x48da   :  { %v5375_v9 = vmul.f32 %v2601_v58, %v2586_v63 }
0x48dc   :  { %v2610_v12 = vpack.c.bf16 %v5375_v9, %v5375_v9 }
0x48de   :  { %2612 = vrot.lane.b32.xlu1 %v2610_v12, %s4641_s25 }
0x4950   :  { %v2613_v14 = vpop.permute.xlu1 %2612 }
0x4951   :  { %4177 = vmatmul.mubr.msk.bf16.vlgmr.msra.gmra.mrb[60].mxu0 %vm138_vm5, %v2613_v14 }
0x4952   :  { %4189 = vmatpush3.bf16.msra.mxu0 %v5287_v21  ;;  %4192 = vmatprep.mubr.msk.bf16.mxu0 %vm4638_vm0, %v4637_v1 }
0x4953   :  { %4190 = vmatprep.subr.bf16.mxu0 %v4637_v1 }
0x4956   :  { %4191 = vmatpush3.bf16.msra.mxu0 %v5294_v22 }
0x4957   :  { %4204 = vmatprep.subr.bf16.mxu0 %v4637_v1 }
0x4a24   :  { %v2651_v16 = vpop.f32.mrb[60].mxu0 }
0x4a25   :  { %v2657_v18 = vadd.f32 %v2651_v16, %v2609_v15  ;;  %v4178_v3 = vpop.f32.mrb[61].mxu0 }
0x4a26   :  { %v2654_v26 = vpop.f32.mrb[62].mxu0 }
0x4a27   :  { %v3658_v7 = vmul.f32 -1.442695, %v2657_v18  ;;  %v4179_v10 = vpop.f32.mrb[63].mxu0 }
0x4a29   :  { %4573 = vpow2.f32 %v3658_v7 }
0x4a2a   :  { %4575 = vtanh.f32 %v2657_v18 }
0x4a33   :  { %v4574_v31 = vpop.eup %4573 }
0x4a34   :  { %v2661_v32 = vadd.f32 1.0, %v4574_v31  ;;  %v4576_v33 = vpop.eup %4575 }
0x4a36   :  { %4577 = vrcp.f32 %v2661_v32 }
0x4a40   :  { %v4578_v36 = vpop.eup %4577 }
0x4a41   :  { %v2665_v37 = vsel %vm4770_vm4, %v4576_v33, %v4578_v36 }
0x4a42   :  { %2668 = vrot.lane.b32.xlu0 %v2665_v37, %s4640_s3  ;;  %v2666_v50 = vmul.f32 %v2665_v37, %v2597_v30 }
0x4ab4   :  { %v2669_v38 = vpop.permute.xlu0 %2668 }
0x4ab5   :  { %v2671_v5 = vmul.f32 %v2669_v38, %v2665_v37 }
0x4ab7   :  { %2673 = vrot.lane.b32.xlu1 %v2671_v5, %s4641_s25 }
0x4b29   :  { %v2674_v40 = vpop.permute.xlu1 %2673 }
0x4b2a   :  { %v2676_v35 = vadd.f32 %v2674_v40, %v2666_v50  ;;  %v2171_v50 = vadd.f32 %v5317_v29, %v5274_v6 }
0x4b2c   :  { %4579 = vtanh.f32 %v2676_v35  ;;  %v3641_v40 = vmul.f32 -1.442695, %v2171_v50 }
0x4b36   :  { %v4580_v11 = vpop.eup %4579 }
0x4b37   :  { %2679 = vrot.lane.b32.xlu0 %v4580_v11, %s4640_s3 }
0x4ba9   :  { %v2680_v20 = vpop.permute.xlu0 %2679 }
0x4baa   :  { %v5392_v8 = vmul.f32 %v2680_v20, %v2665_v37 }
0x4bac   :  { %v2689_v51 = vpack.c.bf16 %v5392_v8, %v5392_v8 }
0x4bae   :  { %2691 = vrot.lane.b32.xlu1 %v2689_v51, %s4641_s25 }
0x4c20   :  { %v2692_v56 = vpop.permute.xlu1 %2691 }
0x4c21   :  { %4185 = vmatmul.mubr.msk.bf16.vlgmr.msra.gmra.mrb[68].mxu1 %vm138_vm5, %v2692_v56 }
0x4c22   :  { %4197 = vmatpush3.bf16.msra.mxu1 %v5287_v21  ;;  %4200 = vmatprep.mubr.msk.bf16.mxu1 %vm4638_vm0, %v4637_v1 }
0x4c23   :  { %4198 = vmatprep.subr.bf16.mxu1 %v4637_v1 }
0x4c26   :  { %4199 = vmatpush3.bf16.msra.mxu1 %v5294_v22 }
0x4c27   :  { %4216 = vmatprep.subr.bf16.mxu1 %v4637_v1 }
0x4cf4   :  { %v2730_v25 = vpop.f32.mrb[68].mxu1 }
0x4cf5   :  { %v2736_v41 = vadd.f32 %v2730_v25, %v2688_v34  ;;  %v4186_v42 = vpop.f32.mrb[69].mxu1 }
0x4cf6   :  { %v2733_v55 = vpop.f32.mrb[70].mxu1 }
0x4cf7   :  { %v3660_v45 = vmul.f32 -1.442695, %v2736_v41  ;;  %v4187_v47 = vpop.f32.mrb[71].mxu1 }
0x4cf9   :  { %4581 = vpow2.f32 %v3660_v45 }
0x4cfa   :  { %4583 = vtanh.f32 %v2736_v41 }
0x4d03   :  { %v4582_v48 = vpop.eup %4581 }
0x4d04   :  { %v2740_v49 = vadd.f32 1.0, %v4582_v48  ;;  %v4584_v21 = vpop.eup %4583 }
0x4d06   :  { %4585 = vrcp.f32 %v2740_v49  ;;  %v2846_v49 = vld [vmem:[#allocation2] sm:$0x3] }
0x4d10   :  { %v4586_v52 = vpop.eup %4585 }
0x4d11   :  { %v2744_v53 = vsel %vm4770_vm4, %v4584_v21, %v4586_v52 }
0x4d12   :  { %2747 = vrot.lane.b32.xlu0 %v2744_v53, %s4640_s3  ;;  %v2745_v60 = vmul.f32 %v2744_v53, %v2676_v35 }
0x4d84   :  { %v2748_v22 = vpop.permute.xlu0 %2747 }
0x4d85   :  { %v2750_v2 = vmul.f32 %v2748_v22, %v2744_v53 }
0x4d87   :  { %2752 = vrot.lane.b32.xlu1 %v2750_v2, %s4641_s25 }
0x4df9   :  { %v2753_v61 = vpop.permute.xlu1 %2752 }
0x4dfa   :  { %v2755_v63 = vadd.f32 %v2753_v61, %v2745_v60 }
0x4dfc   :  { %4587 = vtanh.f32 %v2755_v63 }
0x4e06   :  { %v4588_v0 = vpop.eup %4587 }
0x4e07   :  { %2758 = vrot.lane.b32.xlu0 %v4588_v0, %s4640_s3 }
0x4e79   :  { %v2759_v57 = vpop.permute.xlu0 %2758 }
0x4e7a   :  { %v5409_v4 = vmul.f32 %v2759_v57, %v2744_v53 }
0x4e7c   :  { %v2768_v44 = vpack.c.bf16 %v5409_v4, %v5409_v4 }
0x4e7e   :  { %2770 = vrot.lane.b32.xlu1 %v2768_v44, %s4641_s25 }
0x4ef0   :  { %v2771_v30 = vpop.permute.xlu1 %2770 }
0x4ef1   :  { %4193 = vmatmul.mubr.msk.bf16.vlgmr.msra.gmra.mrb[64].mxu0 %vm138_vm5, %v2771_v30 }
0x4ef2   :  { %4212 = vmatprep.mubr.msk.bf16.mxu0 %vm4638_vm0, %v4637_v1 }
0x4fc4   :  { %v2809_v58 = vpop.f32.mrb[64].mxu0 }
0x4fc5   :  { %v2815_v12 = vadd.f32 %v2809_v58, %v2767_v62  ;;  %v4194_v14 = vpop.f32.mrb[65].mxu0 }
0x4fc6   :  { %v2812_v15 = vpop.f32.mrb[66].mxu0  ;;  %v4325_v14 = vld [vmem:[%s5664_s13 + $0x20] sm:$0xff]  }
0x4fc7   :  { %v3662_v16 = vmul.f32 -1.442695, %v2815_v12  ;;  %v4195_v18 = vpop.f32.mrb[67].mxu0  ;;  %4205 = vmatpush3.bf16.msra.mxu0 %v4325_v14  ;;  %v4327_v15 = vld [vmem:[%s5664_s13 + $0x30] sm:$0xff]   ;;  %v4354_v14 = vld [vmem:[%s5664_s13 + $0xe8] sm:$0xff]  }
0x4fc8   :  { %4206 = vmatprep.subr.bf16.mxu0 %v4637_v1  ;;  %v4328_v18 = vld [vmem:[%s5664_s13 + $0x38] sm:$0xff]  }
0x4fc9   :  { %4589 = vpow2.f32 %v3662_v16 }
0x4fca   :  { %4591 = vtanh.f32 %v2815_v12 }
0x4fcb   :  { %4207 = vmatpush3.bf16.msra.mxu0 %v4326_v24 }
0x4fcc   :  { %4208 = vmatprep.subr.bf16.mxu0 %v4637_v1 }
0x4fcf   :  { %4209 = vmatpush3.bf16.msra.mxu0 %v4327_v15  ;;  %v4355_v15 = vld [vmem:[%s5664_s13 + $0xf0] sm:$0xff]  }
0x4fd0   :  { %4210 = vmatprep.subr.bf16.mxu0 %v4637_v1 }
0x4fd3   :  { %v4590_v3 = vpop.eup %4589  ;;  %4211 = vmatpush3.bf16.msra.mxu0 %v4328_v18 }
0x4fd4   :  { %v2819_v26 = vadd.f32 1.0, %v4590_v3  ;;  %v4592_v7 = vpop.eup %4591  ;;  %4228 = vmatprep.subr.bf16.mxu0 %v4637_v1  ;;  %v4329_v3 = vld [vmem:[%s5664_s13] sm:$0xff]  }
0x4fd6   :  { %4593 = vrcp.f32 %v2819_v26 }
0x4fe0   :  { %v4594_v10 = vpop.eup %4593 }
0x4fe1   :  { %v2823_v31 = vsel %vm4770_vm4, %v4592_v7, %v4594_v10 }
0x4fe2   :  { %2826 = vrot.lane.b32.xlu0 %v2823_v31, %s4640_s3  ;;  %v2824_v36 = vmul.f32 %v2823_v31, %v2755_v63 }
0x5054   :  { %v2827_v32 = vpop.permute.xlu0 %2826 }
0x5055   :  { %v2829_v33 = vmul.f32 %v2827_v32, %v2823_v31 }
0x5057   :  { %2831 = vrot.lane.b32.xlu1 %v2829_v33, %s4641_s25  ;;  %v4331_v33 = vld [vmem:[%s5664_s13 + $0x40] sm:$0xff]  }
0x50c9   :  { %v2832_v37 = vpop.permute.xlu1 %2831 }
0x50ca   :  { %v2834_v38 = vadd.f32 %v2832_v37, %v2824_v36 }
0x50cc   :  { %4595 = vtanh.f32 %v2834_v38 }
0x50cd   :  { %4597 = vpow2.f32 %v3641_v40 }
0x50d6   :  { %v4596_v5 = vpop.eup %4595 }
0x50d7   :  { %2837 = vrot.lane.b32.xlu0 %v4596_v5, %s4640_s3  ;;  %v4598_v35 = vpop.eup %4597 }
0x50d8   :  { %v2175_v11 = vadd.f32 1.0, %v4598_v35 }
0x50da   :  { %4599 = vrcp.f32 %v2175_v11 }
0x50db   :  { %4601 = vtanh.f32 %v2171_v50 }
0x50e4   :  { %v4600_v34 = vpop.eup %4599 }
0x50e5   :  { %v4602_v25 = vpop.eup %4601 }
0x50e6   :  { %v5427_v41 = vsel %vm4770_vm4, %v4602_v25, %v4600_v34  ;;  %v4338_v34 = vld [vmem:[%s5664_s13 + $0x68] sm:$0xff]   ;;  %v4339_v25 = vld [vmem:[%s5664_s13 + $0x80] sm:$0xff]  }
0x50e7   :  { %v2180_v55 = vmul.f32 %v5427_v41, %v5280_v19 }
0x5149   :  { %v2838_v20 = vpop.permute.xlu0 %2837 }
0x514a   :  { %v2840_v51 = vmul.f32 %v2838_v20, %v2823_v31 }
0x514c   :  { %v2847_v56 = vpack.c.bf16 %v2840_v51, %v2840_v51 }
0x514e   :  { %2849 = vrot.lane.b32.xlu1 %v2847_v56, %s4641_s25 }
0x5152   :  { %2182 = vrot.lane.b32.xlu1 %v5427_v41, %s4640_s3 }
0x51c0   :  { %v2850_v6 = vpop.permute.xlu1 %2849 }
0x51c1   :  { %4201 = vmatmul.mubr.msk.bf16.vlgmr.msra.gmra.mrb[72].mxu1 %vm138_vm5, %v2850_v6 }
0x51c2   :  { %4224 = vmatprep.mubr.msk.bf16.mxu1 %vm4638_vm0, %v4637_v1  ;;  %4217 = vmatpush3.bf16.msra.mxu1 %v4329_v3 }
0x51c3   :  { %4218 = vmatprep.subr.bf16.mxu1 %v4637_v1 }
0x51c4   :  { %v2183_v29 = vpop.permute.xlu1 %2182 }
0x51c5   :  { %v2185_v42 = vmul.f32 %v2183_v29, %v5427_v41  ;;  %v4340_v29 = vld [vmem:[%s5664_s13 + $0x70] sm:$0xff]  }
0x51c7   :  { %2187 = vrot.lane.b32.xlu1 %v2185_v42, %s4641_s25  ;;  %v4341_v42 = vld [vmem:[%s5664_s13 + $0x88] sm:$0xff]  }
0x5239   :  { %v2188_v45 = vpop.permute.xlu1 %2187 }
0x523a   :  { %v2190_v47 = vadd.f32 %v2188_v45, %v2180_v55  ;;  %v4342_v45 = vld [vmem:[%s5664_s13 + $0x78] sm:$0xff]  }
0x523c   :  { %4603 = vtanh.f32 %v2190_v47  ;;  %v4343_v47 = vld [vmem:[%s5664_s13 + $0x90] sm:$0xff]  }
0x5246   :  { %v4604_v48 = vpop.eup %4603 }
0x5247   :  { %2193 = vrot.lane.b32.xlu1 %v4604_v48, %s4640_s3 }
0x524b   :  { %2842 = vrot.lane.b32.xlu1 %v2840_v51, %s4640_s3 }
0x5294   :  { %v2888_v21 = vpop.f32.mrb[72].mxu1 }
0x5295   :  { %v2894_v52 = vadd.f32 %v2888_v21, %v2846_v49  ;;  %v4202_v53 = vpop.f32.mrb[73].mxu1  ;;  %v4344_v21 = vld [vmem:[%s5664_s13 + $0x98] sm:$0xff]  }
0x5296   :  { %v2891_v22 = vpop.f32.mrb[74].mxu1 }
0x5297   :  { %v3664_v2 = vmul.f32 -1.442695, %v2894_v52  ;;  %v4203_v60 = vpop.f32.mrb[75].mxu1 }
0x5298   :  { %v4347_v60 = vld [vmem:[%s5664_s13 + $0xc0] sm:$0xff]  }
0x5299   :  { %4605 = vpow2.f32 %v3664_v2  ;;  %v4346_v2 = vld [vmem:[%s5664_s13 + $0xa8] sm:$0xff]  }
0x529a   :  { %4607 = vtanh.f32 %v2894_v52  ;;  %v4345_v52 = vld [vmem:[%s5664_s13 + $0xa0] sm:$0xff]  }
0x52a3   :  { %v4606_v61 = vpop.eup %4605 }
0x52a4   :  { %v2898_v63 = vadd.f32 1.0, %v4606_v61  ;;  %v4608_v19 = vpop.eup %4607 }
0x52a6   :  { %4609 = vrcp.f32 %v2898_v63  ;;  %v4348_v63 = vld [vmem:[%s5664_s13 + $0xb0] sm:$0xff]  }
0x52b0   :  { %v4610_v0 = vpop.eup %4609 }
0x52b1   :  { %v2902_v57 = vsel %vm4770_vm4, %v4608_v19, %v4610_v0  ;;  %v4349_v19 = vld [vmem:[%s5664_s13 + $0xc8] sm:$0xff]   ;;  %v4350_v0 = vld [vmem:[%s5664_s13 + $0xb8] sm:$0xff]  }
0x52b2   :  { %2905 = vrot.lane.b32.xlu0 %v2902_v57, %s4640_s3  ;;  %v2903_v62 = vmul.f32 %v2902_v57, %v2834_v38 }
0x5324   :  { %v2906_v44 = vpop.permute.xlu0 %2905 }
0x5325   :  { %v2908_v30 = vmul.f32 %v2906_v44, %v2902_v57 }
0x5327   :  { %2910 = vrot.lane.b32.xlu0 %v2908_v30, %s4641_s25  ;;  %v4352_v30 = vld [vmem:[%s5664_s13 + $0xd8] sm:$0xff]  }
0x5399   :  { %v2911_v58 = vpop.permute.xlu0 %2910 }
0x539a   :  { %v2913_v12 = vadd.f32 %v2911_v58, %v2903_v62  ;;  %v4353_v62 = vld [vmem:[%s5664_s13 + $0xe0] sm:$0xff]  }
0x539c   :  { %4611 = vtanh.f32 %v2913_v12 }
0x53a6   :  { %v4612_v16 = vpop.eup %4611 }
0x53a7   :  { %2916 = vrot.lane.b32.xlu0 %v4612_v16, %s4640_s3  ;;  %v4356_v16 = vld [vmem:[%s5664_s13 + $0xf8] sm:$0xff]  }
0x53ab   :  { %1724 = vrot.lane.b32.xlu0 %v5175_v13, %s4641_s25  ;;  %v4330_v13 = vld [vmem:[%s5664_s13 + $0x8] sm:$0xff]  }
0x53ac   :  { %4219 = vmatpush3.bf16.msra.mxu1 %v4330_v13 }
0x53ad   :  { %4220 = vmatprep.subr.bf16.mxu1 %v4637_v1 }
0x53af   :  { %1645 = vrot.lane.b32.xlu0 %v5158_v43, %s4641_s25  ;;  %v2194_v43 = vpop.permute.xlu1 %2193 }
0x53b3   :  { %1803 = vrot.lane.b32.xlu0 %v5192_v39, %s4641_s25  ;;  %v2196_v39 = vmul.f32 %v2194_v43, %v5427_v41  ;;  %v2843_v7 = vpop.permute.xlu1 %2842 }
0x53b7   :  { %1882 = vrot.lane.b32.xlu0 %v5209_v59, %s4641_s25  ;;  %v4332_v59 = vld [vmem:[%s5664_s13 + $0x10] sm:$0xff]  }
0x53b8   :  { %4221 = vmatpush3.bf16.msra.mxu1 %v4332_v59 }
0x53b9   :  { %4222 = vmatprep.subr.bf16.mxu1 %v4637_v1 }
0x53bb   :  { %1961 = vrot.lane.b32.xlu0 %v5226_v23, %s4641_s25  ;;  %v4334_v23 = vld [vmem:[%s5664_s13 + $0x18] sm:$0xff]  }
0x53bc   :  { %4223 = vmatpush3.bf16.msra.mxu1 %v4334_v23 }
0x53bd   :  { %4240 = vmatprep.subr.bf16.mxu1 %v4637_v1 }
0x53bf   :  { %2040 = vrot.lane.b32.xlu0 %v5243_v54, %s4641_s25 }
0x53c3   :  { %2119 = vrot.lane.b32.xlu0 %v5298_v27, %s4641_s25 }
0x53c7   :  { %2198 = vrot.lane.b32.xlu0 %v2196_v39, %s4641_s25 }
0x5419   :  { %v2917_v54 = vpop.permute.xlu0 %2916 }
0x541a   :  { %v2919_v27 = vmul.f32 %v2917_v54, %v2902_v57  ;;  %v4351_v57 = vld [vmem:[%s5664_s13 + $0xd0] sm:$0xff]  }
0x541c   :  { %2921 = vrot.lane.b32.xlu1 %v2919_v27, %s4640_s3 }
0x541d   :  { %v1725_v26 = vpop.permute.xlu0 %1724 }
0x541e   :  { %1727 = vst.msk [vmem:[#allocation4 + $0x2] sm:$0x3] %vm217_vm6, %v1725_v26 }
0x541f   :  { %2845 = vst.msk [vmem:[#allocation4 + $0x2] sm:$0x3] %vm917_vm7, %v2843_v7 }
0x5420   :  { %2763 = vrot.lane.b32.xlu1 %v5409_v4, %s4640_s3 }
0x5421   :  { %v1646_v10 = vpop.permute.xlu0 %1645 }
0x5422   :  { %1648 = vst.msk [vmem:[#allocation4] sm:$0x3] %vm217_vm6, %v1646_v10 }
0x5424   :  { %2684 = vrot.lane.b32.xlu1 %v5392_v8, %s4640_s3  ;;  %v4333_v8 = vld [vmem:[%s5664_s13 + $0x48] sm:$0xff]  }
0x5425   :  { %v1804_v31 = vpop.permute.xlu0 %1803 }
0x5426   :  { %1806 = vst.msk [vmem:[#allocation4 + $0x4] sm:$0x3] %vm217_vm6, %v1804_v31  ;;  %v2935_v32 = vld [vmem:[#allocation4 + $0x2] sm:$0x3] }
0x5427   :  { %v2936_v36 = vpack.c.bf16 %v2935_v32, %v2935_v32 }
0x5428   :  { %2605 = vrot.lane.b32.xlu1 %v5375_v9, %s4640_s3  ;;  %v4335_v9 = vld [vmem:[%s5664_s13 + $0x50] sm:$0xff]  }
0x5429   :  { %v1883_v37 = vpop.permute.xlu0 %1882  ;;  %4213 = vmatmul.mubr.msk.bf16.vlgmr.msra.gmra.mrb[68].mxu0 %vm1514_vm8, %v2936_v36 }
0x542a   :  { %1885 = vst.msk [vmem:[#allocation4 + $0x6] sm:$0x3] %vm217_vm6, %v1883_v37  ;;  %4229 = vmatpush3.bf16.msra.mxu0 %v4331_v33  ;;  %4236 = vmatprep.mubr.msk.bf16.mxu0 %vm4638_vm0, %v4637_v1 }
0x542b   :  { %4230 = vmatprep.subr.bf16.mxu0 %v4637_v1 }
0x542c   :  { %2526 = vrot.lane.b32.xlu1 %v5358_v28, %s4640_s3  ;;  %v4336_v28 = vld [vmem:[%s5664_s13 + $0x58] sm:$0xff]  }
0x542d   :  { %v1962_v4 = vpop.permute.xlu0 %1961 }
0x542e   :  { %1964 = vst.msk [vmem:[#allocation4 + $0x8] sm:$0x3] %vm217_vm6, %v1962_v4  ;;  %4231 = vmatpush3.bf16.msra.mxu0 %v4333_v8 }
0x542f   :  { %4232 = vmatprep.subr.bf16.mxu0 %v4637_v1 }
0x5430   :  { %2447 = vrot.lane.b32.xlu1 %v5341_v17, %s4640_s3 }
0x5431   :  { %v2041_v38 = vpop.permute.xlu0 %2040 }
0x5432   :  { %2043 = vst.msk [vmem:[#allocation4 + $0xa] sm:$0x3] %vm217_vm6, %v2041_v38  ;;  %4233 = vmatpush3.bf16.msra.mxu0 %v4335_v9 }
0x5433   :  { %4234 = vmatprep.subr.bf16.mxu0 %v4637_v1 }
0x5434   :  { %2368 = vrot.lane.b32.xlu1 %v5324_v46, %s4640_s3  ;;  %v4337_v46 = vld [vmem:[%s5664_s13 + $0x60] sm:$0xff]  }
0x5435   :  { %v2120_v5 = vpop.permute.xlu0 %2119 }
0x5436   :  { %2122 = vst.msk [vmem:[#allocation4 + $0xc] sm:$0x3] %vm217_vm6, %v2120_v5  ;;  %4235 = vmatpush3.bf16.msra.mxu0 %v4336_v28 }
0x5437   :  { %4252 = vmatprep.subr.bf16.mxu0 %v4637_v1 }
0x5439   :  { %v2199_v17 = vpop.permute.xlu0 %2198 }
0x543a   :  { %2201 = vst.msk [vmem:[#allocation4 + $0xe] sm:$0x3] %vm217_vm6, %v2199_v17 }
0x548e   :  { %v2922_v50 = vpop.permute.xlu1 %2921 }
0x548f   :  { %2924 = vst.msk [vmem:[#allocation4] sm:$0x3] %vm917_vm7, %v2922_v50 }
0x5492   :  { %v2764_v40 = vpop.permute.xlu1 %2763 }
0x5493   :  { %2766 = vst.msk [vmem:[#allocation4 + $0x4] sm:$0x3] %vm917_vm7, %v2764_v40 }
0x5496   :  { %v2685_v35 = vpop.permute.xlu1 %2684  ;;  %v2925_v11 = vld [vmem:[#allocation4] sm:$0x3] }
0x5497   :  { %2687 = vst.msk [vmem:[#allocation4 + $0x6] sm:$0x3] %vm917_vm7, %v2685_v35  ;;  %v2926_v20 = vpack.c.bf16 %v2925_v11, %v2925_v11 }
0x5499   :  { %4225 = vmatmul.mubr.msk.bf16.vlgmr.msra.gmra.mrb[76].mxu1 %vm1514_vm8, %v2926_v20 }
0x549a   :  { %4241 = vmatpush3.bf16.msra.mxu1 %v4337_v46  ;;  %v2606_v51 = vpop.permute.xlu1 %2605  ;;  %v3080_v56 = vld [vmem:[#allocation4 + $0x4] sm:$0x3]  ;;  %4248 = vmatprep.mubr.msk.bf16.mxu1 %vm4638_vm0, %v4637_v1 }
0x549b   :  { %2608 = vst.msk [vmem:[#allocation4 + $0x8] sm:$0x3] %vm917_vm7, %v2606_v51  ;;  %4242 = vmatprep.subr.bf16.mxu1 %v4637_v1  ;;  %v3081_v41 = vpack.c.bf16 %v3080_v56, %v3080_v56 }
0x549d   :  { %4237 = vmatmul.mubr.msk.bf16.vlgmr.msra.gmra.mrb[72].mxu0 %vm1514_vm8, %v3081_v41 }
0x549e   :  { %4243 = vmatpush3.bf16.msra.mxu1 %v4338_v34  ;;  %4253 = vmatpush3.bf16.msra.mxu0 %v4339_v25  ;;  %v2527_v6 = vpop.permute.xlu1 %2526  ;;  %v3159_v48 = vld [vmem:[#allocation4 + $0x6] sm:$0x3] }
0x549f   :  { %2529 = vst.msk [vmem:[#allocation4 + $0xa] sm:$0x3] %vm917_vm7, %v2527_v6  ;;  %4244 = vmatprep.subr.bf16.mxu1 %v4637_v1  ;;  %4254 = vmatprep.subr.bf16.mxu0 %v4637_v1  ;;  %v3160_v53 = vpack.c.bf16 %v3159_v48, %v3159_v48 }
0x54a0   :  { %4260 = vmatprep.mubr.msk.bf16.mxu0 %vm4638_vm0, %v4637_v1 }
0x54a2   :  { %4245 = vmatpush3.bf16.msra.mxu1 %v4340_v29  ;;  %4255 = vmatpush3.bf16.msra.mxu0 %v4341_v42  ;;  %v2448_v55 = vpop.permute.xlu1 %2447  ;;  %v3238_v22 = vld [vmem:[#allocation4 + $0x8] sm:$0x3]  ;;  %v3761_v29 = vld [vmem:[%s5665_s14] ss:$0 sm:$0xff] }
0x54a3   :  { %2450 = vst.msk [vmem:[#allocation4 + $0xc] sm:$0x3] %vm917_vm7, %v2448_v55  ;;  %4246 = vmatprep.subr.bf16.mxu1 %v4637_v1  ;;  %4256 = vmatprep.subr.bf16.mxu0 %v4637_v1  ;;  %v3239_v61 = vpack.c.bf16 %v3238_v22, %v3238_v22 }
0x54a6   :  { %4247 = vmatpush3.bf16.msra.mxu1 %v4342_v45  ;;  %4257 = vmatpush3.bf16.msra.mxu0 %v4343_v47  ;;  %v2369_v49 = vpop.permute.xlu1 %2368  ;;  %v3317_v44 = vld [vmem:[#allocation4 + $0xa] sm:$0x3] }
0x54a7   :  { %2371 = vst.msk [vmem:[#allocation4 + $0xe] sm:$0x3] %vm917_vm7, %v2369_v49  ;;  %4258 = vmatprep.subr.bf16.mxu0 %v4637_v1  ;;  %4264 = vmatprep.subr.bf16.mxu1 %v4637_v1  ;;  %v3318_v58 = vpack.c.bf16 %v3317_v44, %v3317_v44 }
0x54a9   :  { %4249 = vmatmul.mubr.msk.bf16.vlgmr.msra.gmra.mrb[80].mxu1 %vm1514_vm8, %v3160_v53 }
0x54aa   :  { %4259 = vmatpush3.bf16.msra.mxu0 %v4344_v21  ;;  %4265 = vmatpush3.bf16.msra.mxu1 %v4345_v52  ;;  %v3396_v12 = vld [vmem:[#allocation4 + $0xc] sm:$0x3] }
0x54ab   :  { %4266 = vmatprep.subr.bf16.mxu1 %v4637_v1  ;;  %4276 = vmatprep.subr.bf16.mxu0 %v4637_v1  ;;  %v3397_v24 = vpack.c.bf16 %v3396_v12, %v3396_v12 }
0x54ac   :  { %4272 = vmatprep.mubr.msk.bf16.mxu1 %vm4638_vm0, %v4637_v1 }
0x54ad   :  { %4261 = vmatmul.mubr.msk.bf16.vlgmr.msra.gmra.mrb[76].mxu0 %vm1514_vm8, %v3239_v61 }
0x54ae   :  { %4267 = vmatpush3.bf16.msra.mxu1 %v4346_v2  ;;  %4277 = vmatpush3.bf16.msra.mxu0 %v4347_v60  ;;  %v3475_v18 = vld [vmem:[#allocation4 + $0xe] sm:$0x3] }
0x54af   :  { %4268 = vmatprep.subr.bf16.mxu1 %v4637_v1  ;;  %4278 = vmatprep.subr.bf16.mxu0 %v4637_v1  ;;  %v3476_v3 = vpack.c.bf16 %v3475_v18, %v3475_v18 }
0x54b0   :  { %4284 = vmatprep.mubr.msk.bf16.mxu0 %vm4638_vm0, %v4637_v1 }
0x54b2   :  { %4269 = vmatpush3.bf16.msra.mxu1 %v4348_v63  ;;  %4279 = vmatpush3.bf16.msra.mxu0 %v4349_v19 }
0x54b3   :  { %4270 = vmatprep.subr.bf16.mxu1 %v4637_v1  ;;  %4280 = vmatprep.subr.bf16.mxu0 %v4637_v1 }
0x54b6   :  { %4271 = vmatpush3.bf16.msra.mxu1 %v4350_v0  ;;  %4281 = vmatpush3.bf16.msra.mxu0 %v4351_v57 }
0x54b7   :  { %4282 = vmatprep.subr.bf16.mxu0 %v4637_v1  ;;  %4288 = vmatprep.subr.bf16.mxu1 %v4637_v1 }
0x54b9   :  { %4273 = vmatmul.mubr.msk.bf16.vlgmr.msra.gmra.mrb[84].mxu1 %vm1514_vm8, %v3318_v58 }
0x54ba   :  { %4283 = vmatpush3.bf16.msra.mxu0 %v4352_v30  ;;  %4289 = vmatpush3.bf16.msra.mxu1 %v4353_v62 }
0x54bb   :  { %4290 = vmatprep.subr.bf16.mxu1 %v4637_v1  ;;  %4296 = vmatprep.mubr.msk.bf16.mxu1 %vm4638_vm0, %v4637_v1 }
0x54bd   :  { %4285 = vmatmul.mubr.msk.bf16.vlgmr.msra.gmra.mrb[80].mxu0 %vm1514_vm8, %v3397_v24 }
0x54be   :  { %4291 = vmatpush3.bf16.msra.mxu1 %v4354_v14 }
0x54bf   :  { %4292 = vmatprep.subr.bf16.mxu1 %v4637_v1 }
0x54c2   :  { %4293 = vmatpush3.bf16.msra.mxu1 %v4355_v15 }
0x54c3   :  { %4294 = vmatprep.subr.bf16.mxu1 %v4637_v1 }
0x54c6   :  { %4295 = vmatpush3.bf16.msra.mxu1 %v4356_v16 }
0x54c9   :  { %4297 = vmatmul.mubr.msk.bf16.vlgmr.msra.gmra.mrb[88].mxu1 %vm1514_vm8, %v3476_v3 }
0x54fc   :  { %v3007_v13 = vpop.f32.mrb[68].mxu0 }
0x54fd   :  { %v4214_v43 = vpop.f32.mrb[69].mxu0 }
0x54fe   :  { %v3010_v39 = vpop.f32.mrb[70].mxu0 }
0x54ff   :  { %v4215_v59 = vpop.f32.mrb[71].mxu0 }
0x556c   :  { %v3074_v23 = vpop.f32.mrb[76].mxu1 }
0x556d   :  { %v3075_v54 = vadd.f32 %v3074_v23, %v3007_v13  ;;  %v4226_v27 = vpop.f32.mrb[77].mxu1 }
0x556e   :  { %v3077_v26 = vpop.f32.mrb[78].mxu1 }
0x556f   :  { %v4227_v7 = vpop.f32.mrb[79].mxu1 }
0x5570   :  { %v3152_v10 = vpop.f32.mrb[72].mxu0 }
0x5571   :  { %v3158_v31 = vadd.f32 %v3152_v10, %v3075_v54  ;;  %v4238_v32 = vpop.f32.mrb[73].mxu0 }
0x5572   :  { %v3155_v33 = vpop.f32.mrb[74].mxu0 }
0x5573   :  { %v4239_v36 = vpop.f32.mrb[75].mxu0 }
0x557c   :  { %v3231_v1 = vpop.f32.mrb[80].mxu1 }
0x557d   :  { %v3237_v37 = vadd.f32 %v3231_v1, %v3158_v31  ;;  %v4250_v8 = vpop.f32.mrb[81].mxu1 }
0x557e   :  { %v3234_v4 = vpop.f32.mrb[82].mxu1 }
0x557f   :  { %v4251_v9 = vpop.f32.mrb[83].mxu1 }
0x5580   :  { %v3310_v38 = vpop.f32.mrb[76].mxu0 }
0x5581   :  { %v3316_v28 = vadd.f32 %v3310_v38, %v3237_v37  ;;  %v4262_v5 = vpop.f32.mrb[77].mxu0 }
0x5582   :  { %v3313_v17 = vpop.f32.mrb[78].mxu0 }
0x5583   :  { %v4263_v50 = vpop.f32.mrb[79].mxu0 }
0x558c   :  { %v3389_v40 = vpop.f32.mrb[84].mxu1 }
0x558d   :  { %v3395_v35 = vadd.f32 %v3389_v40, %v3316_v28  ;;  %v4274_v11 = vpop.f32.mrb[85].mxu1 }
0x558e   :  { %v3392_v46 = vpop.f32.mrb[86].mxu1 }
0x558f   :  { %v4275_v20 = vpop.f32.mrb[87].mxu1 }
0x5590   :  { %v3468_v51 = vpop.f32.mrb[80].mxu0 }
0x5591   :  { %v3474_v56 = vadd.f32 %v3468_v51, %v3395_v35  ;;  %v4286_v34 = vpop.f32.mrb[81].mxu0 }
0x5592   :  { %v3471_v25 = vpop.f32.mrb[82].mxu0 }
0x5593   :  { %v4287_v41 = vpop.f32.mrb[83].mxu0 }
0x559c   :  { %v3547_v6 = vpop.f32.mrb[88].mxu1 }
0x559d   :  { %v3553_v42 = vadd.f32 %v3547_v6, %v3474_v56  ;;  %v4298_v55 = vpop.f32.mrb[89].mxu1 }
0x559e   :  { %v3550_v45 = vpop.f32.mrb[90].mxu1 }
0x559f   :  { %v3561_v47 = vadd.f32 %v3761_v29, %v3553_v42  ;;  %v4299_v48 = vpop.f32.mrb[91].mxu1 }
0x55a1   :  { %3563 = vst.msk [vmem:[#allocation5] sm:$0x3] %vm3562_vm9, %v3561_v47 }
0x55a2   :  { %4624 = shalt.err (!%p4621_p4)
}
0x55a3   :  { %s4625_s14 = scalar_lea.hbm %s5666_s15, 32 }
0x55a4   :  { %p4626_p5 = scmp.ne.s32.totalorder %s5666_s15, %s4625_s14  ;;  %p4629_p6 = scmp.lt.u32.totalorder %s4625_s14, %s5666_s15 }
0x55a6   :  { %p4631_p7 = pnand %p4629_p6, %p4626_p5 }
0x55a8   :  { %4634 = shalt.err (!%p4631_p7)
}
0x55a9   :  { %3573 = dma.vmem_to_hbm [thread:$0]  %s3571_s7, 32, %s5666_s15, [#allocation6]  }
0x55aa   :  { %4635 = dma.done.wait [#allocation6], 32  }
0x55ab   :  { %4636 = vsyncadd [#allocation6], 4294967264 }
0x55ac   :  { %3577 = vsyncpa [#allocation6], 1 }

</bundles_post_ra>
